<compile_context>
chip_gen: v5e
topology: v5e:2x2
jax: 0.10.0
libtpu: 0.0.40
codegen_flags: <defaults>
</compile_context>

<pallas_src>
import jax
import jax.numpy as jnp
from jax import lax
from jax.experimental import pallas as pl
from jax.experimental.pallas import tpu as pltpu

H1, H2, H3 = 64, 32, 64  # encoder / latent / decoder hidden sizes


def lstm_ae_kernel(x_ref,
                   wih1_ref, whh1_ref, b1_ref,
                   w2_ref, b2_ref,
                   w3_ref, b3_ref,
                   wout_ref, bout_ref,
                   out_ref,
                   gi1_ref, dec_ref):
    T, B, C = x_ref.shape

    # ---- hoist layer-1 input projection out of the recurrence ------------
    # (T*B, C) @ (C, 4H1) + b1  -> one MXU-shaped matmul instead of T tiny ones.
    x2d = x_ref[...].reshape(T * B, C)
    gi1 = (jnp.dot(x2d, wih1_ref[...], preferred_element_type=jnp.float32)
           + b1_ref[...])
    gi1_ref[...] = gi1.reshape(T, B, 4 * H1)

    # ---- hoist loop-invariant loads (JAX does not CSE broadcasts) --------
    whh1 = whh1_ref[...]
    w2 = w2_ref[...]
    b2 = b2_ref[...]
    w3 = w3_ref[...]
    b3 = b3_ref[...]

    def cell(gates, c_prev, H):
        # gate order is [i, f, o, g]: one sigmoid over 3H lanes, one tanh over H.
        s = jax.nn.sigmoid(gates[:, :3 * H])
        i = s[:, 0 * H:1 * H]
        f = s[:, 1 * H:2 * H]
        o = s[:, 2 * H:3 * H]
        g = jnp.tanh(gates[:, 3 * H:])
        c_new = f * c_prev + i * g
        h_new = o * jnp.tanh(c_new)
        return h_new, c_new

    def step(t, carry):
        h1, c1, h2, c2, h3, c3 = carry
        # layer 1: precomputed input gates + recurrent term only.
        g1 = gi1_ref[t] + jnp.dot(h1, whh1, preferred_element_type=jnp.float32)
        h1, c1 = cell(g1, c1, H1)
        # layer 2: fused [h1, h2] @ [Wih2; Whh2]
        g2 = jnp.dot(jnp.concatenate([h1, h2], axis=1), w2,
                     preferred_element_type=jnp.float32) + b2
        h2, c2 = cell(g2, c2, H2)
        # layer 3: fused [h2, h3] @ [Wih3; Whh3]
        g3 = jnp.dot(jnp.concatenate([h2, h3], axis=1), w3,
                     preferred_element_type=jnp.float32) + b3
        h3, c3 = cell(g3, c3, H3)
        # lane-dense (64-wide) per-step store; output head applied after loop.
        dec_ref[t] = h3
        return (h1, c1, h2, c2, h3, c3)

    z = lambda H: jnp.zeros((B, H), jnp.float32)
    carry0 = (z(H1), z(H1), z(H2), z(H2), z(H3), z(H3))
    lax.fori_loop(0, T, step, carry0, unroll=True)

    # ---- output projection outside the recurrence: one matmul + one store -
    dec2d = dec_ref[...].reshape(T * B, H3)
    y = (jnp.dot(dec2d, wout_ref[...], preferred_element_type=jnp.float32)
         + bout_ref[...])
    out_ref[...] = y.reshape(T, B, C)


def lstm_autoencoder_forward(x, params):
    """x: (B, T, C) batch-first, like the PyTorch module. Returns (B, T, C)."""
    B, T, C = x.shape
    B_pad = max(8, ((B + 7) // 8) * 8)            # sublane multiple
    x_tm = jnp.transpose(x, (1, 0, 2)).astype(jnp.float32)   # (T, B, C)
    if B_pad != B:
        x_tm = jnp.pad(x_tm, ((0, 0), (0, B_pad - B), (0, 0)))

    args = (x_tm,
            params['wih1'], params['whh1'], params['b1'],
            params['w2'], params['b2'],
            params['w3'], params['b3'],
            params['wout'], params['bout'])
    vmem = pl.BlockSpec(memory_space=pltpu.MemorySpace.VMEM)

    out_tm = pl.pallas_call(
        lstm_ae_kernel,
        out_shape=jax.ShapeDtypeStruct((T, B_pad, C), jnp.float32),
        in_specs=[vmem] * len(args),
        out_specs=vmem,
        scratch_shapes=[pltpu.VMEM((T, B_pad, 4 * H1), jnp.float32),  # gates_in1
                        pltpu.VMEM((T, B_pad, H3), jnp.float32)],     # decoder h
    )(*args)
    # TODO(synk): for large (T, B) add a batch grid (parallel, 2 TCs on v7x) and
    # tile the T axis instead of whole-array VMEM residency.
    return jnp.transpose(out_tm[:, :B, :], (1, 0, 2))          # back to (B, T, C)


def init_params(key, input_channels=2):
    """Torch-style init U(-1/sqrt(H), 1/sqrt(H)); gates reordered to [i,f,o,g],
    Wih/Whh pre-transposed, layers 2/3 fused to a single [Wih; Whh] matrix."""

    def uni(k, shape, bound):
        return jax.random.uniform(k, shape, jnp.float32, -bound, bound)

    def torch_lstm(k, I, H):
        k, k1, k2, k3, k4 = jax.random.split(k, 5)
        bound = 1.0 / float(H) ** 0.5
        w_ih = uni(k1, (4 * H, I), bound)
        w_hh = uni(k2, (4 * H, H), bound)
        b = uni(k3, (4 * H,), bound) + uni(k4, (4 * H,), bound)  # b_ih + b_hh
        return k, w_ih, w_hh, b

    def reorder(a, H):   # torch rows [i, f, g, o] -> kernel rows [i, f, o, g]
        return jnp.concatenate(
            [a[0 * H:1 * H], a[1 * H:2 * H], a[3 * H:4 * H], a[2 * H:3 * H]],
            axis=0)

    params = {}
    k = key

    k, w_ih1, w_hh1, b1 = torch_lstm(k, input_channels, H1)
    params['wih1'] = reorder(w_ih1, H1).T            # (C, 4H1)
    params['whh1'] = reorder(w_hh1, H1).T            # (H1, 4H1)
    params['b1'] = reorder(b1, H1)[None, :]          # (1, 4H1)

    k, w_ih2, w_hh2, b2 = torch_lstm(k, H1, H2)
    params['w2'] = jnp.concatenate(
        [reorder(w_ih2, H2).T, reorder(w_hh2, H2).T], axis=0)   # (H1+H2, 4H2)
    params['b2'] = reorder(b2, H2)[None, :]          # (1, 4H2)

    k, w_ih3, w_hh3, b3 = torch_lstm(k, H2, H3)
    params['w3'] = jnp.concatenate(
        [reorder(w_ih3, H3).T, reorder(w_hh3, H3).T], axis=0)   # (H2+H3, 4H3)
    params['b3'] = reorder(b3, H3)[None, :]          # (1, 4H3)

    k, k1, k2 = jax.random.split(k, 3)
    bound = 1.0 / float(H3) ** 0.5
    w_out = uni(k1, (input_channels, H3), bound)
    b_out = uni(k2, (input_channels,), bound)
    params['wout'] = w_out.T                         # (H3, C)
    params['bout'] = b_out[None, :]                  # (1, C)
    return params


def _reference_forward(x, params):
    """Pure-JAX reference (same math, same param layout) for a sanity check."""
    B, T, C = x.shape
    x = x.astype(jnp.float32)

    def run_lstm(seq, w_in, w_h, b, H):
        h = jnp.zeros((B, H), jnp.float32)
        c = jnp.zeros((B, H), jnp.float32)
        outs = []
        for t in range(T):
            g = seq[:, t, :] @ w_in + h @ w_h + b
            i = jax.nn.sigmoid(g[:, 0 * H:1 * H])
            f = jax.nn.sigmoid(g[:, 1 * H:2 * H])
            o = jax.nn.sigmoid(g[:, 2 * H:3 * H])
            gg = jnp.tanh(g[:, 3 * H:4 * H])
            c = f * c + i * gg
            h = o * jnp.tanh(c)
            outs.append(h)
        return jnp.stack(outs, axis=1)

    e = run_lstm(x, params['wih1'], params['whh1'], params['b1'], H1)
    l = run_lstm(e, params['w2'][:H1], params['w2'][H1:], params['b2'], H2)
    d = run_lstm(l, params['w3'][:H2], params['w3'][H2:], params['b3'], H3)
    return d @ params['wout'] + params['bout']


if __name__ == "__main__":
    key = jax.random.PRNGKey(0)
    k_param, k_x = jax.random.split(key)

    input_channels = 2
    B, T = 2, 8
    params = init_params(k_param, input_channels=input_channels)
    x = jax.random.normal(k_x, (B, T, input_channels), jnp.float32)

    out = lstm_autoencoder_forward(x, params)
    out = jax.block_until_ready(out)

    ref = _reference_forward(x, params)
    assert out.shape == (B, T, input_channels)
    assert jnp.allclose(out, ref, rtol=1e-3, atol=1e-3), "mismatch vs reference"

    print("KERNEL_OK")
</pallas_src>

<mosaic_0001>
module attributes {stable_mosaic.version = 11 : i64} {
  func.func @lstm_ae_kernel(%arg0: memref<8x8x2xf32, #tpu.memory_space<vmem>>, %arg1: memref<2x256xf32, #tpu.memory_space<vmem>>, %arg2: memref<64x256xf32, #tpu.memory_space<vmem>>, %arg3: memref<1x256xf32, #tpu.memory_space<vmem>>, %arg4: memref<96x128xf32, #tpu.memory_space<vmem>>, %arg5: memref<1x128xf32, #tpu.memory_space<vmem>>, %arg6: memref<96x256xf32, #tpu.memory_space<vmem>>, %arg7: memref<1x256xf32, #tpu.memory_space<vmem>>, %arg8: memref<64x2xf32, #tpu.memory_space<vmem>>, %arg9: memref<1x2xf32, #tpu.memory_space<vmem>>, %arg10: memref<8x8x2xf32, #tpu.memory_space<vmem>>, %arg11: memref<8x8x256xf32, #tpu.memory_space<vmem>>, %arg12: memref<8x8x64xf32, #tpu.memory_space<vmem>>) attributes {dimension_semantics = [], scalar_prefetch = 0 : i64, scratch_operands = 2 : i64, tpu.core_type = #tpu.core_type<tc>} {
    %c0 = arith.constant 0 : index
    %c0_0 = arith.constant 0 : index
    %c0_1 = arith.constant 0 : index
    %0 = vector.load %arg0[%c0, %c0_0, %c0_1] : memref<8x8x2xf32, #tpu.memory_space<vmem>>, vector<8x8x2xf32>
    %1 = vector.shape_cast %0 : vector<8x8x2xf32> to vector<64x2xf32>
    %c0_2 = arith.constant 0 : index
    %c0_3 = arith.constant 0 : index
    %2 = vector.load %arg1[%c0_2, %c0_3] : memref<2x256xf32, #tpu.memory_space<vmem>>, vector<2x256xf32>
    %cst = arith.constant dense<0.000000e+00> : vector<64x256xf32>
    %3 = tpu.matmul %1, %2, %cst {dimension_numbers = #tpu.dot_dimension_numbers<[1], [0], [0], [1], [0, 0, 1, 1], [], []>} : vector<64x2xf32>, vector<2x256xf32>, vector<64x256xf32> -> vector<64x256xf32>
    %c0_4 = arith.constant 0 : index
    %c0_5 = arith.constant 0 : index
    %4 = vector.load %arg3[%c0_4, %c0_5] : memref<1x256xf32, #tpu.memory_space<vmem>>, vector<1x256xf32>
    %5 = vector.broadcast %4 : vector<1x256xf32> to vector<64x256xf32>
    %6 = arith.addf %3, %5 : vector<64x256xf32>
    %7 = vector.shape_cast %6 : vector<64x256xf32> to vector<8x8x256xf32>
    %c0_6 = arith.constant 0 : index
    %c0_7 = arith.constant 0 : index
    %c0_8 = arith.constant 0 : index
    %8 = vector.load %arg11[%c0_6, %c0_7, %c0_8] : memref<8x8x256xf32, #tpu.memory_space<vmem>>, vector<8x8x256xf32>
    tpu.vector_store %arg11[%c0_6, %c0_7, %c0_8], %7 {strides = array<i32>} : memref<8x8x256xf32, #tpu.memory_space<vmem>>, vector<8x8x256xf32>,
    %c0_9 = arith.constant 0 : index
    %c0_10 = arith.constant 0 : index
    %9 = vector.load %arg2[%c0_9, %c0_10] : memref<64x256xf32, #tpu.memory_space<vmem>>, vector<64x256xf32>
    %c0_11 = arith.constant 0 : index
    %c0_12 = arith.constant 0 : index
    %10 = vector.load %arg4[%c0_11, %c0_12] : memref<96x128xf32, #tpu.memory_space<vmem>>, vector<96x128xf32>
    %c0_13 = arith.constant 0 : index
    %c0_14 = arith.constant 0 : index
    %11 = vector.load %arg5[%c0_13, %c0_14] : memref<1x128xf32, #tpu.memory_space<vmem>>, vector<1x128xf32>
    %c0_15 = arith.constant 0 : index
    %c0_16 = arith.constant 0 : index
    %12 = vector.load %arg6[%c0_15, %c0_16] : memref<96x256xf32, #tpu.memory_space<vmem>>, vector<96x256xf32>
    %c0_17 = arith.constant 0 : index
    %c0_18 = arith.constant 0 : index
    %13 = vector.load %arg7[%c0_17, %c0_18] : memref<1x256xf32, #tpu.memory_space<vmem>>, vector<1x256xf32>
    %cst_19 = arith.constant 0.000000e+00 : f32
    %14 = vector.broadcast %cst_19 : f32 to vector<8x64xf32>
    %cst_20 = arith.constant 0.000000e+00 : f32
    %15 = vector.broadcast %cst_20 : f32 to vector<8x64xf32>
    %cst_21 = arith.constant 0.000000e+00 : f32
    %16 = vector.broadcast %cst_21 : f32 to vector<8x32xf32>
    %cst_22 = arith.constant 0.000000e+00 : f32
    %17 = vector.broadcast %cst_22 : f32 to vector<8x32xf32>
    %cst_23 = arith.constant 0.000000e+00 : f32
    %18 = vector.broadcast %cst_23 : f32 to vector<8x64xf32>
    %cst_24 = arith.constant 0.000000e+00 : f32
    %19 = vector.broadcast %cst_24 : f32 to vector<8x64xf32>
    %c0_i32 = arith.constant 0 : i32
    %20 = arith.index_cast %c0_i32 : i32 to index
    %c0_25 = arith.constant 0 : index
    %c0_26 = arith.constant 0 : index
    %21 = vector.load %arg11[%20, %c0_25, %c0_26] : memref<8x8x256xf32, #tpu.memory_space<vmem>>, vector<1x8x256xf32>
    %22 = vector.shape_cast %21 : vector<1x8x256xf32> to vector<8x256xf32>
    %cst_27 = arith.constant dense<0.000000e+00> : vector<8x256xf32>
    %23 = tpu.matmul %14, %9, %cst_27 {dimension_numbers = #tpu.dot_dimension_numbers<[1], [0], [0], [1], [0, 0, 1, 1], [], []>} : vector<8x64xf32>, vector<64x256xf32>, vector<8x256xf32> -> vector<8x256xf32>
    %24 = arith.addf %22, %23 : vector<8x256xf32>
    %25 = vector.extract_strided_slice %24 {offsets = [0, 0], sizes = [8, 192], strides = [1, 1]} : vector<8x256xf32> to vector<8x192xf32>
    %26 = arith.negf %25 : vector<8x192xf32>
    %27 = math.exp %26 : vector<8x192xf32>
    %cst_28 = arith.constant 1.000000e+00 : f32
    %28 = vector.broadcast %cst_28 : f32 to vector<8x192xf32>
    %29 = arith.addf %28, %27 : vector<8x192xf32>
    %30 = arith.divf %28, %29 : vector<8x192xf32>
    %31 = vector.extract_strided_slice %30 {offsets = [0, 0], sizes = [8, 64], strides = [1, 1]} : vector<8x192xf32> to vector<8x64xf32>
    %32 = vector.extract_strided_slice %30 {offsets = [0, 64], sizes = [8, 64], strides = [1, 1]} : vector<8x192xf32> to vector<8x64xf32>
    %33 = vector.extract_strided_slice %30 {offsets = [0, 128], sizes = [8, 64], strides = [1, 1]} : vector<8x192xf32> to vector<8x64xf32>
    %34 = vector.extract_strided_slice %24 {offsets = [0, 192], sizes = [8, 64], strides = [1, 1]} : vector<8x256xf32> to vector<8x64xf32>
    %35 = math.tanh %34 : vector<8x64xf32>
    %36 = arith.mulf %32, %15 : vector<8x64xf32>
    %37 = arith.mulf %31, %35 : vector<8x64xf32>
    %38 = arith.addf %36, %37 : vector<8x64xf32>
    %39 = math.tanh %38 : vector<8x64xf32>
    %40 = arith.mulf %33, %39 : vector<8x64xf32>
    %41 = tpu.concatenate %40, %16 in 1 : vector<8x64xf32>, vector<8x32xf32> -> vector<8x96xf32>
    %cst_29 = arith.constant dense<0.000000e+00> : vector<8x128xf32>
    %42 = tpu.matmul %41, %10, %cst_29 {dimension_numbers = #tpu.dot_dimension_numbers<[1], [0], [0], [1], [0, 0, 1, 1], [], []>} : vector<8x96xf32>, vector<96x128xf32>, vector<8x128xf32> -> vector<8x128xf32>
    %43 = vector.broadcast %11 : vector<1x128xf32> to vector<8x128xf32>
    %44 = arith.addf %42, %43 : vector<8x128xf32>
    %45 = vector.extract_strided_slice %44 {offsets = [0, 0], sizes = [8, 96], strides = [1, 1]} : vector<8x128xf32> to vector<8x96xf32>
    %46 = arith.negf %45 : vector<8x96xf32>
    %47 = math.exp %46 : vector<8x96xf32>
    %cst_30 = arith.constant 1.000000e+00 : f32
    %48 = vector.broadcast %cst_30 : f32 to vector<8x96xf32>
    %49 = arith.addf %48, %47 : vector<8x96xf32>
    %50 = arith.divf %48, %49 : vector<8x96xf32>
    %51 = vector.extract_strided_slice %50 {offsets = [0, 0], sizes = [8, 32], strides = [1, 1]} : vector<8x96xf32> to vector<8x32xf32>
    %52 = vector.extract_strided_slice %50 {offsets = [0, 32], sizes = [8, 32], strides = [1, 1]} : vector<8x96xf32> to vector<8x32xf32>
    %53 = vector.extract_strided_slice %50 {offsets = [0, 64], sizes = [8, 32], strides = [1, 1]} : vector<8x96xf32> to vector<8x32xf32>
    %54 = vector.extract_strided_slice %44 {offsets = [0, 96], sizes = [8, 32], strides = [1, 1]} : vector<8x128xf32> to vector<8x32xf32>
    %55 = math.tanh %54 : vector<8x32xf32>
    %56 = arith.mulf %52, %17 : vector<8x32xf32>
    %57 = arith.mulf %51, %55 : vector<8x32xf32>
    %58 = arith.addf %56, %57 : vector<8x32xf32>
    %59 = math.tanh %58 : vector<8x32xf32>
    %60 = arith.mulf %53, %59 : vector<8x32xf32>
    %61 = tpu.concatenate %60, %18 in 1 : vector<8x32xf32>, vector<8x64xf32> -> vector<8x96xf32>
    %cst_31 = arith.constant dense<0.000000e+00> : vector<8x256xf32>
    %62 = tpu.matmul %61, %12, %cst_31 {dimension_numbers = #tpu.dot_dimension_numbers<[1], [0], [0], [1], [0, 0, 1, 1], [], []>} : vector<8x96xf32>, vector<96x256xf32>, vector<8x256xf32> -> vector<8x256xf32>
    %63 = vector.broadcast %13 : vector<1x256xf32> to vector<8x256xf32>
    %64 = arith.addf %62, %63 : vector<8x256xf32>
    %65 = vector.extract_strided_slice %64 {offsets = [0, 0], sizes = [8, 192], strides = [1, 1]} : vector<8x256xf32> to vector<8x192xf32>
    %66 = arith.negf %65 : vector<8x192xf32>
    %67 = math.exp %66 : vector<8x192xf32>
    %cst_32 = arith.constant 1.000000e+00 : f32
    %68 = vector.broadcast %cst_32 : f32 to vector<8x192xf32>
    %69 = arith.addf %68, %67 : vector<8x192xf32>
    %70 = arith.divf %68, %69 : vector<8x192xf32>
    %71 = vector.extract_strided_slice %70 {offsets = [0, 0], sizes = [8, 64], strides = [1, 1]} : vector<8x192xf32> to vector<8x64xf32>
    %72 = vector.extract_strided_slice %70 {offsets = [0, 64], sizes = [8, 64], strides = [1, 1]} : vector<8x192xf32> to vector<8x64xf32>
    %73 = vector.extract_strided_slice %70 {offsets = [0, 128], sizes = [8, 64], strides = [1, 1]} : vector<8x192xf32> to vector<8x64xf32>
    %74 = vector.extract_strided_slice %64 {offsets = [0, 192], sizes = [8, 64], strides = [1, 1]} : vector<8x256xf32> to vector<8x64xf32>
    %75 = math.tanh %74 : vector<8x64xf32>
    %76 = arith.mulf %72, %19 : vector<8x64xf32>
    %77 = arith.mulf %71, %75 : vector<8x64xf32>
    %78 = arith.addf %76, %77 : vector<8x64xf32>
    %79 = math.tanh %78 : vector<8x64xf32>
    %80 = arith.mulf %73, %79 : vector<8x64xf32>
    %81 = arith.index_cast %c0_i32 : i32 to index
    %c0_33 = arith.constant 0 : index
    %c0_34 = arith.constant 0 : index
    %82 = vector.load %arg12[%81, %c0_33, %c0_34] : memref<8x8x64xf32, #tpu.memory_space<vmem>>, vector<1x8x64xf32>
    %83 = vector.shape_cast %82 : vector<1x8x64xf32> to vector<8x64xf32>
    %84 = vector.shape_cast %80 : vector<8x64xf32> to vector<1x8x64xf32>
    tpu.vector_store %arg12[%81, %c0_33, %c0_34], %84 {strides = array<i32>} : memref<8x8x64xf32, #tpu.memory_space<vmem>>, vector<1x8x64xf32>,
    %c1_i32 = arith.constant 1 : i32
    %85 = arith.index_cast %c1_i32 : i32 to index
    %c0_35 = arith.constant 0 : index
    %c0_36 = arith.constant 0 : index
    %86 = vector.load %arg11[%85, %c0_35, %c0_36] : memref<8x8x256xf32, #tpu.memory_space<vmem>>, vector<1x8x256xf32>
    %87 = vector.shape_cast %86 : vector<1x8x256xf32> to vector<8x256xf32>
    %cst_37 = arith.constant dense<0.000000e+00> : vector<8x256xf32>
    %88 = tpu.matmul %40, %9, %cst_37 {dimension_numbers = #tpu.dot_dimension_numbers<[1], [0], [0], [1], [0, 0, 1, 1], [], []>} : vector<8x64xf32>, vector<64x256xf32>, vector<8x256xf32> -> vector<8x256xf32>
    %89 = arith.addf %87, %88 : vector<8x256xf32>
    %90 = vector.extract_strided_slice %89 {offsets = [0, 0], sizes = [8, 192], strides = [1, 1]} : vector<8x256xf32> to vector<8x192xf32>
    %91 = arith.negf %90 : vector<8x192xf32>
    %92 = math.exp %91 : vector<8x192xf32>
    %cst_38 = arith.constant 1.000000e+00 : f32
    %93 = vector.broadcast %cst_38 : f32 to vector<8x192xf32>
    %94 = arith.addf %93, %92 : vector<8x192xf32>
    %95 = arith.divf %93, %94 : vector<8x192xf32>
    %96 = vector.extract_strided_slice %95 {offsets = [0, 0], sizes = [8, 64], strides = [1, 1]} : vector<8x192xf32> to vector<8x64xf32>
    %97 = vector.extract_strided_slice %95 {offsets = [0, 64], sizes = [8, 64], strides = [1, 1]} : vector<8x192xf32> to vector<8x64xf32>
    %98 = vector.extract_strided_slice %95 {offsets = [0, 128], sizes = [8, 64], strides = [1, 1]} : vector<8x192xf32> to vector<8x64xf32>
    %99 = vector.extract_strided_slice %89 {offsets = [0, 192], sizes = [8, 64], strides = [1, 1]} : vector<8x256xf32> to vector<8x64xf32>
    %100 = math.tanh %99 : vector<8x64xf32>
    %101 = arith.mulf %97, %38 : vector<8x64xf32>
    %102 = arith.mulf %96, %100 : vector<8x64xf32>
    %103 = arith.addf %101, %102 : vector<8x64xf32>
    %104 = math.tanh %103 : vector<8x64xf32>
    %105 = arith.mulf %98, %104 : vector<8x64xf32>
    %106 = tpu.concatenate %105, %60 in 1 : vector<8x64xf32>, vector<8x32xf32> -> vector<8x96xf32>
    %cst_39 = arith.constant dense<0.000000e+00> : vector<8x128xf32>
    %107 = tpu.matmul %106, %10, %cst_39 {dimension_numbers = #tpu.dot_dimension_numbers<[1], [0], [0], [1], [0, 0, 1, 1], [], []>} : vector<8x96xf32>, vector<96x128xf32>, vector<8x128xf32> -> vector<8x128xf32>
    %108 = vector.broadcast %11 : vector<1x128xf32> to vector<8x128xf32>
    %109 = arith.addf %107, %108 : vector<8x128xf32>
    %110 = vector.extract_strided_slice %109 {offsets = [0, 0], sizes = [8, 96], strides = [1, 1]} : vector<8x128xf32> to vector<8x96xf32>
    %111 = arith.negf %110 : vector<8x96xf32>
    %112 = math.exp %111 : vector<8x96xf32>
    %cst_40 = arith.constant 1.000000e+00 : f32
    %113 = vector.broadcast %cst_40 : f32 to vector<8x96xf32>
    %114 = arith.addf %113, %112 : vector<8x96xf32>
    %115 = arith.divf %113, %114 : vector<8x96xf32>
    %116 = vector.extract_strided_slice %115 {offsets = [0, 0], sizes = [8, 32], strides = [1, 1]} : vector<8x96xf32> to vector<8x32xf32>
    %117 = vector.extract_strided_slice %115 {offsets = [0, 32], sizes = [8, 32], strides = [1, 1]} : vector<8x96xf32> to vector<8x32xf32>
    %118 = vector.extract_strided_slice %115 {offsets = [0, 64], sizes = [8, 32], strides = [1, 1]} : vector<8x96xf32> to vector<8x32xf32>
    %119 = vector.extract_strided_slice %109 {offsets = [0, 96], sizes = [8, 32], strides = [1, 1]} : vector<8x128xf32> to vector<8x32xf32>
    %120 = math.tanh %119 : vector<8x32xf32>
    %121 = arith.mulf %117, %58 : vector<8x32xf32>
    %122 = arith.mulf %116, %120 : vector<8x32xf32>
    %123 = arith.addf %121, %122 : vector<8x32xf32>
    %124 = math.tanh %123 : vector<8x32xf32>
    %125 = arith.mulf %118, %124 : vector<8x32xf32>
    %126 = tpu.concatenate %125, %80 in 1 : vector<8x32xf32>, vector<8x64xf32> -> vector<8x96xf32>
    %cst_41 = arith.constant dense<0.000000e+00> : vector<8x256xf32>
    %127 = tpu.matmul %126, %12, %cst_41 {dimension_numbers = #tpu.dot_dimension_numbers<[1], [0], [0], [1], [0, 0, 1, 1], [], []>} : vector<8x96xf32>, vector<96x256xf32>, vector<8x256xf32> -> vector<8x256xf32>
    %128 = vector.broadcast %13 : vector<1x256xf32> to vector<8x256xf32>
    %129 = arith.addf %127, %128 : vector<8x256xf32>
    %130 = vector.extract_strided_slice %129 {offsets = [0, 0], sizes = [8, 192], strides = [1, 1]} : vector<8x256xf32> to vector<8x192xf32>
    %131 = arith.negf %130 : vector<8x192xf32>
    %132 = math.exp %131 : vector<8x192xf32>
    %cst_42 = arith.constant 1.000000e+00 : f32
    %133 = vector.broadcast %cst_42 : f32 to vector<8x192xf32>
    %134 = arith.addf %133, %132 : vector<8x192xf32>
    %135 = arith.divf %133, %134 : vector<8x192xf32>
    %136 = vector.extract_strided_slice %135 {offsets = [0, 0], sizes = [8, 64], strides = [1, 1]} : vector<8x192xf32> to vector<8x64xf32>
    %137 = vector.extract_strided_slice %135 {offsets = [0, 64], sizes = [8, 64], strides = [1, 1]} : vector<8x192xf32> to vector<8x64xf32>
    %138 = vector.extract_strided_slice %135 {offsets = [0, 128], sizes = [8, 64], strides = [1, 1]} : vector<8x192xf32> to vector<8x64xf32>
    %139 = vector.extract_strided_slice %129 {offsets = [0, 192], sizes = [8, 64], strides = [1, 1]} : vector<8x256xf32> to vector<8x64xf32>
    %140 = math.tanh %139 : vector<8x64xf32>
    %141 = arith.mulf %137, %78 : vector<8x64xf32>
    %142 = arith.mulf %136, %140 : vector<8x64xf32>
    %143 = arith.addf %141, %142 : vector<8x64xf32>
    %144 = math.tanh %143 : vector<8x64xf32>
    %145 = arith.mulf %138, %144 : vector<8x64xf32>
    %146 = arith.index_cast %c1_i32 : i32 to index
    %c0_43 = arith.constant 0 : index
    %c0_44 = arith.constant 0 : index
    %147 = vector.load %arg12[%146, %c0_43, %c0_44] : memref<8x8x64xf32, #tpu.memory_space<vmem>>, vector<1x8x64xf32>
    %148 = vector.shape_cast %147 : vector<1x8x64xf32> to vector<8x64xf32>
    %149 = vector.shape_cast %145 : vector<8x64xf32> to vector<1x8x64xf32>
    tpu.vector_store %arg12[%146, %c0_43, %c0_44], %149 {strides = array<i32>} : memref<8x8x64xf32, #tpu.memory_space<vmem>>, vector<1x8x64xf32>,
    %c2_i32 = arith.constant 2 : i32
    %150 = arith.index_cast %c2_i32 : i32 to index
    %c0_45 = arith.constant 0 : index
    %c0_46 = arith.constant 0 : index
    %151 = vector.load %arg11[%150, %c0_45, %c0_46] : memref<8x8x256xf32, #tpu.memory_space<vmem>>, vector<1x8x256xf32>
    %152 = vector.shape_cast %151 : vector<1x8x256xf32> to vector<8x256xf32>
    %cst_47 = arith.constant dense<0.000000e+00> : vector<8x256xf32>
    %153 = tpu.matmul %105, %9, %cst_47 {dimension_numbers = #tpu.dot_dimension_numbers<[1], [0], [0], [1], [0, 0, 1, 1], [], []>} : vector<8x64xf32>, vector<64x256xf32>, vector<8x256xf32> -> vector<8x256xf32>
    %154 = arith.addf %152, %153 : vector<8x256xf32>
    %155 = vector.extract_strided_slice %154 {offsets = [0, 0], sizes = [8, 192], strides = [1, 1]} : vector<8x256xf32> to vector<8x192xf32>
    %156 = arith.negf %155 : vector<8x192xf32>
    %157 = math.exp %156 : vector<8x192xf32>
    %cst_48 = arith.constant 1.000000e+00 : f32
    %158 = vector.broadcast %cst_48 : f32 to vector<8x192xf32>
    %159 = arith.addf %158, %157 : vector<8x192xf32>
    %160 = arith.divf %158, %159 : vector<8x192xf32>
    %161 = vector.extract_strided_slice %160 {offsets = [0, 0], sizes = [8, 64], strides = [1, 1]} : vector<8x192xf32> to vector<8x64xf32>
    %162 = vector.extract_strided_slice %160 {offsets = [0, 64], sizes = [8, 64], strides = [1, 1]} : vector<8x192xf32> to vector<8x64xf32>
    %163 = vector.extract_strided_slice %160 {offsets = [0, 128], sizes = [8, 64], strides = [1, 1]} : vector<8x192xf32> to vector<8x64xf32>
    %164 = vector.extract_strided_slice %154 {offsets = [0, 192], sizes = [8, 64], strides = [1, 1]} : vector<8x256xf32> to vector<8x64xf32>
    %165 = math.tanh %164 : vector<8x64xf32>
    %166 = arith.mulf %162, %103 : vector<8x64xf32>
    %167 = arith.mulf %161, %165 : vector<8x64xf32>
    %168 = arith.addf %166, %167 : vector<8x64xf32>
    %169 = math.tanh %168 : vector<8x64xf32>
    %170 = arith.mulf %163, %169 : vector<8x64xf32>
    %171 = tpu.concatenate %170, %125 in 1 : vector<8x64xf32>, vector<8x32xf32> -> vector<8x96xf32>
    %cst_49 = arith.constant dense<0.000000e+00> : vector<8x128xf32>
    %172 = tpu.matmul %171, %10, %cst_49 {dimension_numbers = #tpu.dot_dimension_numbers<[1], [0], [0], [1], [0, 0, 1, 1], [], []>} : vector<8x96xf32>, vector<96x128xf32>, vector<8x128xf32> -> vector<8x128xf32>
    %173 = vector.broadcast %11 : vector<1x128xf32> to vector<8x128xf32>
    %174 = arith.addf %172, %173 : vector<8x128xf32>
    %175 = vector.extract_strided_slice %174 {offsets = [0, 0], sizes = [8, 96], strides = [1, 1]} : vector<8x128xf32> to vector<8x96xf32>
    %176 = arith.negf %175 : vector<8x96xf32>
    %177 = math.exp %176 : vector<8x96xf32>
    %cst_50 = arith.constant 1.000000e+00 : f32
    %178 = vector.broadcast %cst_50 : f32 to vector<8x96xf32>
    %179 = arith.addf %178, %177 : vector<8x96xf32>
    %180 = arith.divf %178, %179 : vector<8x96xf32>
    %181 = vector.extract_strided_slice %180 {offsets = [0, 0], sizes = [8, 32], strides = [1, 1]} : vector<8x96xf32> to vector<8x32xf32>
    %182 = vector.extract_strided_slice %180 {offsets = [0, 32], sizes = [8, 32], strides = [1, 1]} : vector<8x96xf32> to vector<8x32xf32>
    %183 = vector.extract_strided_slice %180 {offsets = [0, 64], sizes = [8, 32], strides = [1, 1]} : vector<8x96xf32> to vector<8x32xf32>
    %184 = vector.extract_strided_slice %174 {offsets = [0, 96], sizes = [8, 32], strides = [1, 1]} : vector<8x128xf32> to vector<8x32xf32>
    %185 = math.tanh %184 : vector<8x32xf32>
    %186 = arith.mulf %182, %123 : vector<8x32xf32>
    %187 = arith.mulf %181, %185 : vector<8x32xf32>
    %188 = arith.addf %186, %187 : vector<8x32xf32>
    %189 = math.tanh %188 : vector<8x32xf32>
    %190 = arith.mulf %183, %189 : vector<8x32xf32>
    %191 = tpu.concatenate %190, %145 in 1 : vector<8x32xf32>, vector<8x64xf32> -> vector<8x96xf32>
    %cst_51 = arith.constant dense<0.000000e+00> : vector<8x256xf32>
    %192 = tpu.matmul %191, %12, %cst_51 {dimension_numbers = #tpu.dot_dimension_numbers<[1], [0], [0], [1], [0, 0, 1, 1], [], []>} : vector<8x96xf32>, vector<96x256xf32>, vector<8x256xf32> -> vector<8x256xf32>
    %193 = vector.broadcast %13 : vector<1x256xf32> to vector<8x256xf32>
    %194 = arith.addf %192, %193 : vector<8x256xf32>
    %195 = vector.extract_strided_slice %194 {offsets = [0, 0], sizes = [8, 192], strides = [1, 1]} : vector<8x256xf32> to vector<8x192xf32>
    %196 = arith.negf %195 : vector<8x192xf32>
    %197 = math.exp %196 : vector<8x192xf32>
    %cst_52 = arith.constant 1.000000e+00 : f32
    %198 = vector.broadcast %cst_52 : f32 to vector<8x192xf32>
    %199 = arith.addf %198, %197 : vector<8x192xf32>
    %200 = arith.divf %198, %199 : vector<8x192xf32>
    %201 = vector.extract_strided_slice %200 {offsets = [0, 0], sizes = [8, 64], strides = [1, 1]} : vector<8x192xf32> to vector<8x64xf32>
    %202 = vector.extract_strided_slice %200 {offsets = [0, 64], sizes = [8, 64], strides = [1, 1]} : vector<8x192xf32> to vector<8x64xf32>
    %203 = vector.extract_strided_slice %200 {offsets = [0, 128], sizes = [8, 64], strides = [1, 1]} : vector<8x192xf32> to vector<8x64xf32>
    %204 = vector.extract_strided_slice %194 {offsets = [0, 192], sizes = [8, 64], strides = [1, 1]} : vector<8x256xf32> to vector<8x64xf32>
    %205 = math.tanh %204 : vector<8x64xf32>
    %206 = arith.mulf %202, %143 : vector<8x64xf32>
    %207 = arith.mulf %201, %205 : vector<8x64xf32>
    %208 = arith.addf %206, %207 : vector<8x64xf32>
    %209 = math.tanh %208 : vector<8x64xf32>
    %210 = arith.mulf %203, %209 : vector<8x64xf32>
    %211 = arith.index_cast %c2_i32 : i32 to index
    %c0_53 = arith.constant 0 : index
    %c0_54 = arith.constant 0 : index
    %212 = vector.load %arg12[%211, %c0_53, %c0_54] : memref<8x8x64xf32, #tpu.memory_space<vmem>>, vector<1x8x64xf32>
    %213 = vector.shape_cast %212 : vector<1x8x64xf32> to vector<8x64xf32>
    %214 = vector.shape_cast %210 : vector<8x64xf32> to vector<1x8x64xf32>
    tpu.vector_store %arg12[%211, %c0_53, %c0_54], %214 {strides = array<i32>} : memref<8x8x64xf32, #tpu.memory_space<vmem>>, vector<1x8x64xf32>,
    %c3_i32 = arith.constant 3 : i32
    %215 = arith.index_cast %c3_i32 : i32 to index
    %c0_55 = arith.constant 0 : index
    %c0_56 = arith.constant 0 : index
    %216 = vector.load %arg11[%215, %c0_55, %c0_56] : memref<8x8x256xf32, #tpu.memory_space<vmem>>, vector<1x8x256xf32>
    %217 = vector.shape_cast %216 : vector<1x8x256xf32> to vector<8x256xf32>
    %cst_57 = arith.constant dense<0.000000e+00> : vector<8x256xf32>
    %218 = tpu.matmul %170, %9, %cst_57 {dimension_numbers = #tpu.dot_dimension_numbers<[1], [0], [0], [1], [0, 0, 1, 1], [], []>} : vector<8x64xf32>, vector<64x256xf32>, vector<8x256xf32> -> vector<8x256xf32>
    %219 = arith.addf %217, %218 : vector<8x256xf32>
    %220 = vector.extract_strided_slice %219 {offsets = [0, 0], sizes = [8, 192], strides = [1, 1]} : vector<8x256xf32> to vector<8x192xf32>
    %221 = arith.negf %220 : vector<8x192xf32>
    %222 = math.exp %221 : vector<8x192xf32>
    %cst_58 = arith.constant 1.000000e+00 : f32
    %223 = vector.broadcast %cst_58 : f32 to vector<8x192xf32>
    %224 = arith.addf %223, %222 : vector<8x192xf32>
    %225 = arith.divf %223, %224 : vector<8x192xf32>
    %226 = vector.extract_strided_slice %225 {offsets = [0, 0], sizes = [8, 64], strides = [1, 1]} : vector<8x192xf32> to vector<8x64xf32>
    %227 = vector.extract_strided_slice %225 {offsets = [0, 64], sizes = [8, 64], strides = [1, 1]} : vector<8x192xf32> to vector<8x64xf32>
    %228 = vector.extract_strided_slice %225 {offsets = [0, 128], sizes = [8, 64], strides = [1, 1]} : vector<8x192xf32> to vector<8x64xf32>
    %229 = vector.extract_strided_slice %219 {offsets = [0, 192], sizes = [8, 64], strides = [1, 1]} : vector<8x256xf32> to vector<8x64xf32>
    %230 = math.tanh %229 : vector<8x64xf32>
    %231 = arith.mulf %227, %168 : vector<8x64xf32>
    %232 = arith.mulf %226, %230 : vector<8x64xf32>
    %233 = arith.addf %231, %232 : vector<8x64xf32>
    %234 = math.tanh %233 : vector<8x64xf32>
    %235 = arith.mulf %228, %234 : vector<8x64xf32>
    %236 = tpu.concatenate %235, %190 in 1 : vector<8x64xf32>, vector<8x32xf32> -> vector<8x96xf32>
    %cst_59 = arith.constant dense<0.000000e+00> : vector<8x128xf32>
    %237 = tpu.matmul %236, %10, %cst_59 {dimension_numbers = #tpu.dot_dimension_numbers<[1], [0], [0], [1], [0, 0, 1, 1], [], []>} : vector<8x96xf32>, vector<96x128xf32>, vector<8x128xf32> -> vector<8x128xf32>
    %238 = vector.broadcast %11 : vector<1x128xf32> to vector<8x128xf32>
    %239 = arith.addf %237, %238 : vector<8x128xf32>
    %240 = vector.extract_strided_slice %239 {offsets = [0, 0], sizes = [8, 96], strides = [1, 1]} : vector<8x128xf32> to vector<8x96xf32>
    %241 = arith.negf %240 : vector<8x96xf32>
    %242 = math.exp %241 : vector<8x96xf32>
    %cst_60 = arith.constant 1.000000e+00 : f32
    %243 = vector.broadcast %cst_60 : f32 to vector<8x96xf32>
    %244 = arith.addf %243, %242 : vector<8x96xf32>
    %245 = arith.divf %243, %244 : vector<8x96xf32>
    %246 = vector.extract_strided_slice %245 {offsets = [0, 0], sizes = [8, 32], strides = [1, 1]} : vector<8x96xf32> to vector<8x32xf32>
    %247 = vector.extract_strided_slice %245 {offsets = [0, 32], sizes = [8, 32], strides = [1, 1]} : vector<8x96xf32> to vector<8x32xf32>
    %248 = vector.extract_strided_slice %245 {offsets = [0, 64], sizes = [8, 32], strides = [1, 1]} : vector<8x96xf32> to vector<8x32xf32>
    %249 = vector.extract_strided_slice %239 {offsets = [0, 96], sizes = [8, 32], strides = [1, 1]} : vector<8x128xf32> to vector<8x32xf32>
    %250 = math.tanh %249 : vector<8x32xf32>
    %251 = arith.mulf %247, %188 : vector<8x32xf32>
    %252 = arith.mulf %246, %250 : vector<8x32xf32>
    %253 = arith.addf %251, %252 : vector<8x32xf32>
    %254 = math.tanh %253 : vector<8x32xf32>
    %255 = arith.mulf %248, %254 : vector<8x32xf32>
    %256 = tpu.concatenate %255, %210 in 1 : vector<8x32xf32>, vector<8x64xf32> -> vector<8x96xf32>
    %cst_61 = arith.constant dense<0.000000e+00> : vector<8x256xf32>
    %257 = tpu.matmul %256, %12, %cst_61 {dimension_numbers = #tpu.dot_dimension_numbers<[1], [0], [0], [1], [0, 0, 1, 1], [], []>} : vector<8x96xf32>, vector<96x256xf32>, vector<8x256xf32> -> vector<8x256xf32>
    %258 = vector.broadcast %13 : vector<1x256xf32> to vector<8x256xf32>
    %259 = arith.addf %257, %258 : vector<8x256xf32>
    %260 = vector.extract_strided_slice %259 {offsets = [0, 0], sizes = [8, 192], strides = [1, 1]} : vector<8x256xf32> to vector<8x192xf32>
    %261 = arith.negf %260 : vector<8x192xf32>
    %262 = math.exp %261 : vector<8x192xf32>
    %cst_62 = arith.constant 1.000000e+00 : f32
    %263 = vector.broadcast %cst_62 : f32 to vector<8x192xf32>
    %264 = arith.addf %263, %262 : vector<8x192xf32>
    %265 = arith.divf %263, %264 : vector<8x192xf32>
    %266 = vector.extract_strided_slice %265 {offsets = [0, 0], sizes = [8, 64], strides = [1, 1]} : vector<8x192xf32> to vector<8x64xf32>
    %267 = vector.extract_strided_slice %265 {offsets = [0, 64], sizes = [8, 64], strides = [1, 1]} : vector<8x192xf32> to vector<8x64xf32>
    %268 = vector.extract_strided_slice %265 {offsets = [0, 128], sizes = [8, 64], strides = [1, 1]} : vector<8x192xf32> to vector<8x64xf32>
    %269 = vector.extract_strided_slice %259 {offsets = [0, 192], sizes = [8, 64], strides = [1, 1]} : vector<8x256xf32> to vector<8x64xf32>
    %270 = math.tanh %269 : vector<8x64xf32>
    %271 = arith.mulf %267, %208 : vector<8x64xf32>
    %272 = arith.mulf %266, %270 : vector<8x64xf32>
    %273 = arith.addf %271, %272 : vector<8x64xf32>
    %274 = math.tanh %273 : vector<8x64xf32>
    %275 = arith.mulf %268, %274 : vector<8x64xf32>
    %276 = arith.index_cast %c3_i32 : i32 to index
    %c0_63 = arith.constant 0 : index
    %c0_64 = arith.constant 0 : index
    %277 = vector.load %arg12[%276, %c0_63, %c0_64] : memref<8x8x64xf32, #tpu.memory_space<vmem>>, vector<1x8x64xf32>
    %278 = vector.shape_cast %277 : vector<1x8x64xf32> to vector<8x64xf32>
    %279 = vector.shape_cast %275 : vector<8x64xf32> to vector<1x8x64xf32>
    tpu.vector_store %arg12[%276, %c0_63, %c0_64], %279 {strides = array<i32>} : memref<8x8x64xf32, #tpu.memory_space<vmem>>, vector<1x8x64xf32>,
    %c4_i32 = arith.constant 4 : i32
    %280 = arith.index_cast %c4_i32 : i32 to index
    %c0_65 = arith.constant 0 : index
    %c0_66 = arith.constant 0 : index
    %281 = vector.load %arg11[%280, %c0_65, %c0_66] : memref<8x8x256xf32, #tpu.memory_space<vmem>>, vector<1x8x256xf32>
    %282 = vector.shape_cast %281 : vector<1x8x256xf32> to vector<8x256xf32>
    %cst_67 = arith.constant dense<0.000000e+00> : vector<8x256xf32>
    %283 = tpu.matmul %235, %9, %cst_67 {dimension_numbers = #tpu.dot_dimension_numbers<[1], [0], [0], [1], [0, 0, 1, 1], [], []>} : vector<8x64xf32>, vector<64x256xf32>, vector<8x256xf32> -> vector<8x256xf32>
    %284 = arith.addf %282, %283 : vector<8x256xf32>
    %285 = vector.extract_strided_slice %284 {offsets = [0, 0], sizes = [8, 192], strides = [1, 1]} : vector<8x256xf32> to vector<8x192xf32>
    %286 = arith.negf %285 : vector<8x192xf32>
    %287 = math.exp %286 : vector<8x192xf32>
    %cst_68 = arith.constant 1.000000e+00 : f32
    %288 = vector.broadcast %cst_68 : f32 to vector<8x192xf32>
    %289 = arith.addf %288, %287 : vector<8x192xf32>
    %290 = arith.divf %288, %289 : vector<8x192xf32>
    %291 = vector.extract_strided_slice %290 {offsets = [0, 0], sizes = [8, 64], strides = [1, 1]} : vector<8x192xf32> to vector<8x64xf32>
    %292 = vector.extract_strided_slice %290 {offsets = [0, 64], sizes = [8, 64], strides = [1, 1]} : vector<8x192xf32> to vector<8x64xf32>
    %293 = vector.extract_strided_slice %290 {offsets = [0, 128], sizes = [8, 64], strides = [1, 1]} : vector<8x192xf32> to vector<8x64xf32>
    %294 = vector.extract_strided_slice %284 {offsets = [0, 192], sizes = [8, 64], strides = [1, 1]} : vector<8x256xf32> to vector<8x64xf32>
    %295 = math.tanh %294 : vector<8x64xf32>
    %296 = arith.mulf %292, %233 : vector<8x64xf32>
    %297 = arith.mulf %291, %295 : vector<8x64xf32>
    %298 = arith.addf %296, %297 : vector<8x64xf32>
    %299 = math.tanh %298 : vector<8x64xf32>
    %300 = arith.mulf %293, %299 : vector<8x64xf32>
    %301 = tpu.concatenate %300, %255 in 1 : vector<8x64xf32>, vector<8x32xf32> -> vector<8x96xf32>
    %cst_69 = arith.constant dense<0.000000e+00> : vector<8x128xf32>
    %302 = tpu.matmul %301, %10, %cst_69 {dimension_numbers = #tpu.dot_dimension_numbers<[1], [0], [0], [1], [0, 0, 1, 1], [], []>} : vector<8x96xf32>, vector<96x128xf32>, vector<8x128xf32> -> vector<8x128xf32>
    %303 = vector.broadcast %11 : vector<1x128xf32> to vector<8x128xf32>
    %304 = arith.addf %302, %303 : vector<8x128xf32>
    %305 = vector.extract_strided_slice %304 {offsets = [0, 0], sizes = [8, 96], strides = [1, 1]} : vector<8x128xf32> to vector<8x96xf32>
    %306 = arith.negf %305 : vector<8x96xf32>
    %307 = math.exp %306 : vector<8x96xf32>
    %cst_70 = arith.constant 1.000000e+00 : f32
    %308 = vector.broadcast %cst_70 : f32 to vector<8x96xf32>
    %309 = arith.addf %308, %307 : vector<8x96xf32>
    %310 = arith.divf %308, %309 : vector<8x96xf32>
    %311 = vector.extract_strided_slice %310 {offsets = [0, 0], sizes = [8, 32], strides = [1, 1]} : vector<8x96xf32> to vector<8x32xf32>
    %312 = vector.extract_strided_slice %310 {offsets = [0, 32], sizes = [8, 32], strides = [1, 1]} : vector<8x96xf32> to vector<8x32xf32>
    %313 = vector.extract_strided_slice %310 {offsets = [0, 64], sizes = [8, 32], strides = [1, 1]} : vector<8x96xf32> to vector<8x32xf32>
    %314 = vector.extract_strided_slice %304 {offsets = [0, 96], sizes = [8, 32], strides = [1, 1]} : vector<8x128xf32> to vector<8x32xf32>
    %315 = math.tanh %314 : vector<8x32xf32>
    %316 = arith.mulf %312, %253 : vector<8x32xf32>
    %317 = arith.mulf %311, %315 : vector<8x32xf32>
    %318 = arith.addf %316, %317 : vector<8x32xf32>
    %319 = math.tanh %318 : vector<8x32xf32>
    %320 = arith.mulf %313, %319 : vector<8x32xf32>
    %321 = tpu.concatenate %320, %275 in 1 : vector<8x32xf32>, vector<8x64xf32> -> vector<8x96xf32>
    %cst_71 = arith.constant dense<0.000000e+00> : vector<8x256xf32>
    %322 = tpu.matmul %321, %12, %cst_71 {dimension_numbers = #tpu.dot_dimension_numbers<[1], [0], [0], [1], [0, 0, 1, 1], [], []>} : vector<8x96xf32>, vector<96x256xf32>, vector<8x256xf32> -> vector<8x256xf32>
    %323 = vector.broadcast %13 : vector<1x256xf32> to vector<8x256xf32>
    %324 = arith.addf %322, %323 : vector<8x256xf32>
    %325 = vector.extract_strided_slice %324 {offsets = [0, 0], sizes = [8, 192], strides = [1, 1]} : vector<8x256xf32> to vector<8x192xf32>
    %326 = arith.negf %325 : vector<8x192xf32>
    %327 = math.exp %326 : vector<8x192xf32>
    %cst_72 = arith.constant 1.000000e+00 : f32
    %328 = vector.broadcast %cst_72 : f32 to vector<8x192xf32>
    %329 = arith.addf %328, %327 : vector<8x192xf32>
    %330 = arith.divf %328, %329 : vector<8x192xf32>
    %331 = vector.extract_strided_slice %330 {offsets = [0, 0], sizes = [8, 64], strides = [1, 1]} : vector<8x192xf32> to vector<8x64xf32>
    %332 = vector.extract_strided_slice %330 {offsets = [0, 64], sizes = [8, 64], strides = [1, 1]} : vector<8x192xf32> to vector<8x64xf32>
    %333 = vector.extract_strided_slice %330 {offsets = [0, 128], sizes = [8, 64], strides = [1, 1]} : vector<8x192xf32> to vector<8x64xf32>
    %334 = vector.extract_strided_slice %324 {offsets = [0, 192], sizes = [8, 64], strides = [1, 1]} : vector<8x256xf32> to vector<8x64xf32>
    %335 = math.tanh %334 : vector<8x64xf32>
    %336 = arith.mulf %332, %273 : vector<8x64xf32>
    %337 = arith.mulf %331, %335 : vector<8x64xf32>
    %338 = arith.addf %336, %337 : vector<8x64xf32>
    %339 = math.tanh %338 : vector<8x64xf32>
    %340 = arith.mulf %333, %339 : vector<8x64xf32>
    %341 = arith.index_cast %c4_i32 : i32 to index
    %c0_73 = arith.constant 0 : index
    %c0_74 = arith.constant 0 : index
    %342 = vector.load %arg12[%341, %c0_73, %c0_74] : memref<8x8x64xf32, #tpu.memory_space<vmem>>, vector<1x8x64xf32>
    %343 = vector.shape_cast %342 : vector<1x8x64xf32> to vector<8x64xf32>
    %344 = vector.shape_cast %340 : vector<8x64xf32> to vector<1x8x64xf32>
    tpu.vector_store %arg12[%341, %c0_73, %c0_74], %344 {strides = array<i32>} : memref<8x8x64xf32, #tpu.memory_space<vmem>>, vector<1x8x64xf32>,
    %c5_i32 = arith.constant 5 : i32
    %345 = arith.index_cast %c5_i32 : i32 to index
    %c0_75 = arith.constant 0 : index
    %c0_76 = arith.constant 0 : index
    %346 = vector.load %arg11[%345, %c0_75, %c0_76] : memref<8x8x256xf32, #tpu.memory_space<vmem>>, vector<1x8x256xf32>
    %347 = vector.shape_cast %346 : vector<1x8x256xf32> to vector<8x256xf32>
    %cst_77 = arith.constant dense<0.000000e+00> : vector<8x256xf32>
    %348 = tpu.matmul %300, %9, %cst_77 {dimension_numbers = #tpu.dot_dimension_numbers<[1], [0], [0], [1], [0, 0, 1, 1], [], []>} : vector<8x64xf32>, vector<64x256xf32>, vector<8x256xf32> -> vector<8x256xf32>
    %349 = arith.addf %347, %348 : vector<8x256xf32>
    %350 = vector.extract_strided_slice %349 {offsets = [0, 0], sizes = [8, 192], strides = [1, 1]} : vector<8x256xf32> to vector<8x192xf32>
    %351 = arith.negf %350 : vector<8x192xf32>
    %352 = math.exp %351 : vector<8x192xf32>
    %cst_78 = arith.constant 1.000000e+00 : f32
    %353 = vector.broadcast %cst_78 : f32 to vector<8x192xf32>
    %354 = arith.addf %353, %352 : vector<8x192xf32>
    %355 = arith.divf %353, %354 : vector<8x192xf32>
    %356 = vector.extract_strided_slice %355 {offsets = [0, 0], sizes = [8, 64], strides = [1, 1]} : vector<8x192xf32> to vector<8x64xf32>
    %357 = vector.extract_strided_slice %355 {offsets = [0, 64], sizes = [8, 64], strides = [1, 1]} : vector<8x192xf32> to vector<8x64xf32>
    %358 = vector.extract_strided_slice %355 {offsets = [0, 128], sizes = [8, 64], strides = [1, 1]} : vector<8x192xf32> to vector<8x64xf32>
    %359 = vector.extract_strided_slice %349 {offsets = [0, 192], sizes = [8, 64], strides = [1, 1]} : vector<8x256xf32> to vector<8x64xf32>
    %360 = math.tanh %359 : vector<8x64xf32>
    %361 = arith.mulf %357, %298 : vector<8x64xf32>
    %362 = arith.mulf %356, %360 : vector<8x64xf32>
    %363 = arith.addf %361, %362 : vector<8x64xf32>
    %364 = math.tanh %363 : vector<8x64xf32>
    %365 = arith.mulf %358, %364 : vector<8x64xf32>
    %366 = tpu.concatenate %365, %320 in 1 : vector<8x64xf32>, vector<8x32xf32> -> vector<8x96xf32>
    %cst_79 = arith.constant dense<0.000000e+00> : vector<8x128xf32>
    %367 = tpu.matmul %366, %10, %cst_79 {dimension_numbers = #tpu.dot_dimension_numbers<[1], [0], [0], [1], [0, 0, 1, 1], [], []>} : vector<8x96xf32>, vector<96x128xf32>, vector<8x128xf32> -> vector<8x128xf32>
    %368 = vector.broadcast %11 : vector<1x128xf32> to vector<8x128xf32>
    %369 = arith.addf %367, %368 : vector<8x128xf32>
    %370 = vector.extract_strided_slice %369 {offsets = [0, 0], sizes = [8, 96], strides = [1, 1]} : vector<8x128xf32> to vector<8x96xf32>
    %371 = arith.negf %370 : vector<8x96xf32>
    %372 = math.exp %371 : vector<8x96xf32>
    %cst_80 = arith.constant 1.000000e+00 : f32
    %373 = vector.broadcast %cst_80 : f32 to vector<8x96xf32>
    %374 = arith.addf %373, %372 : vector<8x96xf32>
    %375 = arith.divf %373, %374 : vector<8x96xf32>
    %376 = vector.extract_strided_slice %375 {offsets = [0, 0], sizes = [8, 32], strides = [1, 1]} : vector<8x96xf32> to vector<8x32xf32>
    %377 = vector.extract_strided_slice %375 {offsets = [0, 32], sizes = [8, 32], strides = [1, 1]} : vector<8x96xf32> to vector<8x32xf32>
    %378 = vector.extract_strided_slice %375 {offsets = [0, 64], sizes = [8, 32], strides = [1, 1]} : vector<8x96xf32> to vector<8x32xf32>
    %379 = vector.extract_strided_slice %369 {offsets = [0, 96], sizes = [8, 32], strides = [1, 1]} : vector<8x128xf32> to vector<8x32xf32>
    %380 = math.tanh %379 : vector<8x32xf32>
    %381 = arith.mulf %377, %318 : vector<8x32xf32>
    %382 = arith.mulf %376, %380 : vector<8x32xf32>
    %383 = arith.addf %381, %382 : vector<8x32xf32>
    %384 = math.tanh %383 : vector<8x32xf32>
    %385 = arith.mulf %378, %384 : vector<8x32xf32>
    %386 = tpu.concatenate %385, %340 in 1 : vector<8x32xf32>, vector<8x64xf32> -> vector<8x96xf32>
    %cst_81 = arith.constant dense<0.000000e+00> : vector<8x256xf32>
    %387 = tpu.matmul %386, %12, %cst_81 {dimension_numbers = #tpu.dot_dimension_numbers<[1], [0], [0], [1], [0, 0, 1, 1], [], []>} : vector<8x96xf32>, vector<96x256xf32>, vector<8x256xf32> -> vector<8x256xf32>
    %388 = vector.broadcast %13 : vector<1x256xf32> to vector<8x256xf32>
    %389 = arith.addf %387, %388 : vector<8x256xf32>
    %390 = vector.extract_strided_slice %389 {offsets = [0, 0], sizes = [8, 192], strides = [1, 1]} : vector<8x256xf32> to vector<8x192xf32>
    %391 = arith.negf %390 : vector<8x192xf32>
    %392 = math.exp %391 : vector<8x192xf32>
    %cst_82 = arith.constant 1.000000e+00 : f32
    %393 = vector.broadcast %cst_82 : f32 to vector<8x192xf32>
    %394 = arith.addf %393, %392 : vector<8x192xf32>
    %395 = arith.divf %393, %394 : vector<8x192xf32>
    %396 = vector.extract_strided_slice %395 {offsets = [0, 0], sizes = [8, 64], strides = [1, 1]} : vector<8x192xf32> to vector<8x64xf32>
    %397 = vector.extract_strided_slice %395 {offsets = [0, 64], sizes = [8, 64], strides = [1, 1]} : vector<8x192xf32> to vector<8x64xf32>
    %398 = vector.extract_strided_slice %395 {offsets = [0, 128], sizes = [8, 64], strides = [1, 1]} : vector<8x192xf32> to vector<8x64xf32>
    %399 = vector.extract_strided_slice %389 {offsets = [0, 192], sizes = [8, 64], strides = [1, 1]} : vector<8x256xf32> to vector<8x64xf32>
    %400 = math.tanh %399 : vector<8x64xf32>
    %401 = arith.mulf %397, %338 : vector<8x64xf32>
    %402 = arith.mulf %396, %400 : vector<8x64xf32>
    %403 = arith.addf %401, %402 : vector<8x64xf32>
    %404 = math.tanh %403 : vector<8x64xf32>
    %405 = arith.mulf %398, %404 : vector<8x64xf32>
    %406 = arith.index_cast %c5_i32 : i32 to index
    %c0_83 = arith.constant 0 : index
    %c0_84 = arith.constant 0 : index
    %407 = vector.load %arg12[%406, %c0_83, %c0_84] : memref<8x8x64xf32, #tpu.memory_space<vmem>>, vector<1x8x64xf32>
    %408 = vector.shape_cast %407 : vector<1x8x64xf32> to vector<8x64xf32>
    %409 = vector.shape_cast %405 : vector<8x64xf32> to vector<1x8x64xf32>
    tpu.vector_store %arg12[%406, %c0_83, %c0_84], %409 {strides = array<i32>} : memref<8x8x64xf32, #tpu.memory_space<vmem>>, vector<1x8x64xf32>,
    %c6_i32 = arith.constant 6 : i32
    %410 = arith.index_cast %c6_i32 : i32 to index
    %c0_85 = arith.constant 0 : index
    %c0_86 = arith.constant 0 : index
    %411 = vector.load %arg11[%410, %c0_85, %c0_86] : memref<8x8x256xf32, #tpu.memory_space<vmem>>, vector<1x8x256xf32>
    %412 = vector.shape_cast %411 : vector<1x8x256xf32> to vector<8x256xf32>
    %cst_87 = arith.constant dense<0.000000e+00> : vector<8x256xf32>
    %413 = tpu.matmul %365, %9, %cst_87 {dimension_numbers = #tpu.dot_dimension_numbers<[1], [0], [0], [1], [0, 0, 1, 1], [], []>} : vector<8x64xf32>, vector<64x256xf32>, vector<8x256xf32> -> vector<8x256xf32>
    %414 = arith.addf %412, %413 : vector<8x256xf32>
    %415 = vector.extract_strided_slice %414 {offsets = [0, 0], sizes = [8, 192], strides = [1, 1]} : vector<8x256xf32> to vector<8x192xf32>
    %416 = arith.negf %415 : vector<8x192xf32>
    %417 = math.exp %416 : vector<8x192xf32>
    %cst_88 = arith.constant 1.000000e+00 : f32
    %418 = vector.broadcast %cst_88 : f32 to vector<8x192xf32>
    %419 = arith.addf %418, %417 : vector<8x192xf32>
    %420 = arith.divf %418, %419 : vector<8x192xf32>
    %421 = vector.extract_strided_slice %420 {offsets = [0, 0], sizes = [8, 64], strides = [1, 1]} : vector<8x192xf32> to vector<8x64xf32>
    %422 = vector.extract_strided_slice %420 {offsets = [0, 64], sizes = [8, 64], strides = [1, 1]} : vector<8x192xf32> to vector<8x64xf32>
    %423 = vector.extract_strided_slice %420 {offsets = [0, 128], sizes = [8, 64], strides = [1, 1]} : vector<8x192xf32> to vector<8x64xf32>
    %424 = vector.extract_strided_slice %414 {offsets = [0, 192], sizes = [8, 64], strides = [1, 1]} : vector<8x256xf32> to vector<8x64xf32>
    %425 = math.tanh %424 : vector<8x64xf32>
    %426 = arith.mulf %422, %363 : vector<8x64xf32>
    %427 = arith.mulf %421, %425 : vector<8x64xf32>
    %428 = arith.addf %426, %427 : vector<8x64xf32>
    %429 = math.tanh %428 : vector<8x64xf32>
    %430 = arith.mulf %423, %429 : vector<8x64xf32>
    %431 = tpu.concatenate %430, %385 in 1 : vector<8x64xf32>, vector<8x32xf32> -> vector<8x96xf32>
    %cst_89 = arith.constant dense<0.000000e+00> : vector<8x128xf32>
    %432 = tpu.matmul %431, %10, %cst_89 {dimension_numbers = #tpu.dot_dimension_numbers<[1], [0], [0], [1], [0, 0, 1, 1], [], []>} : vector<8x96xf32>, vector<96x128xf32>, vector<8x128xf32> -> vector<8x128xf32>
    %433 = vector.broadcast %11 : vector<1x128xf32> to vector<8x128xf32>
    %434 = arith.addf %432, %433 : vector<8x128xf32>
    %435 = vector.extract_strided_slice %434 {offsets = [0, 0], sizes = [8, 96], strides = [1, 1]} : vector<8x128xf32> to vector<8x96xf32>
    %436 = arith.negf %435 : vector<8x96xf32>
    %437 = math.exp %436 : vector<8x96xf32>
    %cst_90 = arith.constant 1.000000e+00 : f32
    %438 = vector.broadcast %cst_90 : f32 to vector<8x96xf32>
    %439 = arith.addf %438, %437 : vector<8x96xf32>
    %440 = arith.divf %438, %439 : vector<8x96xf32>
    %441 = vector.extract_strided_slice %440 {offsets = [0, 0], sizes = [8, 32], strides = [1, 1]} : vector<8x96xf32> to vector<8x32xf32>
    %442 = vector.extract_strided_slice %440 {offsets = [0, 32], sizes = [8, 32], strides = [1, 1]} : vector<8x96xf32> to vector<8x32xf32>
    %443 = vector.extract_strided_slice %440 {offsets = [0, 64], sizes = [8, 32], strides = [1, 1]} : vector<8x96xf32> to vector<8x32xf32>
    %444 = vector.extract_strided_slice %434 {offsets = [0, 96], sizes = [8, 32], strides = [1, 1]} : vector<8x128xf32> to vector<8x32xf32>
    %445 = math.tanh %444 : vector<8x32xf32>
    %446 = arith.mulf %442, %383 : vector<8x32xf32>
    %447 = arith.mulf %441, %445 : vector<8x32xf32>
    %448 = arith.addf %446, %447 : vector<8x32xf32>
    %449 = math.tanh %448 : vector<8x32xf32>
    %450 = arith.mulf %443, %449 : vector<8x32xf32>
    %451 = tpu.concatenate %450, %405 in 1 : vector<8x32xf32>, vector<8x64xf32> -> vector<8x96xf32>
    %cst_91 = arith.constant dense<0.000000e+00> : vector<8x256xf32>
    %452 = tpu.matmul %451, %12, %cst_91 {dimension_numbers = #tpu.dot_dimension_numbers<[1], [0], [0], [1], [0, 0, 1, 1], [], []>} : vector<8x96xf32>, vector<96x256xf32>, vector<8x256xf32> -> vector<8x256xf32>
    %453 = vector.broadcast %13 : vector<1x256xf32> to vector<8x256xf32>
    %454 = arith.addf %452, %453 : vector<8x256xf32>
    %455 = vector.extract_strided_slice %454 {offsets = [0, 0], sizes = [8, 192], strides = [1, 1]} : vector<8x256xf32> to vector<8x192xf32>
    %456 = arith.negf %455 : vector<8x192xf32>
    %457 = math.exp %456 : vector<8x192xf32>
    %cst_92 = arith.constant 1.000000e+00 : f32
    %458 = vector.broadcast %cst_92 : f32 to vector<8x192xf32>
    %459 = arith.addf %458, %457 : vector<8x192xf32>
    %460 = arith.divf %458, %459 : vector<8x192xf32>
    %461 = vector.extract_strided_slice %460 {offsets = [0, 0], sizes = [8, 64], strides = [1, 1]} : vector<8x192xf32> to vector<8x64xf32>
    %462 = vector.extract_strided_slice %460 {offsets = [0, 64], sizes = [8, 64], strides = [1, 1]} : vector<8x192xf32> to vector<8x64xf32>
    %463 = vector.extract_strided_slice %460 {offsets = [0, 128], sizes = [8, 64], strides = [1, 1]} : vector<8x192xf32> to vector<8x64xf32>
    %464 = vector.extract_strided_slice %454 {offsets = [0, 192], sizes = [8, 64], strides = [1, 1]} : vector<8x256xf32> to vector<8x64xf32>
    %465 = math.tanh %464 : vector<8x64xf32>
    %466 = arith.mulf %462, %403 : vector<8x64xf32>
    %467 = arith.mulf %461, %465 : vector<8x64xf32>
    %468 = arith.addf %466, %467 : vector<8x64xf32>
    %469 = math.tanh %468 : vector<8x64xf32>
    %470 = arith.mulf %463, %469 : vector<8x64xf32>
    %471 = arith.index_cast %c6_i32 : i32 to index
    %c0_93 = arith.constant 0 : index
    %c0_94 = arith.constant 0 : index
    %472 = vector.load %arg12[%471, %c0_93, %c0_94] : memref<8x8x64xf32, #tpu.memory_space<vmem>>, vector<1x8x64xf32>
    %473 = vector.shape_cast %472 : vector<1x8x64xf32> to vector<8x64xf32>
    %474 = vector.shape_cast %470 : vector<8x64xf32> to vector<1x8x64xf32>
    tpu.vector_store %arg12[%471, %c0_93, %c0_94], %474 {strides = array<i32>} : memref<8x8x64xf32, #tpu.memory_space<vmem>>, vector<1x8x64xf32>,
    %c7_i32 = arith.constant 7 : i32
    %475 = arith.index_cast %c7_i32 : i32 to index
    %c0_95 = arith.constant 0 : index
    %c0_96 = arith.constant 0 : index
    %476 = vector.load %arg11[%475, %c0_95, %c0_96] : memref<8x8x256xf32, #tpu.memory_space<vmem>>, vector<1x8x256xf32>
    %477 = vector.shape_cast %476 : vector<1x8x256xf32> to vector<8x256xf32>
    %cst_97 = arith.constant dense<0.000000e+00> : vector<8x256xf32>
    %478 = tpu.matmul %430, %9, %cst_97 {dimension_numbers = #tpu.dot_dimension_numbers<[1], [0], [0], [1], [0, 0, 1, 1], [], []>} : vector<8x64xf32>, vector<64x256xf32>, vector<8x256xf32> -> vector<8x256xf32>
    %479 = arith.addf %477, %478 : vector<8x256xf32>
    %480 = vector.extract_strided_slice %479 {offsets = [0, 0], sizes = [8, 192], strides = [1, 1]} : vector<8x256xf32> to vector<8x192xf32>
    %481 = arith.negf %480 : vector<8x192xf32>
    %482 = math.exp %481 : vector<8x192xf32>
    %cst_98 = arith.constant 1.000000e+00 : f32
    %483 = vector.broadcast %cst_98 : f32 to vector<8x192xf32>
    %484 = arith.addf %483, %482 : vector<8x192xf32>
    %485 = arith.divf %483, %484 : vector<8x192xf32>
    %486 = vector.extract_strided_slice %485 {offsets = [0, 0], sizes = [8, 64], strides = [1, 1]} : vector<8x192xf32> to vector<8x64xf32>
    %487 = vector.extract_strided_slice %485 {offsets = [0, 64], sizes = [8, 64], strides = [1, 1]} : vector<8x192xf32> to vector<8x64xf32>
    %488 = vector.extract_strided_slice %485 {offsets = [0, 128], sizes = [8, 64], strides = [1, 1]} : vector<8x192xf32> to vector<8x64xf32>
    %489 = vector.extract_strided_slice %479 {offsets = [0, 192], sizes = [8, 64], strides = [1, 1]} : vector<8x256xf32> to vector<8x64xf32>
    %490 = math.tanh %489 : vector<8x64xf32>
    %491 = arith.mulf %487, %428 : vector<8x64xf32>
    %492 = arith.mulf %486, %490 : vector<8x64xf32>
    %493 = arith.addf %491, %492 : vector<8x64xf32>
    %494 = math.tanh %493 : vector<8x64xf32>
    %495 = arith.mulf %488, %494 : vector<8x64xf32>
    %496 = tpu.concatenate %495, %450 in 1 : vector<8x64xf32>, vector<8x32xf32> -> vector<8x96xf32>
    %cst_99 = arith.constant dense<0.000000e+00> : vector<8x128xf32>
    %497 = tpu.matmul %496, %10, %cst_99 {dimension_numbers = #tpu.dot_dimension_numbers<[1], [0], [0], [1], [0, 0, 1, 1], [], []>} : vector<8x96xf32>, vector<96x128xf32>, vector<8x128xf32> -> vector<8x128xf32>
    %498 = vector.broadcast %11 : vector<1x128xf32> to vector<8x128xf32>
    %499 = arith.addf %497, %498 : vector<8x128xf32>
    %500 = vector.extract_strided_slice %499 {offsets = [0, 0], sizes = [8, 96], strides = [1, 1]} : vector<8x128xf32> to vector<8x96xf32>
    %501 = arith.negf %500 : vector<8x96xf32>
    %502 = math.exp %501 : vector<8x96xf32>
    %cst_100 = arith.constant 1.000000e+00 : f32
    %503 = vector.broadcast %cst_100 : f32 to vector<8x96xf32>
    %504 = arith.addf %503, %502 : vector<8x96xf32>
    %505 = arith.divf %503, %504 : vector<8x96xf32>
    %506 = vector.extract_strided_slice %505 {offsets = [0, 0], sizes = [8, 32], strides = [1, 1]} : vector<8x96xf32> to vector<8x32xf32>
    %507 = vector.extract_strided_slice %505 {offsets = [0, 32], sizes = [8, 32], strides = [1, 1]} : vector<8x96xf32> to vector<8x32xf32>
    %508 = vector.extract_strided_slice %505 {offsets = [0, 64], sizes = [8, 32], strides = [1, 1]} : vector<8x96xf32> to vector<8x32xf32>
    %509 = vector.extract_strided_slice %499 {offsets = [0, 96], sizes = [8, 32], strides = [1, 1]} : vector<8x128xf32> to vector<8x32xf32>
    %510 = math.tanh %509 : vector<8x32xf32>
    %511 = arith.mulf %507, %448 : vector<8x32xf32>
    %512 = arith.mulf %506, %510 : vector<8x32xf32>
    %513 = arith.addf %511, %512 : vector<8x32xf32>
    %514 = math.tanh %513 : vector<8x32xf32>
    %515 = arith.mulf %508, %514 : vector<8x32xf32>
    %516 = tpu.concatenate %515, %470 in 1 : vector<8x32xf32>, vector<8x64xf32> -> vector<8x96xf32>
    %cst_101 = arith.constant dense<0.000000e+00> : vector<8x256xf32>
    %517 = tpu.matmul %516, %12, %cst_101 {dimension_numbers = #tpu.dot_dimension_numbers<[1], [0], [0], [1], [0, 0, 1, 1], [], []>} : vector<8x96xf32>, vector<96x256xf32>, vector<8x256xf32> -> vector<8x256xf32>
    %518 = vector.broadcast %13 : vector<1x256xf32> to vector<8x256xf32>
    %519 = arith.addf %517, %518 : vector<8x256xf32>
    %520 = vector.extract_strided_slice %519 {offsets = [0, 0], sizes = [8, 192], strides = [1, 1]} : vector<8x256xf32> to vector<8x192xf32>
    %521 = arith.negf %520 : vector<8x192xf32>
    %522 = math.exp %521 : vector<8x192xf32>
    %cst_102 = arith.constant 1.000000e+00 : f32
    %523 = vector.broadcast %cst_102 : f32 to vector<8x192xf32>
    %524 = arith.addf %523, %522 : vector<8x192xf32>
    %525 = arith.divf %523, %524 : vector<8x192xf32>
    %526 = vector.extract_strided_slice %525 {offsets = [0, 0], sizes = [8, 64], strides = [1, 1]} : vector<8x192xf32> to vector<8x64xf32>
    %527 = vector.extract_strided_slice %525 {offsets = [0, 64], sizes = [8, 64], strides = [1, 1]} : vector<8x192xf32> to vector<8x64xf32>
    %528 = vector.extract_strided_slice %525 {offsets = [0, 128], sizes = [8, 64], strides = [1, 1]} : vector<8x192xf32> to vector<8x64xf32>
    %529 = vector.extract_strided_slice %519 {offsets = [0, 192], sizes = [8, 64], strides = [1, 1]} : vector<8x256xf32> to vector<8x64xf32>
    %530 = math.tanh %529 : vector<8x64xf32>
    %531 = arith.mulf %527, %468 : vector<8x64xf32>
    %532 = arith.mulf %526, %530 : vector<8x64xf32>
    %533 = arith.addf %531, %532 : vector<8x64xf32>
    %534 = math.tanh %533 : vector<8x64xf32>
    %535 = arith.mulf %528, %534 : vector<8x64xf32>
    %536 = arith.index_cast %c7_i32 : i32 to index
    %c0_103 = arith.constant 0 : index
    %c0_104 = arith.constant 0 : index
    %537 = vector.load %arg12[%536, %c0_103, %c0_104] : memref<8x8x64xf32, #tpu.memory_space<vmem>>, vector<1x8x64xf32>
    %538 = vector.shape_cast %537 : vector<1x8x64xf32> to vector<8x64xf32>
    %539 = vector.shape_cast %535 : vector<8x64xf32> to vector<1x8x64xf32>
    tpu.vector_store %arg12[%536, %c0_103, %c0_104], %539 {strides = array<i32>} : memref<8x8x64xf32, #tpu.memory_space<vmem>>, vector<1x8x64xf32>,
    %c8_i32 = arith.constant 8 : i32
    %c0_105 = arith.constant 0 : index
    %c0_106 = arith.constant 0 : index
    %c0_107 = arith.constant 0 : index
    %540 = vector.load %arg12[%c0_105, %c0_106, %c0_107] : memref<8x8x64xf32, #tpu.memory_space<vmem>>, vector<8x8x64xf32>
    %541 = vector.shape_cast %540 : vector<8x8x64xf32> to vector<64x64xf32>
    %c0_108 = arith.constant 0 : index
    %c0_109 = arith.constant 0 : index
    %542 = vector.load %arg8[%c0_108, %c0_109] : memref<64x2xf32, #tpu.memory_space<vmem>>, vector<64x2xf32>
    %cst_110 = arith.constant dense<0.000000e+00> : vector<64x2xf32>
    %543 = tpu.matmul %541, %542, %cst_110 {dimension_numbers = #tpu.dot_dimension_numbers<[1], [0], [0], [1], [0, 0, 1, 1], [], []>} : vector<64x64xf32>, vector<64x2xf32>, vector<64x2xf32> -> vector<64x2xf32>
    %c0_111 = arith.constant 0 : index
    %c0_112 = arith.constant 0 : index
    %544 = vector.load %arg9[%c0_111, %c0_112] : memref<1x2xf32, #tpu.memory_space<vmem>>, vector<1x2xf32>
    %545 = vector.broadcast %544 : vector<1x2xf32> to vector<64x2xf32>
    %546 = arith.addf %543, %545 : vector<64x2xf32>
    %547 = vector.shape_cast %546 : vector<64x2xf32> to vector<8x8x2xf32>
    %c0_113 = arith.constant 0 : index
    %c0_114 = arith.constant 0 : index
    %c0_115 = arith.constant 0 : index
    %548 = vector.load %arg10[%c0_113, %c0_114, %c0_115] : memref<8x8x2xf32, #tpu.memory_space<vmem>>, vector<8x8x2xf32>
    tpu.vector_store %arg10[%c0_113, %c0_114, %c0_115], %547 {strides = array<i32>} : memref<8x8x2xf32, #tpu.memory_space<vmem>>, vector<8x8x2xf32>,
    return
  }
}

</mosaic_0001>

<bundles_post_ra>
// kernel: tpu_custom_call.1
= control target key start
LH: loop header
LB: loop body
LE: loop exit
PB: predicated region body
PF: predicated region fallthrough
CT: control target
= control target key end

     0   :  { %15 = vsyncpa [#allocation5], 0  ;;  %s4512_s0 = inlined_call_operand.vmem [shape: f32[8,8,2], index: 0, kind: input, shape index: {}]   ;;  %s4513_s1 = inlined_call_operand.vmem [shape: f32[2,256], index: 1, kind: input, shape index: {}]   ;;  %s4514_s2 = inlined_call_operand.vmem [shape: f32[64,256], index: 2, kind: input, shape index: {}]   ;;  %s4515_s3 = inlined_call_operand.vmem [shape: f32[1,256], index: 3, kind: input, shape index: {}]   ;;  %s4516_s4 = inlined_call_operand.hbm [shape: f32[96,128], index: 4, kind: input, shape index: {}]   ;;  %s4517_s5 = inlined_call_operand.vmem [shape: f32[1,128], index: 5, kind: input, shape index: {}]   ;;  %s4518_s6 = inlined_call_operand.hbm [shape: f32[96,256], index: 6, kind: input, shape index: {}]   ;;  %s4519_s7 = inlined_call_operand.vmem [shape: f32[1,256], index: 7, kind: input, shape index: {}]   ;;  %s4520_s8 = inlined_call_operand.vmem [shape: f32[64,2], index: 8, kind: input, shape index: {}]   ;;  %s4521_s9 = inlined_call_operand.vmem [shape: f32[1,2], index: 9, kind: input, shape index: {}]   ;;  %s4522_s10 = inlined_call_operand.vmem [shape: f32[8,8,2], index: 10, kind: output, shape index: {}]  }
   0x1   :  { %s29_s15 = sshll.u32 %s4516_s4, 4  ;;  %s30_s15 = int_to_ptr.hbm [resolvable:$true] %s29_s15 }
   0x2   :  { %16 = vsyncpa [#allocation7], 0  ;;  %s3077_s16 = smov [#allocation4]   ;;  %s44_s20 = sshll.u32 %s4518_s6, 4  ;;  %s45_s20 = int_to_ptr.hbm [resolvable:$true] %s44_s20 }
   0x3   :  { %s31_s17 = sshll.u32 %s3077_s16, 4  ;;  %s3078_s21 = smov 128   ;;  %s32_s17 = int_to_ptr.vmem [resolvable:$true] %s31_s17 }
   0x4   :  { %s3079_s22 = smov 8   ;;  %s3080_s23 = smov [#allocation6]  }
   0x5   :  { %37 = dma.hbm_to_vmem [thread:$0]  %s30_s15, 1536, %s32_s17, [#allocation5], %s3078_s21, %s3078_s21, %s3079_s22  }
   0x6   :  { %s46_s24 = sshll.u32 %s3080_s23, 4  ;;  %s3081_s25 = smov 256   ;;  %s47_s24 = int_to_ptr.vmem [resolvable:$true] %s46_s24 }
   0x7   :  { %s3082_s26 = smov 16  }
   0x8   :  { %52 = dma.hbm_to_vmem [thread:$0]  %s45_s20, 3072, %s47_s24, [#allocation7], %s3081_s25, %s3081_s25, %s3082_s26  }
   0x9   :  { %3073 = dma.done.wait [#allocation5], 1536  }
   0xa   :  { %3074 = vsyncadd [#allocation5], 4294965760 }
   0xb   :  { %3075 = dma.done.wait [#allocation7], 3072  }
   0xc   :  { %3076 = vsyncadd [#allocation7], 4294964224  ;;  %v3150_v0 = vld [vmem:[%s4514_s2 + $0x78] sm:$0xff]  ;;  %v3155_v1 = vld [vmem:[%s4514_s2 + $0x68] sm:$0xff]  ;;  %vm111_vm0 = vcmask 1041408   ;;  %vm86_vm1 = vcmask 15360  }
   0xd   :  { %302 = vmatpush.msra.mxu3 %v3150_v0  ;;  %v3161_v2 = vld [vmem:[%s4514_s2 + $0x58] sm:$0xff]  ;;  %v75_v3 = vld [vmem:[%s4513_s1] sm:$0xf]  ;;  %v3170_v4 = vld [vmem:[%s4514_s2 + $0x70] sm:$0xff]  ;;  %v3083_v20 = vmov 0.0   ;;  %s3084_s19 = smov 64  }
   0xe   :  { %83 = vst [vmem:[#allocation1] ss:$4 sm:$0xff] %v75_v3  ;;  %v3175_v5 = vld [vmem:[%s4514_s2 + $0x60] sm:$0xff]  ;;  %v3180_v6 = vld [vmem:[%s4514_s2 + $0x48] sm:$0xff]  ;;  %282 = vmatpush.msra.mxu2 %v3170_v4  ;;  %v3187_v7 = vld [vmem:[%s4514_s2 + $0x50] sm:$0xff]  ;;  %vm270_vm10 = vcmask 523264  }
   0xf   :  { %303 = vmatpush.msra.mxu3 %v3155_v1  ;;  %v3192_v8 = vld [vmem:[%s4514_s2 + $0x38] sm:$0xff]  ;;  %v3199_v9 = vld [vmem:[%s4514_s2 + $0x40] sm:$0xff]  ;;  %v3204_v10 = vld [vmem:[%s4514_s2 + $0x28] sm:$0xff]  ;;  %vm376_vm11 = vcmask 785408   ;;  %s3085_s21 = smov 32  }
  0x10   :  { %283 = vmatpush.msra.mxu2 %v3175_v5  ;;  %v3211_v11 = vld [vmem:[%s4514_s2 + $0x18] sm:$0xff]  ;;  %v67_v12 = vld [vmem:[%s4512_s0] sm:$0xff]  ;;  %v3219_v13 = vld [vmem:[%s4514_s2 + $0x30] sm:$0xff] }
  0x11   :  { %304 = vmatpush.msra.mxu3 %v3161_v2  ;;  %v3227_v16 = vld [vmem:[%s4514_s2 + $0x20] sm:$0xff]  ;;  %v3232_v17 = vld [vmem:[%s4514_s2 + $0x8] sm:$0xff]  ;;  %v3240_v18 = vld [vmem:[%s4514_s2 + $0x10] sm:$0xff] }
  0x12   :  { %284 = vmatpush.msra.mxu2 %v3187_v7  ;;  %v3249_v19 = vld [vmem:[%s4514_s2] sm:$0xff]  ;;  %v3269_v49 = vld [vmem:[#allocation4 + $0x50] sm:$0xff]  ;;  %v3273_v50 = vld [vmem:[#allocation4 + $0x48] sm:$0xff] }
  0x13   :  { %305 = vmatpush.msra.mxu3 %v3180_v6  ;;  %v76_v21 = vld [vmem:[%s4515_s3] sm:$0x3]  ;;  %v3277_v51 = vld [vmem:[#allocation4 + $0x40] sm:$0xff]  ;;  %v3285_v53 = vld [vmem:[#allocation4 + $0x30] sm:$0xff] }
  0x14   :  { %285 = vmatpush.msra.mxu2 %v3199_v9  ;;  %v3256_v22 = vperm.slane %v76_v21, 1  ;;  %v3263_v28 = vperm.slane %v76_v21, 0  ;;  %v3267_v48 = vld [vmem:[#allocation4 + $0x58] sm:$0xff]  ;;  %v3289_v54 = vld [vmem:[#allocation4 + $0x28] sm:$0xff]  ;;  %v3293_v55 = vld [vmem:[#allocation4 + $0x20] sm:$0xff] }
  0x15   :  { %306 = vmatpush.msra.mxu3 %v3192_v8  ;;  %v85_v14 = vld.sshfl [vmem:[#allocation1 + $0x8] sm:$0xff pattern:$0x73625140]  ;;  %v84_v15 = vld.sshfl [vmem:[#allocation1] sm:$0xff pattern:$0x73625140] }
  0x16   :  { %2581 = vmatpush.msk.msra.mxu1 %vm111_vm0, %v85_v14  ;;  %286 = vmatpush.msra.mxu2 %v3219_v13  ;;  %v3281_v52 = vld [vmem:[#allocation4 + $0x38] sm:$0xff]  ;;  %v3301_v57 = vld [vmem:[#allocation4 + $0x10] sm:$0xff]  ;;  %v3315_v14 = vld [vmem:[#allocation4] sm:$0xff] }
  0x17   :  { %307 = vmatpush.msra.mxu3 %v3204_v10  ;;  %2582 = vmatmul.msk.f32.vlgmr.msra.gmra.mxu1 %vm86_vm1, %v67_v12  ;;  %v3297_v56 = vld [vmem:[#allocation4 + $0x18] sm:$0xff] }
  0x18   :  { %2572 = vmatpush.msk.msra.mxu0 %vm111_vm0, %v84_v15  ;;  %287 = vmatpush.msra.mxu2 %v3227_v16  ;;  %vm441_vm0 = vcmask 261120  }
  0x19   :  { %308 = vmatpush.msra.mxu3 %v3211_v11  ;;  %2573 = vmatmul.msk.f32.vlgmr.msra.gmra.mxu0 %vm86_vm1, %v67_v12  ;;  %v3312_v12 = vld [vmem:[#allocation4 + $0x8] sm:$0xff] }
  0x1a   :  { %288 = vmatpush.msra.mxu2 %v3240_v18  ;;  %660 = vmatpush.msrb.mxu1 %v3267_v48 }
  0x1b   :  { %309 = vmatpush.msra.mxu3 %v3232_v17 }
  0x1c   :  { %310 = vmatmul.f32.vlgmr.msra.gmra.mxu3 %v3083_v20  ;;  %289 = vmatpush.msra.mxu2 %v3249_v19 }
  0x1d   :  { %290 = vmatmul.f32.vlgmr.msra.gmra.mxu2 %v3083_v20  ;;  %384 = vmatpush.msrb.mxu3 %v3267_v48 }
  0x1e   :  { %661 = vmatpush.msrb.mxu1 %v3269_v49 }
  0x1f   :  { %385 = vmatpush.msrb.mxu3 %v3269_v49 }
  0x20   :  { %662 = vmatpush.msrb.mxu1 %v3273_v50 }
  0x21   :  { %386 = vmatpush.msrb.mxu3 %v3273_v50 }
  0x22   :  { %663 = vmatpush.msrb.mxu1 %v3277_v51 }
  0x23   :  { %387 = vmatpush.msrb.mxu3 %v3277_v51 }
  0x24   :  { %664 = vmatpush.msrb.mxu1 %v3281_v52 }
  0x25   :  { %388 = vmatpush.msrb.mxu3 %v3281_v52 }
  0x26   :  { %665 = vmatpush.msrb.mxu1 %v3285_v53 }
  0x27   :  { %389 = vmatpush.msrb.mxu3 %v3285_v53 }
  0x28   :  { %666 = vmatpush.msrb.mxu1 %v3289_v54 }
  0x29   :  { %390 = vmatpush.msrb.mxu3 %v3289_v54 }
  0x2a   :  { %667 = vmatpush.msrb.mxu1 %v3293_v55 }
  0x2b   :  { %391 = vmatpush.msrb.mxu3 %v3293_v55 }
  0x2c   :  { %668 = vmatpush.msrb.mxu1 %v3297_v56 }
  0x2d   :  { %392 = vmatpush.msrb.mxu3 %v3297_v56 }
  0x2e   :  { %669 = vmatpush.msrb.mxu1 %v3301_v57 }
  0x2f   :  { %393 = vmatpush.msrb.mxu3 %v3301_v57 }
  0x30   :  { %670 = vmatpush.msrb.mxu1 %v3312_v12 }
  0x31   :  { %394 = vmatpush.msrb.mxu3 %v3312_v12 }
  0x32   :  { %671 = vmatpush.msrb.mxu1 %v3315_v14 }
  0x33   :  { %395 = vmatpush.msrb.mxu3 %v3315_v14 }
  0x34   :  { %857 = vmatpush.msra.mxu1 %v3150_v0 }
  0x36   :  { %858 = vmatpush.msra.mxu1 %v3155_v1 }
  0x38   :  { %859 = vmatpush.msra.mxu1 %v3161_v2 }
  0x3a   :  { %860 = vmatpush.msra.mxu1 %v3180_v6 }
  0x3c   :  { %861 = vmatpush.msra.mxu1 %v3192_v8 }
  0x3e   :  { %862 = vmatpush.msra.mxu1 %v3204_v10 }
  0x40   :  { %863 = vmatpush.msra.mxu1 %v3211_v11 }
  0x42   :  { %864 = vmatpush.msra.mxu1 %v3232_v17 }
  0x94   :  { %v174_v23 = vpop.f32.mrf.mxu1 }
  0x95   :  { %v175_v24 = vadd.f32 %v174_v23, %v3256_v22 }
  0x96   :  { %v133_v29 = vpop.f32.mrf.mxu0 }
  0x97   :  { %v134_v30 = vadd.f32 %v133_v29, %v3263_v28 }
  0x9f   :  { %v311_v25 = vpop.f32.mrf.mxu3 }
  0xa0   :  { %v3259_v26 = vadd.f32 %v311_v25, %v175_v24  ;;  %v291_v31 = vpop.f32.mrf.mxu2 }
  0xa1   :  { %v314_v32 = vadd.f32 %v291_v31, %v134_v30 }
  0xa2   :  { %2687 = vtanh.f32 %v3259_v26  ;;  %v2591_v62 = vmul.f32 -1.442695, %v3259_v26 }
  0xa3   :  { %v2590_v33 = vmul.f32 -1.442695, %v314_v32 }
  0xa5   :  { %2689 = vpow2.f32 %v2590_v33 }
  0xa8   :  { %v2688_v27 = vpop.eup %2687 }
  0xa9   :  { %357 = vrot.lane.b32.xlu0 %v2688_v27, %s3084_s19 }
  0xab   :  { %v2690_v34 = vpop.eup %2689 }
  0xac   :  { %v322_v35 = vadd.f32 1.0, %v2690_v34  ;;  %v3336_v34 = vld [vmem:[%s4517_s5] ss:$0 sm:$0xff] }
  0xae   :  { %2691 = vrcp.f32 %v322_v35  ;;  %vm329_vm2 = vweird.f32 %v322_v35  ;;  %v335_v40 = vand.u32 2147483648, %v322_v35  ;;  %v333_v42 = vand.u32 2147483647, %v322_v35 }
  0xb0   :  { %v336_v43 = vor.u32 1.1754944e-38, %v335_v40  ;;  %vm334_vm5 = vcmp.eq.f32.partialorder %v333_v42, 8.507059e+37 }
  0xb4   :  { %v2692_v36 = vpop.eup %2691 }
  0xb5   :  { %v325_v37 = vmul.f32 %v2692_v36, %v322_v35  ;;  %vm330_vm3 = vweird.f32 %v2692_v36 }
  0xb6   :  { %vm331_vm4 = vmor %vm329_vm2, %vm330_vm3 }
  0xb7   :  { %v326_v38 = vsub.f32 1.0, %v325_v37 }
  0xb9   :  { %v327_v39 = vmul.f32 %v2692_v36, %v326_v38 }
  0xbb   :  { %v328_v41 = vadd.f32 %v2692_v36, %v327_v39 }
  0xbd   :  { %v332_v44 = vsel %vm331_vm4, %v2692_v36, %v328_v41 }
  0xbe   :  { %v337_v46 = vsel %vm334_vm5, %v336_v43, %v332_v44 }
  0xbf   :  { %v355_v58 = vmul.f32 0.0, %v337_v46 }
 0x11b   :  { %v358_v45 = vpop.permute.xlu0 %357 }
 0x11c   :  { %v360_v47 = vmul.f32 %v358_v45, %v337_v46 }
 0x11e   :  { %362 = vrot.lane.b32.xlu0 %v360_v47, %s3084_s19 }
 0x190   :  { %v363_v59 = vpop.permute.xlu0 %362 }
 0x191   :  { %v3307_v60 = vadd.f32 %v363_v59, %v355_v58 }
 0x193   :  { %2693 = vtanh.f32 %v3307_v60 }
 0x194   :  { %2695 = vpow2.f32 %v2591_v62 }
 0x199   :  { %v2694_v61 = vpop.eup %2693 }
 0x19a   :  { %368 = vrot.lane.b32.xlu1 %v2694_v61, %s3084_s19  ;;  %v2696_v63 = vpop.eup %2695 }
 0x19b   :  { %v323_v3 = vadd.f32 1.0, %v2696_v63 }
 0x19d   :  { %2697 = vrcp.f32 %v323_v3  ;;  %v350_v25 = vand.u32 2147483648, %v323_v3  ;;  %vm344_vm7 = vweird.f32 %v323_v3  ;;  %v348_v26 = vand.u32 2147483647, %v323_v3 }
 0x19f   :  { %v351_v29 = vor.u32 1.1754944e-38, %v350_v25  ;;  %vm349_vm9 = vcmp.eq.f32.partialorder %v348_v26, 8.507059e+37  ;;  %v68_v25 = vld [vmem:[%s4512_s0 + $0x8] sm:$0xff]  ;;  %v3359_v26 = vld [vmem:[#allocation6 + $0x98] sm:$0xff] }
 0x1a0   :  { %2583 = vmatmul.msk.f32.gmra.mxu1 %vm86_vm1, %v68_v25  ;;  %2574 = vmatmul.msk.f32.gmra.mxu0 %vm86_vm1, %v68_v25  ;;  %v72_v25 = vld [vmem:[%s4512_s0 + $0x28] sm:$0xff] }
 0x1a3   :  { %v2698_v15 = vpop.eup %2697 }
 0x1a4   :  { %v340_v20 = vmul.f32 %v2698_v15, %v323_v3  ;;  %vm345_vm6 = vweird.f32 %v2698_v15 }
 0x1a5   :  { %vm346_vm8 = vmor %vm344_vm7, %vm345_vm6 }
 0x1a6   :  { %v341_v21 = vsub.f32 1.0, %v340_v20 }
 0x1a8   :  { %v342_v23 = vmul.f32 %v2698_v15, %v341_v21 }
 0x1aa   :  { %v343_v24 = vadd.f32 %v2698_v15, %v342_v23  ;;  %v3349_v23 = vld [vmem:[#allocation6 + $0xb8] sm:$0xff] }
 0x1ab   :  { %475 = vmatpush.msrb.mxu0 %v3349_v23  ;;  %749 = vmatpush.msrb.mxu2 %v3349_v23 }
 0x1ac   :  { %v347_v27 = vsel %vm346_vm8, %v2698_v15, %v343_v24  ;;  %v3351_v24 = vld [vmem:[#allocation6 + $0xa8] sm:$0xff] }
 0x1ad   :  { %v352_v30 = vsel %vm349_vm9, %v351_v29, %v347_v27  ;;  %476 = vmatpush.msrb.mxu0 %v3351_v24  ;;  %v3363_v27 = vld [vmem:[#allocation6 + $0xb0] sm:$0xff]  ;;  %v3365_v29 = vld [vmem:[#allocation6 + $0x88] sm:$0xff]  ;;  %750 = vmatpush.msrb.mxu2 %v3351_v24 }
 0x1ae   :  { %455 = vmatpush.msra.mxu3 %v3363_v27 }
 0x1af   :  { %477 = vmatpush.msrb.mxu0 %v3359_v26  ;;  %751 = vmatpush.msrb.mxu2 %v3359_v26 }
 0x1b1   :  { %478 = vmatpush.msrb.mxu0 %v3365_v29  ;;  %752 = vmatpush.msrb.mxu2 %v3365_v29 }
 0x20c   :  { %v369_v31 = vpop.permute.xlu1 %368 }
 0x20d   :  { %v3328_v32 = vmul.f32 %v369_v31, %v352_v30  ;;  %v3368_v30 = vld [vmem:[#allocation6 + $0xa0] sm:$0xff]  ;;  %v3372_v31 = vld [vmem:[#allocation6 + $0x90] sm:$0xff] }
 0x20e   :  { %456 = vmatpush.msra.mxu3 %v3368_v30 }
 0x20f   :  { %v372_v33 = vsel %vm270_vm10, %v3328_v32, 0.0 }
 0x210   :  { %2592 = vmatmul.msk.f32.vlgmr.msrb.gmra.mxu3 %vm376_vm11, %v372_v33  ;;  %v3374_v33 = vld [vmem:[#allocation6 + $0x78] sm:$0xff] }
 0x211   :  { %457 = vmatpush.msra.mxu3 %v3372_v31  ;;  %479 = vmatpush.msrb.mxu0 %v3374_v33 }
 0x212   :  { %753 = vmatpush.msrb.mxu2 %v3374_v33 }
 0x293   :  { %v397_v35 = vpop.f32.mrf.mxu3 }
 0x294   :  { %v398_v36 = vadd.f32 %v3336_v34, %v397_v35  ;;  %v69_v35 = vld [vmem:[%s4512_s0 + $0x10] sm:$0xff] }
 0x295   :  { %2584 = vmatmul.msk.f32.gmra.mxu1 %vm86_vm1, %v69_v35  ;;  %2575 = vmatmul.msk.f32.gmra.mxu0 %vm86_vm1, %v69_v35 }
 0x296   :  { %2699 = vtanh.f32 %v398_v36  ;;  %v2593_v38 = vmul.f32 -1.442695, %v398_v36  ;;  %v3382_v36 = vld [vmem:[#allocation6 + $0x80] sm:$0xff] }
 0x297   :  { %458 = vmatpush.msra.mxu3 %v3382_v36 }
 0x298   :  { %2701 = vpow2.f32 %v2593_v38  ;;  %v3389_v38 = vld [vmem:[#allocation6 + $0x70] sm:$0xff] }
 0x299   :  { %459 = vmatpush.msra.mxu3 %v3389_v38 }
 0x29c   :  { %v2700_v37 = vpop.eup %2699 }
 0x29d   :  { %422 = vrot.lane.b32.xlu1 %v2700_v37, %s3085_s21  ;;  %v3384_v37 = vld [vmem:[#allocation6 + $0x68] sm:$0xff] }
 0x29e   :  { %v2702_v39 = vpop.eup %2701  ;;  %480 = vmatpush.msrb.mxu0 %v3384_v37  ;;  %754 = vmatpush.msrb.mxu2 %v3384_v37 }
 0x29f   :  { %v403_v40 = vadd.f32 1.0, %v2702_v39  ;;  %v3393_v39 = vld [vmem:[#allocation6 + $0x58] sm:$0xff] }
 0x2a0   :  { %481 = vmatpush.msrb.mxu0 %v3393_v39  ;;  %755 = vmatpush.msrb.mxu2 %v3393_v39 }
 0x2a1   :  { %2703 = vrcp.f32 %v403_v40  ;;  %v415_v46 = vand.u32 2147483648, %v403_v40  ;;  %vm409_vm13 = vweird.f32 %v403_v40  ;;  %v413_v47 = vand.u32 2147483647, %v403_v40 }
 0x2a3   :  { %v416_v59 = vor.u32 1.1754944e-38, %v415_v46  ;;  %vm414_vm15 = vcmp.eq.f32.partialorder %v413_v47, 8.507059e+37  ;;  %v3418_v46 = vld [vmem:[#allocation6 + $0x28] sm:$0xff]  ;;  %v3421_v47 = vld [vmem:[#allocation6 + $0x30] sm:$0xff] }
 0x2a7   :  { %v2704_v41 = vpop.eup %2703 }
 0x2a8   :  { %v405_v42 = vmul.f32 %v2704_v41, %v403_v40  ;;  %vm410_vm12 = vweird.f32 %v2704_v41  ;;  %v3397_v40 = vld [vmem:[#allocation6 + $0x60] sm:$0xff] }
 0x2a9   :  { %vm411_vm14 = vmor %vm409_vm13, %vm410_vm12  ;;  %460 = vmatpush.msra.mxu3 %v3397_v40 }
 0x2aa   :  { %v406_v43 = vsub.f32 1.0, %v405_v42  ;;  %v3404_v42 = vld [vmem:[#allocation6 + $0x50] sm:$0xff] }
 0x2ab   :  { %461 = vmatpush.msra.mxu3 %v3404_v42 }
 0x2ac   :  { %v407_v44 = vmul.f32 %v2704_v41, %v406_v43  ;;  %v3407_v43 = vld [vmem:[#allocation6 + $0x38] sm:$0xff] }
 0x2ae   :  { %v408_v45 = vadd.f32 %v2704_v41, %v407_v44  ;;  %v70_v44 = vld [vmem:[%s4512_s0 + $0x18] sm:$0xff] }
 0x2af   :  { %2585 = vmatmul.msk.f32.gmra.mxu1 %vm86_vm1, %v70_v44  ;;  %2576 = vmatmul.msk.f32.gmra.mxu0 %vm86_vm1, %v70_v44 }
 0x2b0   :  { %v412_v58 = vsel %vm411_vm14, %v2704_v41, %v408_v45  ;;  %v3400_v41 = vld [vmem:[#allocation6 + $0x48] sm:$0xff]  ;;  %v3414_v45 = vld [vmem:[#allocation6 + $0x40] sm:$0xff] }
 0x2b1   :  { %v3340_v62 = vsel %vm414_vm15, %v416_v59, %v412_v58  ;;  %482 = vmatpush.msrb.mxu0 %v3400_v41  ;;  %462 = vmatpush.msra.mxu3 %v3414_v45  ;;  %v3426_v58 = vld [vmem:[#allocation6 + $0x18] sm:$0xff]  ;;  %v3429_v59 = vld [vmem:[#allocation6 + $0x20] sm:$0xff] }
 0x2b2   :  { %v420_v3 = vmul.f32 0.0, %v3340_v62  ;;  %756 = vmatpush.msrb.mxu2 %v3400_v41 }
 0x2b3   :  { %483 = vmatpush.msrb.mxu0 %v3407_v43  ;;  %463 = vmatpush.msra.mxu3 %v3421_v47 }
 0x2b4   :  { %757 = vmatpush.msrb.mxu2 %v3407_v43 }
 0x2b5   :  { %484 = vmatpush.msrb.mxu0 %v3418_v46  ;;  %464 = vmatpush.msra.mxu3 %v3429_v59 }
 0x2b6   :  { %758 = vmatpush.msrb.mxu2 %v3418_v46 }
 0x2b7   :  { %485 = vmatpush.msrb.mxu0 %v3426_v58 }
 0x2b8   :  { %759 = vmatpush.msrb.mxu2 %v3426_v58 }
 0x30f   :  { %v423_v61 = vpop.permute.xlu1 %422 }
 0x310   :  { %v425_v63 = vmul.f32 %v423_v61, %v3340_v62  ;;  %v3433_v61 = vld [vmem:[#allocation6 + $0x8] sm:$0xff] }
 0x311   :  { %486 = vmatpush.msrb.mxu0 %v3433_v61  ;;  %760 = vmatpush.msrb.mxu2 %v3433_v61 }
 0x312   :  { %427 = vrot.lane.b32.xlu2 %v425_v63, %s3085_s21  ;;  %v3435_v63 = vld [vmem:[#allocation6 + $0x10] sm:$0xff] }
 0x313   :  { %465 = vmatpush.msra.mxu3 %v3435_v63  ;;  %582 = vmatpush.msra.mxu0 %v3150_v0 }
 0x314   :  { %1112 = vmatpush.msra.mxu2 %v3170_v4 }
 0x315   :  { %583 = vmatpush.msra.mxu0 %v3155_v1  ;;  %v73_v1 = vld [vmem:[%s4512_s0 + $0x30] sm:$0xff] }
 0x316   :  { %1113 = vmatpush.msra.mxu2 %v3175_v5 }
 0x317   :  { %584 = vmatpush.msra.mxu0 %v3161_v2  ;;  %v74_v2 = vld [vmem:[%s4512_s0 + $0x38] sm:$0xff] }
 0x318   :  { %1114 = vmatpush.msra.mxu2 %v3187_v7 }
 0x319   :  { %585 = vmatpush.msra.mxu0 %v3180_v6 }
 0x31a   :  { %1115 = vmatpush.msra.mxu2 %v3199_v9 }
 0x31b   :  { %586 = vmatpush.msra.mxu0 %v3192_v8 }
 0x31c   :  { %1116 = vmatpush.msra.mxu2 %v3219_v13 }
 0x31d   :  { %587 = vmatpush.msra.mxu0 %v3204_v10 }
 0x31e   :  { %1117 = vmatpush.msra.mxu2 %v3227_v16 }
 0x31f   :  { %588 = vmatpush.msra.mxu0 %v3211_v11 }
 0x320   :  { %1118 = vmatpush.msra.mxu2 %v3240_v18 }
 0x321   :  { %589 = vmatpush.msra.mxu0 %v3232_v17  ;;  %v177_v17 = vpop.f32.mrf.mxu1 }
 0x322   :  { %1119 = vmatpush.msra.mxu2 %v3249_v19 }
 0x36c   :  { %v428_v15 = vpop.permute.xlu2 %427 }
 0x36d   :  { %v3345_v20 = vadd.f32 %v428_v15, %v420_v3  ;;  %v71_v3 = vld [vmem:[%s4512_s0 + $0x20] sm:$0xff]  ;;  %v3443_v15 = vld [vmem:[#allocation6] sm:$0xff] }
 0x36e   :  { %2586 = vmatmul.msk.f32.gmra.mxu1 %vm86_vm1, %v71_v3  ;;  %2577 = vmatmul.msk.f32.gmra.mxu0 %vm86_vm1, %v71_v3 }
 0x36f   :  { %2705 = vtanh.f32 %v3345_v20  ;;  %466 = vmatpush.msra.mxu3 %v3443_v15 }
 0x371   :  { %562 = vmatpush.msrb.mxu3 %v3170_v4 }
 0x373   :  { %563 = vmatpush.msrb.mxu3 %v3175_v5 }
 0x375   :  { %v2706_v21 = vpop.eup %2705  ;;  %564 = vmatpush.msrb.mxu3 %v3187_v7 }
 0x376   :  { %433 = vrot.lane.b32.xlu2 %v2706_v21, %s3085_s21  ;;  %2578 = vmatmul.msk.f32.gmra.mxu0 %vm86_vm1, %v72_v25 }
 0x377   :  { %565 = vmatpush.msrb.mxu3 %v3199_v9  ;;  %2587 = vmatmul.msk.f32.gmra.mxu1 %vm86_vm1, %v72_v25 }
 0x379   :  { %566 = vmatpush.msrb.mxu3 %v3219_v13 }
 0x37b   :  { %567 = vmatpush.msrb.mxu3 %v3227_v16 }
 0x37d   :  { %568 = vmatpush.msrb.mxu3 %v3240_v18 }
 0x37e   :  { %2579 = vmatmul.msk.f32.gmra.mxu0 %vm86_vm1, %v73_v1 }
 0x37f   :  { %569 = vmatpush.msrb.mxu3 %v3249_v19  ;;  %2588 = vmatmul.msk.f32.gmra.mxu1 %vm86_vm1, %v73_v1 }
 0x386   :  { %2580 = vmatmul.msk.f32.gmra.mxu0 %vm86_vm1, %v74_v2 }
 0x387   :  { %2589 = vmatmul.msk.f32.gmra.mxu1 %vm86_vm1, %v74_v2 }
 0x3d0   :  { %v434_v21 = vpop.permute.xlu2 %433 }
 0x3d1   :  { %v3459_v0 = vmul.f32 %v434_v21, %v3340_v62 }
 0x3d3   :  { %438 = vrot.lane.b32.xlu0 %v3459_v0, %s3084_s19 }
 0x445   :  { %v439_v6 = vpop.permute.xlu0 %438 }
 0x446   :  { %v442_v8 = vsel %vm441_vm0, %v439_v6, 0.0 }
 0x447   :  { %2594 = vmatmul.msk.f32.vlgmr.msra.gmra.mxu3 %vm376_vm11, %v442_v8  ;;  %2595 = vmatmul.msk.f32.vlgmr.msrb.gmra.mxu0 %vm376_vm11, %v442_v8 }
 0x448   :  { %837 = vmatpush.msrb.mxu0 %v3170_v4  ;;  %729 = vmatpush.msra.mxu3 %v3363_v27  ;;  %v136_v4 = vpop.f32.mrf.mxu0 }
 0x44a   :  { %838 = vmatpush.msrb.mxu0 %v3175_v5  ;;  %730 = vmatpush.msra.mxu3 %v3368_v30 }
 0x44c   :  { %839 = vmatpush.msrb.mxu0 %v3187_v7  ;;  %731 = vmatpush.msra.mxu3 %v3372_v31 }
 0x44e   :  { %840 = vmatpush.msrb.mxu0 %v3199_v9  ;;  %732 = vmatpush.msra.mxu3 %v3382_v36 }
 0x44f   :  { %2598 = vmatmul.msk.f32.vlgmr.msrb.gmra.mxu3 %vm270_vm10, %v3328_v32  ;;  %2599 = vmatmul.msk.f32.vlgmr.msra.gmra.mxu0 %vm270_vm10, %v3328_v32 }
 0x450   :  { %841 = vmatpush.msrb.mxu0 %v3219_v13  ;;  %733 = vmatpush.msra.mxu3 %v3389_v38  ;;  %v3548_v5 = vpop.f32.mrf.mxu0 }
 0x452   :  { %842 = vmatpush.msrb.mxu0 %v3227_v16  ;;  %734 = vmatpush.msra.mxu3 %v3397_v40 }
 0x454   :  { %843 = vmatpush.msrb.mxu0 %v3240_v18  ;;  %735 = vmatpush.msra.mxu3 %v3404_v42  ;;  %v178_v18 = vadd.f32 %v177_v17, %v3256_v22 }
 0x456   :  { %844 = vmatpush.msrb.mxu0 %v3249_v19  ;;  %736 = vmatpush.msra.mxu3 %v3414_v45 }
 0x458   :  { %1004 = vmatpush.msra.mxu0 %v3363_v27  ;;  %737 = vmatpush.msra.mxu3 %v3421_v47  ;;  %v3550_v7 = vpop.f32.mrf.mxu0 }
 0x45a   :  { %1005 = vmatpush.msra.mxu0 %v3368_v30  ;;  %738 = vmatpush.msra.mxu3 %v3429_v59 }
 0x45c   :  { %1006 = vmatpush.msra.mxu0 %v3372_v31  ;;  %739 = vmatpush.msra.mxu3 %v3435_v63 }
 0x45e   :  { %1007 = vmatpush.msra.mxu0 %v3382_v36  ;;  %740 = vmatpush.msra.mxu3 %v3443_v15 }
 0x460   :  { %935 = vmatpush.msrb.mxu3 %v3267_v48  ;;  %1008 = vmatpush.msra.mxu0 %v3389_v38  ;;  %v3552_v9 = vpop.f32.mrf.mxu0  ;;  %v267_v48 = vld [vmem:[%s4519_s7] sm:$0x3] }
 0x461   :  { %v3577_v17 = vperm.slane %v267_v48, 0 }
 0x462   :  { %936 = vmatpush.msrb.mxu3 %v3269_v49  ;;  %1009 = vmatpush.msra.mxu0 %v3397_v40 }
 0x464   :  { %937 = vmatpush.msrb.mxu3 %v3273_v50  ;;  %1010 = vmatpush.msra.mxu0 %v3404_v42  ;;  %v3566_v50 = vperm.slane %v267_v48, 1 }
 0x466   :  { %938 = vmatpush.msrb.mxu3 %v3277_v51  ;;  %1011 = vmatpush.msra.mxu0 %v3414_v45 }
 0x468   :  { %939 = vmatpush.msrb.mxu3 %v3281_v52  ;;  %1012 = vmatpush.msra.mxu0 %v3421_v47  ;;  %v3554_v10 = vpop.f32.mrf.mxu0 }
 0x469   :  { %4553 = vst [vmem:[#allocation10_spill] sm:$0xff] %v3554_v10 }
 0x46a   :  { %940 = vmatpush.msrb.mxu3 %v3285_v53  ;;  %1013 = vmatpush.msra.mxu0 %v3429_v59 }
 0x46c   :  { %941 = vmatpush.msrb.mxu3 %v3289_v54  ;;  %1014 = vmatpush.msra.mxu0 %v3435_v63 }
 0x46e   :  { %942 = vmatpush.msrb.mxu3 %v3293_v55  ;;  %1015 = vmatpush.msra.mxu0 %v3443_v15 }
 0x470   :  { %943 = vmatpush.msrb.mxu3 %v3297_v56  ;;  %v3556_v11 = vpop.f32.mrf.mxu0  ;;  %v137_v56 = vadd.f32 %v136_v4, %v3263_v28 }
 0x471   :  { %4554 = vst [vmem:[#allocation11_spill] sm:$0xff] %v3556_v11 }
 0x472   :  { %944 = vmatpush.msrb.mxu3 %v3301_v57 }
 0x474   :  { %945 = vmatpush.msrb.mxu3 %v3312_v12 }
 0x476   :  { %946 = vmatpush.msrb.mxu3 %v3315_v14 }
 0x478   :  { %v3558_v13 = vpop.f32.mrf.mxu0 }
 0x479   :  { %4555 = vst [vmem:[#allocation12_spill] sm:$0xff] %v3558_v13 }
 0x4c4   :  { %v488_v16 = vpop.f32.mrf.mxu0 }
 0x4c5   :  { %v3570_v51 = vadd.f32 %v488_v16, %v3566_v50 }
 0x4ca   :  { %v468_v54 = vpop.f32.mrf.mxu3 }
 0x4cc   :  { %v591_v19 = vpop.f32.mrf.mxu0 }
 0x4cd   :  { %v3564_v49 = vadd.f32 %v591_v19, %v178_v18  ;;  %v469_v18 = vadd.f32 %v468_v54, %v3577_v17 }
 0x4cf   :  { %2707 = vtanh.f32 %v3564_v49  ;;  %v2596_v19 = vmul.f32 -1.442695, %v469_v18 }
 0x4d0   :  { %2709 = vtanh.f32 %v3570_v51 }
 0x4d2   :  { %v571_v55 = vpop.f32.mrf.mxu3 }
 0x4d3   :  { %v594_v57 = vadd.f32 %v571_v55, %v137_v56 }
 0x4d5   :  { %v2708_v52 = vpop.eup %2707  ;;  %v2600_v12 = vmul.f32 -1.442695, %v594_v57 }
 0x4d6   :  { %637 = vrot.lane.b32.xlu1 %v2708_v52, %s3084_s19  ;;  %v2710_v53 = vpop.eup %2709 }
 0x4d7   :  { %2711 = vpow2.f32 %v2600_v12 }
 0x4dd   :  { %v2712_v14 = vpop.eup %2711 }
 0x4de   :  { %532 = vrot.lane.b32.xlu1 %v2710_v53, %s3084_s19  ;;  %v602_v32 = vadd.f32 1.0, %v2712_v14 }
 0x4e0   :  { %2713 = vrcp.f32 %v602_v32  ;;  %v615_v25 = vand.u32 2147483648, %v602_v32  ;;  %vm609_vm3 = vweird.f32 %v602_v32  ;;  %v613_v1 = vand.u32 2147483647, %v602_v32 }
 0x4e1   :  { %2715 = vpow2.f32 %v2596_v19 }
 0x4e2   :  { %v616_v6 = vor.u32 1.1754944e-38, %v615_v25  ;;  %vm614_vm5 = vcmp.eq.f32.partialorder %v613_v1, 8.507059e+37 }
 0x4e6   :  { %v2714_v62 = vpop.eup %2713 }
 0x4e7   :  { %v605_v35 = vmul.f32 %v2714_v62, %v602_v32  ;;  %vm610_vm2 = vweird.f32 %v2714_v62  ;;  %v2716_v52 = vpop.eup %2715 }
 0x4e8   :  { %vm611_vm4 = vmor %vm609_vm3, %vm610_vm2  ;;  %v497_v53 = vadd.f32 1.0, %v2716_v52 }
 0x4e9   :  { %v606_v44 = vsub.f32 1.0, %v605_v35 }
 0x4ea   :  { %2717 = vrcp.f32 %v497_v53  ;;  %v510_v54 = vand.u32 2147483648, %v497_v53  ;;  %vm504_vm7 = vweird.f32 %v497_v53 }
 0x4eb   :  { %v607_v3 = vmul.f32 %v2714_v62, %v606_v44  ;;  %v508_v44 = vand.u32 2147483647, %v497_v53 }
 0x4ec   :  { %v511_v25 = vor.u32 1.1754944e-38, %v510_v54  ;;  %v140_v54 = vadd.f32 %v3548_v5, %v3263_v28 }
 0x4ed   :  { %v608_v21 = vadd.f32 %v2714_v62, %v607_v3  ;;  %vm509_vm9 = vcmp.eq.f32.partialorder %v508_v44, 8.507059e+37 }
 0x4ef   :  { %v612_v2 = vsel %vm611_vm4, %v2714_v62, %v608_v21 }
 0x4f0   :  { %v617_v4 = vsel %vm614_vm5, %v616_v6, %v612_v2  ;;  %v2718_v55 = vpop.eup %2717  ;;  %v2601_v2 = vmul.f32 -1.442695, %v3564_v49 }
 0x4f1   :  { %v500_v56 = vmul.f32 %v2718_v55, %v497_v53  ;;  %v635_v57 = vmul.f32 %v617_v4, %v3307_v60  ;;  %vm505_vm6 = vweird.f32 %v2718_v55 }
 0x4f2   :  { %vm506_vm8 = vmor %vm504_vm7, %vm505_vm6 }
 0x4f3   :  { %v501_v12 = vsub.f32 1.0, %v500_v56 }
 0x4f5   :  { %v502_v62 = vmul.f32 %v2718_v55, %v501_v12 }
 0x4f7   :  { %v503_v48 = vadd.f32 %v2718_v55, %v502_v62 }
 0x4f9   :  { %v507_v3 = vsel %vm506_vm8, %v2718_v55, %v503_v48 }
 0x4fa   :  { %v3585_v60 = vsel %vm509_vm9, %v511_v25, %v507_v3 }
 0x548   :  { %v638_v8 = vpop.permute.xlu1 %637 }
 0x549   :  { %v640_v16 = vmul.f32 %v638_v8, %v617_v4 }
 0x54b   :  { %642 = vrot.lane.b32.xlu2 %v640_v16, %s3084_s19 }
 0x550   :  { %v533_v21 = vpop.permute.xlu1 %532 }
 0x551   :  { %v535_v1 = vmul.f32 %v533_v21, %v3585_v60 }
 0x5a5   :  { %v643_v14 = vpop.permute.xlu2 %642 }
 0x5a6   :  { %v3581_v32 = vadd.f32 %v643_v14, %v635_v57 }
 0x5a8   :  { %2719 = vtanh.f32 %v3581_v32 }
 0x5a9   :  { %2721 = vpow2.f32 %v2601_v2 }
 0x5ae   :  { %v2720_v35 = vpop.eup %2719 }
 0x5af   :  { %648 = vrot.lane.b32.xlu0 %v2720_v35, %s3084_s19  ;;  %v2722_v6 = vpop.eup %2721 }
 0x5b0   :  { %v603_v8 = vadd.f32 1.0, %v2722_v6 }
 0x5b2   :  { %2723 = vrcp.f32 %v603_v8  ;;  %v630_v53 = vand.u32 2147483648, %v603_v8  ;;  %vm624_vm13 = vweird.f32 %v603_v8  ;;  %v628_v55 = vand.u32 2147483647, %v603_v8 }
 0x5b4   :  { %v631_v57 = vor.u32 1.1754944e-38, %v630_v53  ;;  %vm629_vm15 = vcmp.eq.f32.partialorder %v628_v55, 8.507059e+37 }
 0x5b7   :  { %537 = vrot.lane.b32.xlu0 %v535_v1, %s3084_s19 }
 0x5b8   :  { %v2724_v4 = vpop.eup %2723 }
 0x5b9   :  { %v620_v16 = vmul.f32 %v2724_v4, %v603_v8  ;;  %vm625_vm12 = vweird.f32 %v2724_v4 }
 0x5ba   :  { %vm626_vm14 = vmor %vm624_vm13, %vm625_vm12 }
 0x5bb   :  { %v621_v18 = vsub.f32 1.0, %v620_v16 }
 0x5bd   :  { %v622_v19 = vmul.f32 %v2724_v4, %v621_v18 }
 0x5bf   :  { %v623_v52 = vadd.f32 %v2724_v4, %v622_v19 }
 0x5c1   :  { %v627_v56 = vsel %vm626_vm14, %v2724_v4, %v623_v52 }
 0x5c2   :  { %v632_v12 = vsel %vm629_vm15, %v631_v57, %v627_v56 }
 0x621   :  { %v649_v14 = vpop.permute.xlu0 %648 }
 0x622   :  { %v651_v49 = vmul.f32 %v649_v14, %v632_v12  ;;  %v530_v12 = vmul.f32 0.0, %v3585_v60 }
 0x624   :  { %2608 = vmatmul.msk.f32.vlgmr.msrb.gmra.mxu0 %vm270_vm10, %v651_v49  ;;  %v652_v62 = vsel %vm270_vm10, %v651_v49, %v3459_v0 }
 0x625   :  { %2602 = vmatmul.msk.f32.vlgmr.msrb.gmra.mxu1 %vm376_vm11, %v652_v62  ;;  %1279 = vmatpush.msrb.mxu0 %v3363_v27  ;;  %v180_v27 = vpop.f32.mrf.mxu1 }
 0x626   :  { %1024 = vmatpush.msrb.mxu1 %v3349_v23 }
 0x627   :  { %1280 = vmatpush.msrb.mxu0 %v3368_v30 }
 0x628   :  { %1025 = vmatpush.msrb.mxu1 %v3351_v24 }
 0x629   :  { %1281 = vmatpush.msrb.mxu0 %v3372_v31  ;;  %v538_v55 = vpop.permute.xlu0 %537 }
 0x62a   :  { %1026 = vmatpush.msrb.mxu1 %v3359_v26 }
 0x62b   :  { %1282 = vmatpush.msrb.mxu0 %v3382_v36 }
 0x62c   :  { %1027 = vmatpush.msrb.mxu1 %v3365_v29 }
 0x62d   :  { %2609 = vmatmul.msk.f32.vlgmr.msra.gmra.mxu1 %vm270_vm10, %v651_v49  ;;  %1283 = vmatpush.msrb.mxu0 %v3389_v38  ;;  %v3631_v30 = vpop.f32.mrf.mxu1  ;;  %v3651_v49 = vadd.f32 %v538_v55, %v530_v12 }
 0x62e   :  { %1028 = vmatpush.msrb.mxu1 %v3374_v33 }
 0x62f   :  { %1284 = vmatpush.msrb.mxu0 %v3397_v40 }
 0x630   :  { %1029 = vmatpush.msrb.mxu1 %v3384_v37 }
 0x631   :  { %1285 = vmatpush.msrb.mxu0 %v3404_v42 }
 0x632   :  { %1030 = vmatpush.msrb.mxu1 %v3393_v39 }
 0x633   :  { %1286 = vmatpush.msrb.mxu0 %v3414_v45 }
 0x634   :  { %1031 = vmatpush.msrb.mxu1 %v3400_v41 }
 0x635   :  { %1287 = vmatpush.msrb.mxu0 %v3421_v47  ;;  %v3633_v31 = vpop.f32.mrf.mxu1  ;;  %v181_v47 = vadd.f32 %v180_v27, %v3256_v22 }
 0x636   :  { %1032 = vmatpush.msrb.mxu1 %v3407_v43 }
 0x637   :  { %1288 = vmatpush.msrb.mxu0 %v3429_v59 }
 0x638   :  { %1033 = vmatpush.msrb.mxu1 %v3418_v46 }
 0x639   :  { %1289 = vmatpush.msrb.mxu0 %v3435_v63 }
 0x63a   :  { %1034 = vmatpush.msrb.mxu1 %v3426_v58 }
 0x63b   :  { %1290 = vmatpush.msrb.mxu0 %v3443_v15 }
 0x63c   :  { %1035 = vmatpush.msrb.mxu1 %v3433_v61 }
 0x63d   :  { %v3635_v36 = vpop.f32.mrf.mxu1 }
 0x63e   :  { %1299 = vmatpush.msra.mxu1 %v3349_v23  ;;  %4556 = vst [vmem:[#allocation13_spill] sm:$0xff] %v3635_v36 }
 0x640   :  { %1300 = vmatpush.msra.mxu1 %v3351_v24 }
 0x642   :  { %1301 = vmatpush.msra.mxu1 %v3359_v26 }
 0x644   :  { %1302 = vmatpush.msra.mxu1 %v3365_v29 }
 0x645   :  { %v3637_v38 = vpop.f32.mrf.mxu1 }
 0x646   :  { %1303 = vmatpush.msra.mxu1 %v3374_v33  ;;  %4557 = vst [vmem:[#allocation14_spill] sm:$0xff] %v3637_v38 }
 0x648   :  { %1304 = vmatpush.msra.mxu1 %v3384_v37 }
 0x64a   :  { %1305 = vmatpush.msra.mxu1 %v3393_v39 }
 0x64c   :  { %1306 = vmatpush.msra.mxu1 %v3400_v41 }
 0x64d   :  { %v3639_v40 = vpop.f32.mrf.mxu1 }
 0x64e   :  { %1307 = vmatpush.msra.mxu1 %v3407_v43  ;;  %4558 = vst [vmem:[#allocation15_spill] sm:$0xff] %v3639_v40 }
 0x650   :  { %1308 = vmatpush.msra.mxu1 %v3418_v46 }
 0x652   :  { %1309 = vmatpush.msra.mxu1 %v3426_v58 }
 0x654   :  { %1310 = vmatpush.msra.mxu1 %v3433_v61 }
 0x6a1   :  { %v846_v35 = vpop.f32.mrf.mxu0 }
 0x6a2   :  { %v673_v42 = vpop.f32.mrf.mxu1 }
 0x6a3   :  { %v674_v45 = vadd.f32 %v3336_v34, %v673_v42  ;;  %v869_v34 = vadd.f32 %v846_v35, %v140_v54 }
 0x6a5   :  { %2725 = vtanh.f32 %v674_v45  ;;  %v2603_v48 = vmul.f32 -1.442695, %v674_v45  ;;  %v2610_v44 = vmul.f32 -1.442695, %v869_v34  ;;  %v2597_v34 = vmul.f32 -1.442695, %v3570_v51 }
 0x6aa   :  { %v866_v59 = vpop.f32.mrf.mxu1 }
 0x6ab   :  { %v2726_v63 = vpop.eup %2725  ;;  %v3643_v15 = vadd.f32 %v866_v59, %v181_v47 }
 0x6ac   :  { %698 = vrot.lane.b32.xlu2 %v2726_v63, %s3085_s21 }
 0x6ad   :  { %2727 = vtanh.f32 %v3643_v15 }
 0x6ae   :  { %2729 = vpow2.f32 %v2603_v48 }
 0x6af   :  { %2731 = vpow2.f32 %v2610_v44 }
 0x6b3   :  { %v2728_v0 = vpop.eup %2727 }
 0x6b4   :  { %912 = vrot.lane.b32.xlu2 %v2728_v0, %s3084_s19  ;;  %v2730_v3 = vpop.eup %2729 }
 0x6b5   :  { %v679_v21 = vadd.f32 1.0, %v2730_v3  ;;  %v2732_v25 = vpop.eup %2731 }
 0x6b6   :  { %v877_v1 = vadd.f32 1.0, %v2732_v25 }
 0x6b7   :  { %2733 = vrcp.f32 %v679_v21  ;;  %v691_v5 = vand.u32 2147483648, %v679_v21  ;;  %vm685_vm3 = vweird.f32 %v679_v21  ;;  %v689_v53 = vand.u32 2147483647, %v679_v21 }
 0x6b8   :  { %2735 = vrcp.f32 %v877_v1  ;;  %v890_v47 = vand.u32 2147483648, %v877_v1  ;;  %vm884_vm7 = vweird.f32 %v877_v1  ;;  %v888_v59 = vand.u32 2147483647, %v877_v1 }
 0x6b9   :  { %v692_v14 = vor.u32 1.1754944e-38, %v691_v5  ;;  %vm690_vm5 = vcmp.eq.f32.partialorder %v689_v53, 8.507059e+37  ;;  %2737 = vtanh.f32 %v3651_v49 }
 0x6ba   :  { %v891_v63 = vor.u32 1.1754944e-38, %v890_v47  ;;  %vm889_vm9 = vcmp.eq.f32.partialorder %v888_v59, 8.507059e+37  ;;  %2739 = vpow2.f32 %v2597_v34 }
 0x6bd   :  { %v2734_v2 = vpop.eup %2733 }
 0x6be   :  { %v681_v6 = vmul.f32 %v2734_v2, %v679_v21  ;;  %v2736_v4 = vpop.eup %2735  ;;  %vm686_vm2 = vweird.f32 %v2734_v2 }
 0x6bf   :  { %v880_v18 = vmul.f32 %v2736_v4, %v877_v1  ;;  %vm687_vm4 = vmor %vm685_vm3, %vm686_vm2  ;;  %vm885_vm6 = vweird.f32 %v2736_v4  ;;  %v2738_v54 = vpop.eup %2737 }
 0x6c0   :  { %v682_v8 = vsub.f32 1.0, %v681_v6  ;;  %vm886_vm8 = vmor %vm884_vm7, %vm885_vm6  ;;  %v2740_v44 = vpop.eup %2739 }
 0x6c1   :  { %v881_v52 = vsub.f32 1.0, %v880_v18  ;;  %v498_v3 = vadd.f32 1.0, %v2740_v44 }
 0x6c2   :  { %v683_v16 = vmul.f32 %v2734_v2, %v682_v8 }
 0x6c3   :  { %v882_v57 = vmul.f32 %v2736_v4, %v881_v52  ;;  %2741 = vrcp.f32 %v498_v3  ;;  %v525_v18 = vand.u32 2147483648, %v498_v3  ;;  %vm519_vm13 = vweird.f32 %v498_v3 }
 0x6c4   :  { %v684_v19 = vadd.f32 %v2734_v2, %v683_v16  ;;  %v523_v51 = vand.u32 2147483647, %v498_v3 }
 0x6c5   :  { %v883_v45 = vadd.f32 %v2736_v4, %v882_v57  ;;  %v526_v52 = vor.u32 1.1754944e-38, %v525_v18  ;;  %v3696_v18 = vld [vmem:[#allocation4 + $0x50] sm:$0xff] }
 0x6c6   :  { %v688_v56 = vsel %vm687_vm4, %v2734_v2, %v684_v19  ;;  %vm524_vm15 = vcmp.eq.f32.partialorder %v523_v51, 8.507059e+37  ;;  %v3702_v51 = vld [vmem:[%s4514_s2 + $0x58] sm:$0xff] }
 0x6c7   :  { %v3653_v27 = vsel %vm690_vm5, %v692_v14, %v688_v56  ;;  %v887_v60 = vsel %vm886_vm8, %v2736_v4, %v883_v45 }
 0x6c8   :  { %v892_v0 = vsel %vm889_vm9, %v891_v63, %v887_v60  ;;  %v696_v6 = vmul.f32 %v3653_v27, %v3345_v20 }
 0x6c9   :  { %v2742_v21 = vpop.eup %2741  ;;  %v910_v5 = vmul.f32 %v892_v0, %v3581_v32  ;;  %v2611_v32 = vmul.f32 -1.442695, %v3643_v15 }
 0x6ca   :  { %v515_v25 = vmul.f32 %v2742_v21, %v498_v3  ;;  %vm520_vm12 = vweird.f32 %v2742_v21 }
 0x6cb   :  { %vm521_vm14 = vmor %vm519_vm13, %vm520_vm12 }
 0x6cc   :  { %v516_v1 = vsub.f32 1.0, %v515_v25 }
 0x6ce   :  { %v517_v2 = vmul.f32 %v2742_v21, %v516_v1 }
 0x6d0   :  { %v518_v16 = vadd.f32 %v2742_v21, %v517_v2 }
 0x6d2   :  { %v522_v19 = vsel %vm521_vm14, %v2742_v21, %v518_v16  ;;  %v3693_v16 = vld [vmem:[%s4514_s2 + $0x68] sm:$0xff] }
 0x6d3   :  { %v527_v55 = vsel %vm524_vm15, %v526_v52, %v522_v19  ;;  %v3705_v19 = vld [vmem:[#allocation4 + $0x48] sm:$0xff]  ;;  %v3711_v52 = vld [vmem:[%s4514_s2 + $0x48] sm:$0xff] }
 0x706   :  { %v699_v62 = vpop.permute.xlu2 %698 }
 0x707   :  { %v701_v42 = vmul.f32 %v699_v62, %v3653_v27 }
 0x709   :  { %703 = vrot.lane.b32.xlu1 %v701_v42, %s3085_s21 }
 0x70e   :  { %v913_v48 = vpop.permute.xlu2 %912 }
 0x70f   :  { %v915_v35 = vmul.f32 %v913_v48, %v892_v0 }
 0x711   :  { %917 = vrot.lane.b32.xlu0 %v915_v35, %s3084_s19  ;;  %543 = vrot.lane.b32.xlu1 %v2738_v54, %s3084_s19 }
 0x77b   :  { %v704_v8 = vpop.permute.xlu1 %703 }
 0x77c   :  { %v3663_v4 = vadd.f32 %v704_v8, %v696_v6  ;;  %v3684_v6 = vld [vmem:[%s4514_s2 + $0x78] sm:$0xff]  ;;  %v3687_v8 = vld [vmem:[#allocation4 + $0x58] sm:$0xff] }
 0x77e   :  { %2743 = vtanh.f32 %v3663_v4 }
 0x783   :  { %v918_v53 = vpop.permute.xlu0 %917  ;;  %v544_v56 = vpop.permute.xlu1 %543 }
 0x784   :  { %v2744_v20 = vpop.eup %2743  ;;  %v3667_v57 = vadd.f32 %v918_v53, %v910_v5  ;;  %v546_v12 = vmul.f32 %v544_v56, %v527_v55  ;;  %v3714_v5 = vld [vmem:[#allocation4 + $0x40] sm:$0xff]  ;;  %v3722_v53 = vld [vmem:[%s4514_s2 + $0x38] sm:$0xff]  ;;  %v3725_v55 = vld [vmem:[#allocation4 + $0x38] sm:$0xff] }
 0x785   :  { %709 = vrot.lane.b32.xlu2 %v2744_v20, %s3085_s21  ;;  %v3731_v56 = vld [vmem:[%s4514_s2 + $0x28] sm:$0xff]  ;;  %v3734_v20 = vld [vmem:[#allocation4 + $0x30] sm:$0xff] }
 0x786   :  { %2745 = vtanh.f32 %v3667_v57  ;;  %547 = vst.msk [vmem:[#allocation3] sm:$0xff] %vm270_vm10, %v546_v12  ;;  %718 = vrot.lane.b32.xlu1 %v546_v12, %s3085_s21  ;;  %v3740_v12 = vld [vmem:[%s4514_s2 + $0x18] sm:$0xff] }
 0x787   :  { %2747 = vpow2.f32 %v2611_v32  ;;  %v3749_v32 = vld [vmem:[%s4514_s2 + $0x8] sm:$0xff] }
 0x78c   :  { %v2746_v14 = vpop.eup %2745 }
 0x78d   :  { %923 = vrot.lane.b32.xlu2 %v2746_v14, %s3084_s19  ;;  %v2748_v62 = vpop.eup %2747  ;;  %v3743_v14 = vld [vmem:[#allocation4 + $0x28] sm:$0xff] }
 0x78e   :  { %v878_v42 = vadd.f32 1.0, %v2748_v62  ;;  %v3752_v62 = vld [vmem:[#allocation4 + $0x20] sm:$0xff] }
 0x790   :  { %2749 = vrcp.f32 %v878_v42  ;;  %v905_v35 = vand.u32 2147483648, %v878_v42  ;;  %vm899_vm3 = vweird.f32 %v878_v42  ;;  %v903_v54 = vand.u32 2147483647, %v878_v42 }
 0x792   :  { %v906_v34 = vor.u32 1.1754944e-38, %v905_v35  ;;  %vm904_vm5 = vcmp.eq.f32.partialorder %v903_v54, 8.507059e+37  ;;  %v3796_v35 = vld [vmem:[%s4514_s2 + $0x30] sm:$0xff]  ;;  %v3803_v54 = vld [vmem:[%s4514_s2 + $0x20] sm:$0xff] }
 0x793   :  { %4560 = vst [vmem:[#allocation17_spill] sm:$0xff] %v3796_v35 }
 0x794   :  { %4561 = vst [vmem:[#allocation18_spill] sm:$0xff] %v3803_v54 }
 0x796   :  { %v2750_v45 = vpop.eup %2749 }
 0x797   :  { %v895_v47 = vmul.f32 %v2750_v45, %v878_v42  ;;  %vm900_vm2 = vweird.f32 %v2750_v45  ;;  %v3759_v42 = vld [vmem:[%s4514_s2 + $0x70] sm:$0xff] }
 0x798   :  { %vm901_vm4 = vmor %vm899_vm3, %vm900_vm2 }
 0x799   :  { %v896_v59 = vsub.f32 1.0, %v895_v47  ;;  %v3768_v47 = vld [vmem:[%s4514_s2 + $0x60] sm:$0xff] }
 0x79b   :  { %v897_v60 = vmul.f32 %v2750_v45, %v896_v59  ;;  %v3771_v59 = vld [vmem:[#allocation4 + $0x10] sm:$0xff] }
 0x79d   :  { %v898_v48 = vadd.f32 %v2750_v45, %v897_v60  ;;  %v3777_v60 = vld [vmem:[%s4514_s2 + $0x50] sm:$0xff] }
 0x79f   :  { %v902_v15 = vsel %vm901_vm4, %v2750_v45, %v898_v48  ;;  %v3762_v45 = vld [vmem:[#allocation4 + $0x18] sm:$0xff]  ;;  %v3789_v48 = vld [vmem:[#allocation4] sm:$0xff] }
 0x7a0   :  { %v907_v44 = vsel %vm904_vm5, %v906_v34, %v902_v15  ;;  %v3810_v15 = vld [vmem:[%s4514_s2 + $0x10] sm:$0xff]  ;;  %v3817_v34 = vld [vmem:[%s4514_s2] sm:$0xff] }
 0x7a1   :  { %4562 = vst [vmem:[#allocation19_spill] sm:$0xff] %v3810_v15 }
 0x7a2   :  { %4563 = vst [vmem:[#allocation20_spill] sm:$0xff] %v3817_v34 }
 0x7df   :  { %v710_v63 = vpop.permute.xlu2 %709 }
 0x7e0   :  { %v712_v0 = vmul.f32 %v710_v63, %v3653_v27  ;;  %v3780_v63 = vld [vmem:[#allocation4 + $0x8] sm:$0xff] }
 0x7e2   :  { %714 = vrot.lane.b32.xlu0 %v712_v0, %s3084_s19 }
 0x7e7   :  { %v924_v3 = vpop.permute.xlu2 %923 }
 0x7e8   :  { %v926_v21 = vmul.f32 %v924_v3, %v907_v44 }
 0x7ea   :  { %v927_v25 = vsel %vm270_vm10, %v926_v21, %v712_v0  ;;  %v3786_v0 = vld [vmem:[%s4514_s2 + $0x40] sm:$0xff] }
 0x7eb   :  { %4559 = vst [vmem:[#allocation16_spill] sm:$0xff] %v3786_v0 }
 0x7f8   :  { %v719_v1 = vpop.permute.xlu1 %718 }
 0x854   :  { %v715_v2 = vpop.permute.xlu0 %714 }
 0x855   :  { %v721_v27 = vsel %vm441_vm0, %v715_v2, %v719_v1 }
 0x856   :  { %2604 = vmatmul.msk.f32.vlgmr.msra.gmra.mxu3 %vm376_vm11, %v721_v27  ;;  %2605 = vmatmul.msk.f32.vlgmr.msrb.gmra.mxu2 %vm376_vm11, %v721_v27 }
 0x857   :  { %1132 = vmatpush.msrb.mxu2 %v3684_v6  ;;  %1210 = vmatpush.msra.mxu3 %v3687_v8 }
 0x859   :  { %1133 = vmatpush.msrb.mxu2 %v3693_v16  ;;  %1211 = vmatpush.msra.mxu3 %v3696_v18 }
 0x85b   :  { %1134 = vmatpush.msrb.mxu2 %v3702_v51  ;;  %1212 = vmatpush.msra.mxu3 %v3705_v19 }
 0x85d   :  { %1135 = vmatpush.msrb.mxu2 %v3711_v52  ;;  %1213 = vmatpush.msra.mxu3 %v3714_v5 }
 0x85e   :  { %2612 = vmatmul.msk.f32.vlgmr.msrb.gmra.mxu3 %vm376_vm11, %v927_v25  ;;  %2618 = vmatmul.msk.f32.vlgmr.msra.gmra.mxu2 %vm270_vm10, %v926_v21 }
 0x85f   :  { %1136 = vmatpush.msrb.mxu2 %v3722_v53  ;;  %1214 = vmatpush.msra.mxu3 %v3725_v55 }
 0x861   :  { %1137 = vmatpush.msrb.mxu2 %v3731_v56  ;;  %1215 = vmatpush.msra.mxu3 %v3734_v20 }
 0x863   :  { %1138 = vmatpush.msrb.mxu2 %v3740_v12  ;;  %1216 = vmatpush.msra.mxu3 %v3743_v14 }
 0x865   :  { %1139 = vmatpush.msrb.mxu2 %v3749_v32  ;;  %1217 = vmatpush.msra.mxu3 %v3752_v62 }
 0x866   :  { %2619 = vmatmul.msk.f32.vlgmr.msrb.gmra.mxu2 %vm270_vm10, %v926_v21 }
 0x867   :  { %1387 = vmatpush.msra.mxu2 %v3759_v42  ;;  %1218 = vmatpush.msra.mxu3 %v3762_v45 }
 0x869   :  { %1388 = vmatpush.msra.mxu2 %v3768_v47  ;;  %1219 = vmatpush.msra.mxu3 %v3771_v59 }
 0x86b   :  { %1389 = vmatpush.msra.mxu2 %v3777_v60  ;;  %1220 = vmatpush.msra.mxu3 %v3780_v63 }
 0x86d   :  { %1390 = vmatpush.msra.mxu2 %v3786_v0  ;;  %1221 = vmatpush.msra.mxu3 %v3789_v48 }
 0x86f   :  { %1662 = vmatpush.msrb.mxu3 %v3759_v42  ;;  %1391 = vmatpush.msra.mxu2 %v3796_v35 }
 0x871   :  { %1663 = vmatpush.msrb.mxu3 %v3768_v47  ;;  %1392 = vmatpush.msra.mxu2 %v3803_v54 }
 0x873   :  { %1664 = vmatpush.msrb.mxu3 %v3777_v60  ;;  %1393 = vmatpush.msra.mxu2 %v3810_v15 }
 0x875   :  { %1665 = vmatpush.msrb.mxu3 %v3786_v0  ;;  %1394 = vmatpush.msra.mxu2 %v3817_v34 }
 0x877   :  { %1666 = vmatpush.msrb.mxu3 %v3796_v35  ;;  %1574 = vmatpush.msrb.mxu2 %v3349_v23 }
 0x879   :  { %1667 = vmatpush.msrb.mxu3 %v3803_v54  ;;  %1575 = vmatpush.msrb.mxu2 %v3351_v24 }
 0x87b   :  { %1668 = vmatpush.msrb.mxu3 %v3810_v15  ;;  %1576 = vmatpush.msrb.mxu2 %v3359_v26 }
 0x87d   :  { %1669 = vmatpush.msrb.mxu3 %v3817_v34  ;;  %1577 = vmatpush.msrb.mxu2 %v3365_v29  ;;  %v143_v29 = vadd.f32 %v3550_v7, %v3263_v28 }
 0x87f   :  { %1578 = vmatpush.msrb.mxu2 %v3374_v33 }
 0x881   :  { %1579 = vmatpush.msrb.mxu2 %v3384_v37 }
 0x883   :  { %1580 = vmatpush.msrb.mxu2 %v3393_v39 }
 0x885   :  { %1581 = vmatpush.msrb.mxu2 %v3400_v41  ;;  %v3845_v41 = vld [vmem:[%s4517_s5] ss:$0 sm:$0xff] }
 0x886   :  { %4564 = vst [vmem:[#allocation21_spill] sm:$0xff] %v3845_v41 }
 0x887   :  { %1582 = vmatpush.msrb.mxu2 %v3407_v43 }
 0x889   :  { %1583 = vmatpush.msrb.mxu2 %v3418_v46 }
 0x88b   :  { %1584 = vmatpush.msrb.mxu2 %v3426_v58  ;;  %v184_v58 = vadd.f32 %v3631_v30, %v3256_v22 }
 0x88d   :  { %1585 = vmatpush.msrb.mxu2 %v3433_v61 }
 0x8d9   :  { %v742_v23 = vpop.f32.mrf.mxu3  ;;  %v762_v24 = vpop.f32.mrf.mxu2 }
 0x8da   :  { %v3837_v26 = vadd.f32 %v762_v24, %v3566_v50  ;;  %v743_v25 = vadd.f32 %v742_v23, %v3577_v17 }
 0x8dc   :  { %2751 = vtanh.f32 %v3837_v26  ;;  %v2606_v1 = vmul.f32 -1.442695, %v743_v25 }
 0x8e1   :  { %v948_v33 = vpop.f32.mrf.mxu3  ;;  %v1121_v37 = vpop.f32.mrf.mxu2 }
 0x8e2   :  { %v2752_v39 = vpop.eup %2751  ;;  %v949_v43 = vadd.f32 %v3845_v41, %v948_v33  ;;  %v1144_v46 = vadd.f32 %v1121_v37, %v143_v29 }
 0x8e3   :  { %806 = vrot.lane.b32.xlu0 %v2752_v39, %s3084_s19 }
 0x8e4   :  { %2753 = vtanh.f32 %v949_v43  ;;  %v2620_v21 = vmul.f32 -1.442695, %v1144_v46  ;;  %v2613_v30 = vmul.f32 -1.442695, %v949_v43 }
 0x8e9   :  { %v1141_v61 = vpop.f32.mrf.mxu2 }
 0x8ea   :  { %v2754_v44 = vpop.eup %2753  ;;  %v3851_v7 = vadd.f32 %v1141_v61, %v184_v58 }
 0x8eb   :  { %973 = vrot.lane.b32.xlu1 %v2754_v44, %s3085_s21 }
 0x8ec   :  { %2755 = vtanh.f32 %v3851_v7 }
 0x8ed   :  { %2757 = vpow2.f32 %v2620_v21 }
 0x8ee   :  { %2759 = vpow2.f32 %v2606_v1 }
 0x8f2   :  { %v2756_v3 = vpop.eup %2755 }
 0x8f3   :  { %1187 = vrot.lane.b32.xlu2 %v2756_v3, %s3084_s19  ;;  %v2758_v2 = vpop.eup %2757 }
 0x8f4   :  { %v1152_v27 = vadd.f32 1.0, %v2758_v2  ;;  %v2760_v24 = vpop.eup %2759 }
 0x8f5   :  { %v771_v29 = vadd.f32 1.0, %v2760_v24 }
 0x8f6   :  { %2761 = vrcp.f32 %v1152_v27  ;;  %v1165_v1 = vand.u32 2147483648, %v1152_v27  ;;  %vm1159_vm7 = vweird.f32 %v1152_v27  ;;  %v1163_v43 = vand.u32 2147483647, %v1152_v27 }
 0x8f7   :  { %2763 = vpow2.f32 %v2613_v30  ;;  %v784_v38 = vand.u32 2147483648, %v771_v29  ;;  %vm778_vm13 = vweird.f32 %v771_v29 }
 0x8f8   :  { %2765 = vrcp.f32 %v771_v29  ;;  %v1166_v13 = vor.u32 1.1754944e-38, %v1165_v1  ;;  %vm1164_vm9 = vcmp.eq.f32.partialorder %v1163_v43, 8.507059e+37 }
 0x8f9   :  { %v785_v10 = vor.u32 1.1754944e-38, %v784_v38 }
 0x8fc   :  { %v2762_v33 = vpop.eup %2761 }
 0x8fd   :  { %v2764_v37 = vpop.eup %2763  ;;  %v1155_v39 = vmul.f32 %v2762_v33, %v1152_v27  ;;  %vm1160_vm6 = vweird.f32 %v2762_v33 }
 0x8fe   :  { %v954_v58 = vadd.f32 1.0, %v2764_v37  ;;  %v2766_v44 = vpop.eup %2765  ;;  %vm1161_vm8 = vmor %vm1159_vm7, %vm1160_vm6 }
 0x8ff   :  { %v1156_v61 = vsub.f32 1.0, %v1155_v39  ;;  %v774_v23 = vmul.f32 %v2766_v44, %v771_v29  ;;  %vm779_vm12 = vweird.f32 %v2766_v44 }
 0x900   :  { %2767 = vrcp.f32 %v954_v58  ;;  %vm780_vm14 = vmor %vm778_vm13, %vm779_vm12  ;;  %vm960_vm3 = vweird.f32 %v954_v58  ;;  %v964_v43 = vand.u32 2147483647, %v954_v58 }
 0x901   :  { %v1157_v46 = vmul.f32 %v2762_v33, %v1156_v61  ;;  %v775_v21 = vsub.f32 1.0, %v774_v23 }
 0x902   :  { %vm965_vm5 = vcmp.eq.f32.partialorder %v964_v43, 8.507059e+37 }
 0x903   :  { %v1158_v3 = vadd.f32 %v2762_v33, %v1157_v46  ;;  %v776_v30 = vmul.f32 %v2766_v44, %v775_v21  ;;  %v782_v46 = vand.u32 2147483647, %v771_v29 }
 0x905   :  { %v1162_v2 = vsel %vm1161_vm8, %v2762_v33, %v1158_v3  ;;  %v777_v11 = vadd.f32 %v2766_v44, %v776_v30  ;;  %vm783_vm15 = vcmp.eq.f32.partialorder %v782_v46, 8.507059e+37 }
 0x906   :  { %v2768_v25 = vpop.eup %2767  ;;  %v1167_v40 = vsel %vm1164_vm9, %v1166_v13, %v1162_v2  ;;  %v966_v13 = vand.u32 2147483648, %v954_v58 }
 0x907   :  { %v956_v24 = vmul.f32 %v2768_v25, %v954_v58  ;;  %v781_v23 = vsel %vm780_vm14, %v2766_v44, %v777_v11  ;;  %vm961_vm2 = vweird.f32 %v2768_v25 }
 0x908   :  { %v786_v3 = vsel %vm783_vm15, %v785_v10, %v781_v23  ;;  %vm962_vm4 = vmor %vm960_vm3, %vm961_vm2  ;;  %v967_v30 = vor.u32 1.1754944e-38, %v966_v13  ;;  %v1185_v10 = vmul.f32 %v1167_v40, %v3667_v57 }
 0x909   :  { %v957_v61 = vsub.f32 1.0, %v956_v24  ;;  %v804_v58 = vmul.f32 %v786_v3, %v3651_v49  ;;  %v2621_v49 = vmul.f32 -1.442695, %v3851_v7 }
 0x90b   :  { %v958_v27 = vmul.f32 %v2768_v25, %v957_v61 }
 0x90d   :  { %v959_v1 = vadd.f32 %v2768_v25, %v958_v27 }
 0x90f   :  { %v963_v2 = vsel %vm962_vm4, %v2768_v25, %v959_v1 }
 0x910   :  { %v3859_v24 = vsel %vm965_vm5, %v967_v30, %v963_v2 }
 0x911   :  { %v971_v61 = vmul.f32 %v3859_v24, %v3663_v4 }
 0x94d   :  { %v1188_v37 = vpop.permute.xlu2 %1187 }
 0x94e   :  { %v1190_v39 = vmul.f32 %v1188_v37, %v1167_v40 }
 0x950   :  { %1192 = vrot.lane.b32.xlu2 %v1190_v39, %s3084_s19 }
 0x955   :  { %v807_v33 = vpop.permute.xlu0 %806 }
 0x956   :  { %v809_v21 = vmul.f32 %v807_v33, %v786_v3 }
 0x958   :  { %811 = vrot.lane.b32.xlu0 %v809_v21, %s3084_s19 }
 0x95d   :  { %v974_v29 = vpop.permute.xlu1 %973 }
 0x95e   :  { %v976_v11 = vmul.f32 %v974_v29, %v3859_v24 }
 0x960   :  { %978 = vrot.lane.b32.xlu1 %v976_v11, %s3085_s21 }
 0x9aa   :  { %v1193_v38 = vpop.permute.xlu2 %1192 }
 0x9ab   :  { %v3864_v44 = vadd.f32 %v1193_v38, %v1185_v10  ;;  %v3884_v38 = vld [vmem:[#allocation6 + $0xb0] sm:$0xff] }
 0x9ad   :  { %2769 = vtanh.f32 %v3864_v44 }
 0x9b3   :  { %v2770_v37 = vpop.eup %2769 }
 0x9b4   :  { %1198 = vrot.lane.b32.xlu2 %v2770_v37, %s3084_s19  ;;  %v3887_v37 = vld [vmem:[#allocation6 + $0xa0] sm:$0xff] }
 0x9ca   :  { %v812_v25 = vpop.permute.xlu0 %811 }
 0x9cb   :  { %v3869_v39 = vadd.f32 %v812_v25, %v804_v58  ;;  %v3890_v58 = vld [vmem:[#allocation6 + $0x90] sm:$0xff]  ;;  %v3893_v25 = vld [vmem:[#allocation6 + $0x80] sm:$0xff] }
 0x9cd   :  { %2771 = vtanh.f32 %v3869_v39 }
 0x9d2   :  { %v979_v46 = vpop.permute.xlu1 %978 }
 0x9d3   :  { %v2772_v40 = vpop.eup %2771  ;;  %v3874_v57 = vadd.f32 %v979_v46, %v971_v61  ;;  %v2607_v61 = vmul.f32 -1.442695, %v3837_v26  ;;  %v3897_v46 = vld [vmem:[#allocation6 + $0x70] sm:$0xff] }
 0x9d4   :  { %817 = vrot.lane.b32.xlu0 %v2772_v40, %s3084_s19  ;;  %v3900_v40 = vld [vmem:[#allocation6 + $0x60] sm:$0xff] }
 0x9d5   :  { %2773 = vtanh.f32 %v3874_v57 }
 0x9d6   :  { %2775 = vpow2.f32 %v2621_v49  ;;  %v3906_v49 = vld [vmem:[#allocation6 + $0x40] sm:$0xff] }
 0x9db   :  { %v2774_v23 = vpop.eup %2773 }
 0x9dc   :  { %984 = vrot.lane.b32.xlu1 %v2774_v23, %s3085_s21  ;;  %v2776_v27 = vpop.eup %2775  ;;  %v3903_v23 = vld [vmem:[#allocation6 + $0x50] sm:$0xff] }
 0x9dd   :  { %v1153_v33 = vadd.f32 1.0, %v2776_v27  ;;  %v3909_v27 = vld [vmem:[#allocation6 + $0x30] sm:$0xff] }
 0x9df   :  { %2777 = vrcp.f32 %v1153_v33  ;;  %v1180_v43 = vand.u32 2147483648, %v1153_v33  ;;  %vm1174_vm7 = vweird.f32 %v1153_v33  ;;  %v1178_v2 = vand.u32 2147483647, %v1153_v33 }
 0x9e0   :  { %2779 = vpow2.f32 %v2607_v61 }
 0x9e1   :  { %v1181_v29 = vor.u32 1.1754944e-38, %v1180_v43  ;;  %vm1179_vm9 = vcmp.eq.f32.partialorder %v1178_v2, 8.507059e+37 }
 0x9e5   :  { %v2778_v3 = vpop.eup %2777 }
 0x9e6   :  { %v1170_v21 = vmul.f32 %v2778_v3, %v1153_v33  ;;  %vm1175_vm6 = vweird.f32 %v2778_v3  ;;  %v2780_v26 = vpop.eup %2779  ;;  %v3912_v33 = vld [vmem:[#allocation6 + $0x20] sm:$0xff] }
 0x9e7   :  { %vm1176_vm8 = vmor %vm1174_vm7, %vm1175_vm6 }
 0x9e8   :  { %v1171_v4 = vsub.f32 1.0, %v1170_v21  ;;  %v3915_v21 = vld [vmem:[#allocation6 + $0x10] sm:$0xff] }
 0x9ea   :  { %v1172_v1 = vmul.f32 %v2778_v3, %v1171_v4  ;;  %v3918_v4 = vld [vmem:[#allocation6] sm:$0xff] }
 0x9ec   :  { %v1173_v13 = vadd.f32 %v2778_v3, %v1172_v1 }
 0x9ee   :  { %v1177_v30 = vsel %vm1176_vm8, %v2778_v3, %v1173_v13  ;;  %v772_v3 = vadd.f32 1.0, %v2780_v26 }
 0x9ef   :  { %v1182_v10 = vsel %vm1179_vm9, %v1181_v29, %v1177_v30 }
 0x9f0   :  { %2781 = vrcp.f32 %v772_v3  ;;  %v799_v29 = vand.u32 2147483648, %v772_v3  ;;  %vm793_vm13 = vweird.f32 %v772_v3 }
 0x9f2   :  { %v800_v61 = vor.u32 1.1754944e-38, %v799_v29  ;;  %v3952_v29 = vld [vmem:[#allocation6 + $0x38] sm:$0xff] }
 0x9f3   :  { %4573 = vst [vmem:[#allocation30_spill] sm:$0xff] %v3952_v29 }
 0x9f6   :  { %v2782_v1 = vpop.eup %2781 }
 0x9f7   :  { %v789_v13 = vmul.f32 %v2782_v1, %v772_v3  ;;  %vm794_vm12 = vweird.f32 %v2782_v1 }
 0x9f8   :  { %vm795_vm14 = vmor %vm793_vm13, %vm794_vm12 }
 0x9f9   :  { %v790_v43 = vsub.f32 1.0, %v789_v13 }
 0x9fb   :  { %v791_v2 = vmul.f32 %v2782_v1, %v790_v43 }
 0x9fd   :  { %v792_v30 = vadd.f32 %v2782_v1, %v791_v2  ;;  %v3946_v2 = vld [vmem:[#allocation6 + $0x58] sm:$0xff] }
 0x9fe   :  { %4571 = vst [vmem:[#allocation28_spill] sm:$0xff] %v3946_v2 }
 0xa0e   :  { %v1199_v11 = vpop.permute.xlu2 %1198 }
 0xa0f   :  { %v3880_v7 = vmul.f32 %v1199_v11, %v1182_v10  ;;  %v797_v11 = vand.u32 2147483647, %v772_v3  ;;  %v796_v10 = vsel %vm795_vm14, %v2782_v1, %v792_v30  ;;  %v3928_v3 = vld [vmem:[#allocation6 + $0xb8] sm:$0xff]  ;;  %v3931_v1 = vld [vmem:[#allocation6 + $0xa8] sm:$0xff] }
 0xa10   :  { %4565 = vst [vmem:[#allocation22_spill] sm:$0xff] %v3928_v3  ;;  %v3949_v30 = vld [vmem:[#allocation6 + $0x48] sm:$0xff] }
 0xa11   :  { %2628 = vmatmul.msk.f32.vlgmr.msra.gmra.mxu2 %vm270_vm10, %v3880_v7  ;;  %vm798_vm15 = vcmp.eq.f32.partialorder %v797_v11, 8.507059e+37  ;;  %4566 = vst [vmem:[#allocation23_spill] sm:$0xff] %v3931_v1  ;;  %v3955_v11 = vld [vmem:[#allocation6 + $0x28] sm:$0xff] }
 0xa12   :  { %1829 = vmatpush.msra.mxu2 %v3884_v38  ;;  %v801_v26 = vsel %vm798_vm15, %v800_v61, %v796_v10  ;;  %4572 = vst [vmem:[#allocation29_spill] sm:$0xff] %v3949_v30  ;;  %v3958_v10 = vld [vmem:[#allocation6 + $0x18] sm:$0xff]  ;;  %v3961_v61 = vld [vmem:[#allocation6 + $0x8] sm:$0xff] }
 0xa13   :  { %4574 = vst [vmem:[#allocation31_spill] sm:$0xff] %v3955_v11 }
 0xa14   :  { %1830 = vmatpush.msra.mxu2 %v3887_v37  ;;  %4575 = vst [vmem:[#allocation32_spill] sm:$0xff] %v3958_v10 }
 0xa15   :  { %4576 = vst [vmem:[#allocation33_spill] sm:$0xff] %v3961_v61 }
 0xa16   :  { %1831 = vmatpush.msra.mxu2 %v3890_v58 }
 0xa18   :  { %1832 = vmatpush.msra.mxu2 %v3893_v25 }
 0xa1a   :  { %1833 = vmatpush.msra.mxu2 %v3897_v46 }
 0xa1c   :  { %1834 = vmatpush.msra.mxu2 %v3900_v40 }
 0xa1e   :  { %1835 = vmatpush.msra.mxu2 %v3903_v23 }
 0xa20   :  { %1836 = vmatpush.msra.mxu2 %v3906_v49 }
 0xa22   :  { %1837 = vmatpush.msra.mxu2 %v3909_v27 }
 0xa24   :  { %1838 = vmatpush.msra.mxu2 %v3912_v33 }
 0xa26   :  { %1839 = vmatpush.msra.mxu2 %v3915_v21 }
 0xa28   :  { %1840 = vmatpush.msra.mxu2 %v3918_v4 }
 0xa46   :  { %v818_v36 = vpop.permute.xlu0 %817 }
 0xa47   :  { %v820_v34 = vmul.f32 %v818_v36, %v801_v26  ;;  %v3934_v36 = vld [vmem:[#allocation6 + $0x98] sm:$0xff] }
 0xa48   :  { %4567 = vst [vmem:[#allocation24_spill] sm:$0xff] %v3934_v36 }
 0xa49   :  { %822 = vst.msk [vmem:[#allocation3 + $0x8] sm:$0xff] %vm270_vm10, %v820_v34  ;;  %993 = vrot.lane.b32.xlu1 %v820_v34, %s3085_s21  ;;  %v3940_v34 = vld [vmem:[#allocation6 + $0x78] sm:$0xff] }
 0xa4a   :  { %4569 = vst [vmem:[#allocation26_spill] sm:$0xff] %v3940_v34 }
 0xa4e   :  { %v985_v15 = vpop.permute.xlu1 %984 }
 0xa4f   :  { %v987_v13 = vmul.f32 %v985_v15, %v3859_v24  ;;  %v3937_v15 = vld [vmem:[#allocation6 + $0x88] sm:$0xff] }
 0xa50   :  { %4568 = vst [vmem:[#allocation25_spill] sm:$0xff] %v3937_v15  ;;  %v3943_v24 = vld [vmem:[#allocation6 + $0x68] sm:$0xff] }
 0xa51   :  { %v1202_v43 = vsel %vm270_vm10, %v3880_v7, %v987_v13  ;;  %989 = vrot.lane.b32.xlu0 %v987_v13, %s3084_s19  ;;  %4570 = vst [vmem:[#allocation27_spill] sm:$0xff] %v3943_v24 }
 0xa52   :  { %2622 = vmatmul.msk.f32.vlgmr.msra.gmra.mxu3 %vm376_vm11, %v1202_v43 }
 0xa53   :  { %1849 = vmatpush.msra.mxu3 %v3928_v3 }
 0xa55   :  { %1850 = vmatpush.msra.mxu3 %v3931_v1 }
 0xa57   :  { %1851 = vmatpush.msra.mxu3 %v3934_v36 }
 0xa59   :  { %1852 = vmatpush.msra.mxu3 %v3937_v15 }
 0xa5b   :  { %1853 = vmatpush.msra.mxu3 %v3940_v34 }
 0xa5d   :  { %1854 = vmatpush.msra.mxu3 %v3943_v24 }
 0xa5f   :  { %1855 = vmatpush.msra.mxu3 %v3946_v2 }
 0xa61   :  { %1856 = vmatpush.msra.mxu3 %v3949_v30 }
 0xa63   :  { %1857 = vmatpush.msra.mxu3 %v3952_v29 }
 0xa65   :  { %1858 = vmatpush.msra.mxu3 %v3955_v11 }
 0xa67   :  { %1859 = vmatpush.msra.mxu3 %v3958_v10 }
 0xa69   :  { %1860 = vmatpush.msra.mxu3 %v3961_v61 }
 0xabb   :  { %v994_v26 = vpop.permute.xlu1 %993 }
 0xac3   :  { %v990_v13 = vpop.permute.xlu0 %989 }
 0xac4   :  { %v996_v43 = vsel %vm441_vm0, %v990_v13, %v994_v26 }
 0xac5   :  { %2614 = vmatmul.msk.f32.vlgmr.msra.gmra.mxu0 %vm376_vm11, %v996_v43  ;;  %2615 = vmatmul.msk.f32.vlgmr.msrb.gmra.mxu1 %vm376_vm11, %v996_v43 }
 0xac6   :  { %1407 = vmatpush.msrb.mxu1 %v3684_v6  ;;  %1485 = vmatpush.msra.mxu0 %v3687_v8 }
 0xac8   :  { %1408 = vmatpush.msrb.mxu1 %v3693_v16  ;;  %1486 = vmatpush.msra.mxu0 %v3696_v18 }
 0xaca   :  { %1409 = vmatpush.msrb.mxu1 %v3702_v51  ;;  %1487 = vmatpush.msra.mxu0 %v3705_v19 }
 0xacc   :  { %1410 = vmatpush.msrb.mxu1 %v3711_v52  ;;  %1488 = vmatpush.msra.mxu0 %v3714_v5 }
 0xace   :  { %1411 = vmatpush.msrb.mxu1 %v3722_v53  ;;  %1489 = vmatpush.msra.mxu0 %v3725_v55 }
 0xad0   :  { %1412 = vmatpush.msrb.mxu1 %v3731_v56  ;;  %1490 = vmatpush.msra.mxu0 %v3734_v20 }
 0xad2   :  { %1413 = vmatpush.msrb.mxu1 %v3740_v12  ;;  %1491 = vmatpush.msra.mxu0 %v3743_v14 }
 0xad4   :  { %1414 = vmatpush.msrb.mxu1 %v3749_v32  ;;  %1492 = vmatpush.msra.mxu0 %v3752_v62 }
 0xad5   :  { %v1223_v26 = vpop.f32.mrf.mxu3 }
 0xad6   :  { %v1224_v13 = vadd.f32 %v3845_v41, %v1223_v26  ;;  %1493 = vmatpush.msra.mxu0 %v3762_v45 }
 0xad8   :  { %2783 = vtanh.f32 %v1224_v13  ;;  %1494 = vmatpush.msra.mxu0 %v3771_v59  ;;  %v2623_v61 = vmul.f32 -1.442695, %v1224_v13 }
 0xada   :  { %1495 = vmatpush.msra.mxu0 %v3780_v63  ;;  %2785 = vpow2.f32 %v2623_v61 }
 0xadc   :  { %1496 = vmatpush.msra.mxu0 %v3789_v48 }
 0xade   :  { %v2784_v43 = vpop.eup %2783 }
 0xadf   :  { %1248 = vrot.lane.b32.xlu0 %v2784_v43, %s3085_s21 }
 0xae0   :  { %v2786_v10 = vpop.eup %2785 }
 0xae1   :  { %v1229_v11 = vadd.f32 1.0, %v2786_v10 }
 0xae3   :  { %2787 = vrcp.f32 %v1229_v11  ;;  %v1241_v36 = vand.u32 2147483648, %v1229_v11  ;;  %vm1235_vm3 = vweird.f32 %v1229_v11  ;;  %v1239_v13 = vand.u32 2147483647, %v1229_v11 }
 0xae5   :  { %v1242_v10 = vor.u32 1.1754944e-38, %v1241_v36  ;;  %vm1240_vm5 = vcmp.eq.f32.partialorder %v1239_v13, 8.507059e+37 }
 0xae9   :  { %v2788_v29 = vpop.eup %2787 }
 0xaea   :  { %v1231_v30 = vmul.f32 %v2788_v29, %v1229_v11  ;;  %vm1236_vm2 = vweird.f32 %v2788_v29 }
 0xaeb   :  { %vm1237_vm4 = vmor %vm1235_vm3, %vm1236_vm2 }
 0xaec   :  { %v1232_v41 = vsub.f32 1.0, %v1231_v30 }
 0xaee   :  { %v1233_v24 = vmul.f32 %v2788_v29, %v1232_v41 }
 0xaf0   :  { %v1234_v34 = vadd.f32 %v2788_v29, %v1233_v24 }
 0xaf2   :  { %v1238_v61 = vsel %vm1237_vm4, %v2788_v29, %v1234_v34 }
 0xaf3   :  { %v1243_v43 = vsel %vm1240_vm5, %v1242_v10, %v1238_v61 }
 0xb42   :  { %v1037_v26 = vpop.f32.mrf.mxu1  ;;  %v1017_v30 = vpop.f32.mrf.mxu0 }
 0xb43   :  { %v1038_v2 = vadd.f32 %v1037_v26, %v3566_v50  ;;  %v1018_v41 = vadd.f32 %v1017_v30, %v3577_v17  ;;  %v1246_v30 = vmul.f32 %v1243_v43, %v3874_v57 }
 0xb45   :  { %2789 = vtanh.f32 %v1038_v2  ;;  %v2616_v24 = vmul.f32 -1.442695, %v1018_v41 }
 0xb47   :  { %2791 = vpow2.f32 %v2616_v24 }
 0xb4b   :  { %v2790_v15 = vpop.eup %2789 }
 0xb4c   :  { %1081 = vrot.lane.b32.xlu2 %v2790_v15, %s3084_s19 }
 0xb4d   :  { %v2792_v26 = vpop.eup %2791 }
 0xb4e   :  { %v1046_v54 = vadd.f32 1.0, %v2792_v26 }
 0xb50   :  { %2793 = vrcp.f32 %v1046_v54  ;;  %v1059_v36 = vand.u32 2147483648, %v1046_v54  ;;  %vm1053_vm7 = vweird.f32 %v1046_v54  ;;  %v1057_v29 = vand.u32 2147483647, %v1046_v54 }
 0xb51   :  { %v1249_v1 = vpop.permute.xlu0 %1248 }
 0xb52   :  { %v1251_v3 = vmul.f32 %v1249_v1, %v1243_v43  ;;  %vm1058_vm9 = vcmp.eq.f32.partialorder %v1057_v29, 8.507059e+37 }
 0xb54   :  { %1253 = vrot.lane.b32.xlu2 %v1251_v3, %s3085_s21  ;;  %v1060_v3 = vor.u32 1.1754944e-38, %v1059_v36 }
 0xb56   :  { %v2794_v15 = vpop.eup %2793 }
 0xb57   :  { %v1049_v35 = vmul.f32 %v2794_v15, %v1046_v54  ;;  %vm1054_vm6 = vweird.f32 %v2794_v15 }
 0xb58   :  { %vm1055_vm8 = vmor %vm1053_vm7, %vm1054_vm6 }
 0xb59   :  { %v1050_v11 = vsub.f32 1.0, %v1049_v35 }
 0xb5b   :  { %v1051_v0 = vmul.f32 %v2794_v15, %v1050_v11 }
 0xb5d   :  { %v1052_v34 = vadd.f32 %v2794_v15, %v1051_v0 }
 0xb5f   :  { %v1056_v1 = vsel %vm1055_vm8, %v2794_v15, %v1052_v34  ;;  %v2617_v34 = vmul.f32 -1.442695, %v1038_v2 }
 0xb60   :  { %v1061_v61 = vsel %vm1058_vm9, %v1060_v3, %v1056_v1 }
 0xb61   :  { %v1079_v35 = vmul.f32 %v1061_v61, %v3869_v39 }
 0xba6   :  { %v1082_v13 = vpop.permute.xlu2 %1081 }
 0xba7   :  { %v1084_v10 = vmul.f32 %v1082_v13, %v1061_v61 }
 0xba9   :  { %1086 = vrot.lane.b32.xlu1 %v1084_v10, %s3084_s19 }
 0xbae   :  { %v1254_v41 = vpop.permute.xlu2 %1253 }
 0xbaf   :  { %v3995_v24 = vadd.f32 %v1254_v41, %v1246_v30 }
 0xbb1   :  { %2795 = vtanh.f32 %v3995_v24 }
 0xbb7   :  { %v2796_v0 = vpop.eup %2795 }
 0xbb8   :  { %1259 = vrot.lane.b32.xlu1 %v2796_v0, %s3085_s21 }
 0xc1b   :  { %v1087_v54 = vpop.permute.xlu1 %1086 }
 0xc1c   :  { %v4000_v26 = vadd.f32 %v1087_v54, %v1079_v35 }
 0xc1e   :  { %2797 = vtanh.f32 %v4000_v26 }
 0xc1f   :  { %2799 = vpow2.f32 %v2617_v34 }
 0xc24   :  { %v2798_v15 = vpop.eup %2797 }
 0xc25   :  { %1092 = vrot.lane.b32.xlu0 %v2798_v15, %s3084_s19  ;;  %v2800_v36 = vpop.eup %2799 }
 0xc26   :  { %v1047_v29 = vadd.f32 1.0, %v2800_v36 }
 0xc28   :  { %2801 = vrcp.f32 %v1047_v29  ;;  %v1074_v10 = vand.u32 2147483648, %v1047_v29  ;;  %vm1068_vm13 = vweird.f32 %v1047_v29  ;;  %v1072_v30 = vand.u32 2147483647, %v1047_v29 }
 0xc2a   :  { %v1260_v11 = vpop.permute.xlu1 %1259  ;;  %v1075_v41 = vor.u32 1.1754944e-38, %v1074_v10  ;;  %vm1073_vm15 = vcmp.eq.f32.partialorder %v1072_v30, 8.507059e+37 }
 0xc2b   :  { %v4004_v57 = vmul.f32 %v1260_v11, %v1243_v43 }
 0xc2d   :  { %1264 = vrot.lane.b32.xlu2 %v4004_v57, %s3084_s19 }
 0xc2e   :  { %v2802_v39 = vpop.eup %2801 }
 0xc2f   :  { %v1064_v1 = vmul.f32 %v2802_v39, %v1047_v29  ;;  %vm1069_vm12 = vweird.f32 %v2802_v39 }
 0xc30   :  { %vm1070_vm14 = vmor %vm1068_vm13, %vm1069_vm12 }
 0xc31   :  { %v1065_v3 = vsub.f32 1.0, %v1064_v1 }
 0xc33   :  { %v1066_v13 = vmul.f32 %v2802_v39, %v1065_v3 }
 0xc35   :  { %v1067_v61 = vadd.f32 %v2802_v39, %v1066_v13 }
 0xc37   :  { %v1071_v43 = vsel %vm1070_vm14, %v2802_v39, %v1067_v61 }
 0xc38   :  { %v1076_v0 = vsel %vm1073_vm15, %v1075_v41, %v1071_v43 }
 0xc87   :  { %v1265_v54 = vpop.permute.xlu2 %1264 }
 0xc97   :  { %v1093_v35 = vpop.permute.xlu0 %1092 }
 0xc98   :  { %v1095_v2 = vmul.f32 %v1093_v35, %v1076_v0 }
 0xc9a   :  { %1097 = vst.msk [vmem:[#allocation3 + $0x10] sm:$0xff] %vm270_vm10, %v1095_v2  ;;  %1268 = vrot.lane.b32.xlu0 %v1095_v2, %s3085_s21 }
 0xd0c   :  { %v1269_v15 = vpop.permute.xlu0 %1268 }
 0xd0d   :  { %v1271_v11 = vsel %vm441_vm0, %v1265_v54, %v1269_v15 }
 0xd0e   :  { %2624 = vmatmul.msk.f32.vlgmr.msrb.gmra.mxu0 %vm376_vm11, %v1271_v11  ;;  %2625 = vmatmul.msk.f32.vlgmr.msra.gmra.mxu1 %vm376_vm11, %v1271_v11 }
 0xd0f   :  { %1682 = vmatpush.msrb.mxu0 %v3684_v6  ;;  %1554 = vmatpush.msra.mxu1 %v3884_v38 }
 0xd11   :  { %1683 = vmatpush.msrb.mxu0 %v3693_v16  ;;  %1555 = vmatpush.msra.mxu1 %v3887_v37 }
 0xd13   :  { %1684 = vmatpush.msrb.mxu0 %v3702_v51  ;;  %1556 = vmatpush.msra.mxu1 %v3890_v58 }
 0xd15   :  { %1685 = vmatpush.msrb.mxu0 %v3711_v52  ;;  %1557 = vmatpush.msra.mxu1 %v3893_v25 }
 0xd16   :  { %2629 = vmatmul.msk.f32.vlgmr.msrb.gmra.mxu1 %vm270_vm10, %v3880_v7 }
 0xd17   :  { %1686 = vmatpush.msrb.mxu0 %v3722_v53  ;;  %1558 = vmatpush.msra.mxu1 %v3897_v46  ;;  %v146_v53 = vadd.f32 %v3552_v9, %v3263_v28 }
 0xd19   :  { %1687 = vmatpush.msrb.mxu0 %v3731_v56  ;;  %1559 = vmatpush.msra.mxu1 %v3900_v40 }
 0xd1b   :  { %1688 = vmatpush.msrb.mxu0 %v3740_v12  ;;  %1560 = vmatpush.msra.mxu1 %v3903_v23 }
 0xd1d   :  { %1689 = vmatpush.msrb.mxu0 %v3749_v32  ;;  %1561 = vmatpush.msra.mxu1 %v3906_v49 }
 0xd1f   :  { %1562 = vmatpush.msra.mxu1 %v3909_v27 }
 0xd21   :  { %1563 = vmatpush.msra.mxu1 %v3912_v33 }
 0xd23   :  { %1564 = vmatpush.msra.mxu1 %v3915_v21 }
 0xd25   :  { %1565 = vmatpush.msra.mxu1 %v3918_v4 }
 0xd27   :  { %1760 = vmatpush.msrb.mxu1 %v3687_v8  ;;  %v187_v8 = vadd.f32 %v3633_v31, %v3256_v22 }
 0xd29   :  { %1761 = vmatpush.msrb.mxu1 %v3696_v18 }
 0xd2b   :  { %1762 = vmatpush.msrb.mxu1 %v3705_v19 }
 0xd2d   :  { %1763 = vmatpush.msrb.mxu1 %v3714_v5  ;;  %v1396_v5 = vpop.f32.mrf.mxu2 }
 0xd2f   :  { %1764 = vmatpush.msrb.mxu1 %v3725_v55  ;;  %v1419_v55 = vadd.f32 %v1396_v5, %v146_v53 }
 0xd31   :  { %1765 = vmatpush.msrb.mxu1 %v3734_v20  ;;  %v2630_v31 = vmul.f32 -1.442695, %v1419_v55 }
 0xd33   :  { %1766 = vmatpush.msrb.mxu1 %v3743_v14 }
 0xd35   :  { %1767 = vmatpush.msrb.mxu1 %v3752_v62 }
 0xd37   :  { %1768 = vmatpush.msrb.mxu1 %v3762_v45 }
 0xd39   :  { %1769 = vmatpush.msrb.mxu1 %v3771_v59 }
 0xd3b   :  { %1770 = vmatpush.msrb.mxu1 %v3780_v63 }
 0xd3d   :  { %1771 = vmatpush.msrb.mxu1 %v3789_v48 }
 0xd8b   :  { %v1312_v6 = vpop.f32.mrf.mxu1  ;;  %v1292_v29 = vpop.f32.mrf.mxu0 }
 0xd8c   :  { %v4050_v51 = vadd.f32 %v1312_v6, %v3566_v50  ;;  %v1293_v39 = vadd.f32 %v1292_v29, %v3577_v17  ;;  %v4585_v29 = vld [vmem:[#allocation25_spill] sm:$0xff] }
 0xd8e   :  { %v2626_v1 = vmul.f32 -1.442695, %v1293_v39  ;;  %v4586_v39 = vld [vmem:[#allocation26_spill] sm:$0xff] }
 0xd93   :  { %v1416_v16 = vpop.f32.mrf.mxu1 }
 0xd94   :  { %v1420_v18 = vadd.f32 %v1416_v16, %v187_v8 }
 0xd96   :  { %2803 = vtanh.f32 %v1420_v18 }
 0xd97   :  { %2805 = vtanh.f32 %v4050_v51 }
 0xd98   :  { %2807 = vpow2.f32 %v2630_v31 }
 0xd9c   :  { %v2804_v19 = vpop.eup %2803 }
 0xd9d   :  { %1462 = vrot.lane.b32.xlu1 %v2804_v19, %s3084_s19  ;;  %v2806_v52 = vpop.eup %2805 }
 0xd9e   :  { %v2808_v56 = vpop.eup %2807 }
 0xd9f   :  { %v1427_v20 = vadd.f32 1.0, %v2808_v56 }
 0xda1   :  { %2809 = vrcp.f32 %v1427_v20  ;;  %v1440_v59 = vand.u32 2147483648, %v1427_v20  ;;  %vm1434_vm3 = vweird.f32 %v1427_v20  ;;  %v1438_v63 = vand.u32 2147483647, %v1427_v20 }
 0xda2   :  { %2811 = vpow2.f32 %v2626_v1  ;;  %v4587_v1 = vld [vmem:[#allocation27_spill] sm:$0xff] }
 0xda3   :  { %v1441_v7 = vor.u32 1.1754944e-38, %v1440_v59  ;;  %vm1439_vm5 = vcmp.eq.f32.partialorder %v1438_v63, 8.507059e+37 }
 0xda5   :  { %1356 = vrot.lane.b32.xlu1 %v2806_v52, %s3084_s19  ;;  %v2631_v52 = vmul.f32 -1.442695, %v1420_v18 }
 0xda7   :  { %v2810_v12 = vpop.eup %2809 }
 0xda8   :  { %v1430_v14 = vmul.f32 %v2810_v12, %v1427_v20  ;;  %vm1435_vm2 = vweird.f32 %v2810_v12  ;;  %v2812_v3 = vpop.eup %2811 }
 0xda9   :  { %vm1436_vm4 = vmor %vm1434_vm3, %vm1435_vm2  ;;  %v1321_v13 = vadd.f32 1.0, %v2812_v3  ;;  %v4588_v3 = vld [vmem:[#allocation28_spill] sm:$0xff] }
 0xdaa   :  { %v1431_v32 = vsub.f32 1.0, %v1430_v14 }
 0xdab   :  { %2813 = vrcp.f32 %v1321_v13  ;;  %v1334_v15 = vand.u32 2147483648, %v1321_v13  ;;  %vm1328_vm7 = vweird.f32 %v1321_v13  ;;  %v1332_v11 = vand.u32 2147483647, %v1321_v13 }
 0xdac   :  { %v1432_v62 = vmul.f32 %v2810_v12, %v1431_v32 }
 0xdad   :  { %v1335_v16 = vor.u32 1.1754944e-38, %v1334_v15  ;;  %vm1333_vm9 = vcmp.eq.f32.partialorder %v1332_v11, 8.507059e+37 }
 0xdae   :  { %v1433_v45 = vadd.f32 %v2810_v12, %v1432_v62 }
 0xdb0   :  { %v1437_v48 = vsel %vm1436_vm4, %v2810_v12, %v1433_v45 }
 0xdb1   :  { %v1442_v9 = vsel %vm1439_vm5, %v1441_v7, %v1437_v48  ;;  %v2814_v61 = vpop.eup %2813  ;;  %v4577_v7 = vld [vmem:[#allocation16_spill] sm:$0xff] }
 0xdb2   :  { %v1324_v10 = vmul.f32 %v2814_v61, %v1321_v13  ;;  %v1460_v30 = vmul.f32 %v1442_v9, %v3864_v44  ;;  %vm1329_vm6 = vweird.f32 %v2814_v61  ;;  %v4589_v13 = vld [vmem:[#allocation29_spill] sm:$0xff] }
 0xdb3   :  { %vm1330_vm8 = vmor %vm1328_vm7, %vm1329_vm6 }
 0xdb4   :  { %v1325_v43 = vsub.f32 1.0, %v1324_v10  ;;  %v4591_v10 = vld [vmem:[#allocation31_spill] sm:$0xff] }
 0xdb6   :  { %v1326_v35 = vmul.f32 %v2814_v61, %v1325_v43  ;;  %v4593_v43 = vld [vmem:[#allocation33_spill] sm:$0xff] }
 0xdb8   :  { %v1327_v2 = vadd.f32 %v2814_v61, %v1326_v35  ;;  %v4594_v35 = vld [vmem:[#allocation21_spill] sm:$0xff] }
 0xdba   :  { %v1331_v6 = vsel %vm1330_vm8, %v2814_v61, %v1327_v2  ;;  %v4590_v61 = vld [vmem:[#allocation30_spill] sm:$0xff] }
 0xdbb   :  { %v4064_v44 = vsel %vm1333_vm9, %v1335_v16, %v1331_v6 }
 0xe0f   :  { %v1463_v34 = vpop.permute.xlu1 %1462 }
 0xe10   :  { %v1465_v36 = vmul.f32 %v1463_v34, %v1442_v9  ;;  %v4582_v9 = vld [vmem:[#allocation22_spill] sm:$0xff]  ;;  %v4583_v34 = vld [vmem:[#allocation23_spill] sm:$0xff] }
 0xe12   :  { %1467 = vrot.lane.b32.xlu2 %v1465_v36, %s3084_s19  ;;  %v4584_v36 = vld [vmem:[#allocation24_spill] sm:$0xff] }
 0xe17   :  { %v1357_v8 = vpop.permute.xlu1 %1356 }
 0xe18   :  { %v1359_v19 = vmul.f32 %v1357_v8, %v4064_v44 }
 0xe6c   :  { %v1468_v41 = vpop.permute.xlu2 %1467 }
 0xe6d   :  { %v4060_v0 = vadd.f32 %v1468_v41, %v1460_v30  ;;  %v4592_v30 = vld [vmem:[#allocation32_spill] sm:$0xff] }
 0xe6f   :  { %2815 = vtanh.f32 %v4060_v0 }
 0xe70   :  { %2817 = vpow2.f32 %v2631_v52 }
 0xe75   :  { %v2816_v54 = vpop.eup %2815 }
 0xe76   :  { %1473 = vrot.lane.b32.xlu0 %v2816_v54, %s3084_s19  ;;  %v2818_v5 = vpop.eup %2817  ;;  %v4595_v54 = vld [vmem:[#allocation13_spill] sm:$0xff] }
 0xe77   :  { %v1428_v53 = vadd.f32 1.0, %v2818_v5  ;;  %v190_v15 = vadd.f32 %v4595_v54, %v3256_v22  ;;  %v4596_v5 = vld [vmem:[#allocation10_spill] sm:$0xff] }
 0xe79   :  { %2819 = vrcp.f32 %v1428_v53  ;;  %v1455_v14 = vand.u32 2147483648, %v1428_v53  ;;  %vm1449_vm13 = vweird.f32 %v1428_v53  ;;  %v1453_v32 = vand.u32 2147483647, %v1428_v53 }
 0xe7b   :  { %v1456_v45 = vor.u32 1.1754944e-38, %v1455_v14  ;;  %vm1454_vm15 = vcmp.eq.f32.partialorder %v1453_v32, 8.507059e+37 }
 0xe7e   :  { %1361 = vrot.lane.b32.xlu0 %v1359_v19, %s3084_s19 }
 0xe7f   :  { %v2820_v55 = vpop.eup %2819 }
 0xe80   :  { %v1445_v31 = vmul.f32 %v2820_v55, %v1428_v53  ;;  %vm1450_vm12 = vweird.f32 %v2820_v55  ;;  %v149_v53 = vadd.f32 %v4596_v5, %v3263_v28 }
 0xe81   :  { %vm1451_vm14 = vmor %vm1449_vm13, %vm1450_vm12 }
 0xe82   :  { %v1446_v56 = vsub.f32 1.0, %v1445_v31 }
 0xe84   :  { %v1447_v20 = vmul.f32 %v2820_v55, %v1446_v56 }
 0xe86   :  { %v1448_v12 = vadd.f32 %v2820_v55, %v1447_v20 }
 0xe88   :  { %v1452_v62 = vsel %vm1451_vm14, %v2820_v55, %v1448_v12 }
 0xe89   :  { %v1457_v63 = vsel %vm1454_vm15, %v1456_v45, %v1452_v62 }
 0xee8   :  { %v1474_v59 = vpop.permute.xlu0 %1473 }
 0xee9   :  { %v1476_v18 = vmul.f32 %v1474_v59, %v1457_v63 }
 0xeeb   :  { %v1477_v48 = vsel %vm270_vm10, %v1476_v18, %v4004_v57  ;;  %2638 = vmatmul.msk.f32.vlgmr.msrb.gmra.mxu3 %vm270_vm10, %v1476_v18  ;;  %v4578_v57 = vld [vmem:[#allocation17_spill] sm:$0xff] }
 0xeec   :  { %2632 = vmatmul.msk.f32.vlgmr.msra.gmra.mxu0 %vm376_vm11, %v1477_v48  ;;  %2104 = vmatpush.msrb.mxu3 %v3884_v38 }
 0xeed   :  { %1937 = vmatpush.msra.mxu0 %v3759_v42  ;;  %v4579_v42 = vld [vmem:[#allocation18_spill] sm:$0xff] }
 0xeee   :  { %2105 = vmatpush.msrb.mxu3 %v3887_v37 }
 0xeef   :  { %1938 = vmatpush.msra.mxu0 %v3768_v47  ;;  %v4580_v47 = vld [vmem:[#allocation19_spill] sm:$0xff] }
 0xef0   :  { %2106 = vmatpush.msrb.mxu3 %v3890_v58 }
 0xef1   :  { %1939 = vmatpush.msra.mxu0 %v3777_v60  ;;  %v4581_v60 = vld [vmem:[#allocation20_spill] sm:$0xff] }
 0xef2   :  { %2107 = vmatpush.msrb.mxu3 %v3893_v25 }
 0xef3   :  { %1940 = vmatpush.msra.mxu0 %v4577_v7 }
 0xef4   :  { %2639 = vmatmul.msk.f32.vlgmr.msrb.gmra.mxu0 %vm270_vm10, %v1476_v18  ;;  %2108 = vmatpush.msrb.mxu3 %v3897_v46 }
 0xef5   :  { %1941 = vmatpush.msra.mxu0 %v4578_v57 }
 0xef6   :  { %2109 = vmatpush.msrb.mxu3 %v3900_v40 }
 0xef7   :  { %1942 = vmatpush.msra.mxu0 %v4579_v42 }
 0xef8   :  { %2110 = vmatpush.msrb.mxu3 %v3903_v23 }
 0xef9   :  { %1943 = vmatpush.msra.mxu0 %v4580_v47  ;;  %v1362_v47 = vpop.permute.xlu0 %1361 }
 0xefa   :  { %2111 = vmatpush.msrb.mxu3 %v3906_v49 }
 0xefb   :  { %1944 = vmatpush.msra.mxu0 %v4581_v60 }
 0xefc   :  { %2112 = vmatpush.msrb.mxu3 %v3909_v27 }
 0xefd   :  { %2124 = vmatpush.msrb.mxu0 %v4582_v9 }
 0xefe   :  { %2113 = vmatpush.msrb.mxu3 %v3912_v33 }
 0xeff   :  { %2125 = vmatpush.msrb.mxu0 %v4583_v34 }
 0xf00   :  { %2114 = vmatpush.msrb.mxu3 %v3915_v21 }
 0xf01   :  { %2126 = vmatpush.msrb.mxu0 %v4584_v36 }
 0xf02   :  { %2115 = vmatpush.msrb.mxu3 %v3918_v4 }
 0xf03   :  { %2127 = vmatpush.msrb.mxu0 %v4585_v29 }
 0xf05   :  { %2128 = vmatpush.msrb.mxu0 %v4586_v39 }
 0xf07   :  { %2129 = vmatpush.msrb.mxu0 %v4587_v1 }
 0xf09   :  { %2130 = vmatpush.msrb.mxu0 %v4588_v3 }
 0xf0b   :  { %2131 = vmatpush.msrb.mxu0 %v4589_v13 }
 0xf0d   :  { %2132 = vmatpush.msrb.mxu0 %v4590_v61 }
 0xf0f   :  { %2133 = vmatpush.msrb.mxu0 %v4591_v10 }
 0xf11   :  { %2134 = vmatpush.msrb.mxu0 %v4592_v30 }
 0xf13   :  { %2135 = vmatpush.msrb.mxu0 %v4593_v43 }
 0xf69   :  { %v1498_v41 = vpop.f32.mrf.mxu0 }
 0xf6a   :  { %v1499_v2 = vadd.f32 %v4594_v35, %v1498_v41  ;;  %v1354_v35 = vmul.f32 %v4064_v44, %v4000_v26 }
 0xf6c   :  { %2821 = vtanh.f32 %v1499_v2  ;;  %v2633_v19 = vmul.f32 -1.442695, %v1499_v2  ;;  %v4117_v54 = vadd.f32 %v1362_v47, %v1354_v35 }
 0xf6e   :  { %v1671_v52 = vpop.f32.mrf.mxu3 }
 0xf6f   :  { %v1694_v55 = vadd.f32 %v1671_v52, %v149_v53 }
 0xf71   :  { %v1691_v11 = vpop.f32.mrf.mxu0  ;;  %v2640_v31 = vmul.f32 -1.442695, %v1694_v55 }
 0xf72   :  { %v2822_v6 = vpop.eup %2821  ;;  %v4108_v8 = vadd.f32 %v1691_v11, %v190_v15 }
 0xf73   :  { %1523 = vrot.lane.b32.xlu2 %v2822_v6, %s3085_s21 }
 0xf74   :  { %2823 = vtanh.f32 %v4108_v8 }
 0xf75   :  { %2825 = vpow2.f32 %v2633_v19 }
 0xf76   :  { %2827 = vpow2.f32 %v2640_v31 }
 0xf7a   :  { %v2824_v16 = vpop.eup %2823 }
 0xf7b   :  { %1737 = vrot.lane.b32.xlu2 %v2824_v16, %s3084_s19  ;;  %v2826_v56 = vpop.eup %2825 }
 0xf7c   :  { %v1504_v20 = vadd.f32 1.0, %v2826_v56  ;;  %v2828_v12 = vpop.eup %2827  ;;  %v2627_v56 = vmul.f32 -1.442695, %v4050_v51 }
 0xf7d   :  { %v1702_v14 = vadd.f32 1.0, %v2828_v12 }
 0xf7e   :  { %2829 = vrcp.f32 %v1504_v20  ;;  %v1516_v57 = vand.u32 2147483648, %v1504_v20  ;;  %vm1510_vm3 = vweird.f32 %v1504_v20  ;;  %v1514_v42 = vand.u32 2147483647, %v1504_v20 }
 0xf7f   :  { %2831 = vrcp.f32 %v1702_v14  ;;  %v1715_v19 = vand.u32 2147483648, %v1702_v14  ;;  %vm1709_vm7 = vweird.f32 %v1702_v14  ;;  %v1713_v52 = vand.u32 2147483647, %v1702_v14 }
 0xf80   :  { %v1517_v2 = vor.u32 1.1754944e-38, %v1516_v57  ;;  %vm1515_vm5 = vcmp.eq.f32.partialorder %v1514_v42, 8.507059e+37  ;;  %2833 = vtanh.f32 %v4117_v54 }
 0xf81   :  { %v1716_v44 = vor.u32 1.1754944e-38, %v1715_v19  ;;  %vm1714_vm9 = vcmp.eq.f32.partialorder %v1713_v52, 8.507059e+37  ;;  %2835 = vpow2.f32 %v2627_v56 }
 0xf84   :  { %v2830_v32 = vpop.eup %2829 }
 0xf85   :  { %v1506_v62 = vmul.f32 %v2830_v32, %v1504_v20  ;;  %v2832_v59 = vpop.eup %2831  ;;  %vm1511_vm2 = vweird.f32 %v2830_v32 }
 0xf86   :  { %v1705_v18 = vmul.f32 %v2832_v59, %v1702_v14  ;;  %vm1512_vm4 = vmor %vm1510_vm3, %vm1511_vm2  ;;  %vm1710_vm6 = vweird.f32 %v2832_v59  ;;  %v2834_v31 = vpop.eup %2833 }
 0xf87   :  { %v1507_v45 = vsub.f32 1.0, %v1506_v62  ;;  %vm1711_vm8 = vmor %vm1709_vm7, %vm1710_vm6  ;;  %v2836_v20 = vpop.eup %2835 }
 0xf88   :  { %v1706_v7 = vsub.f32 1.0, %v1705_v18  ;;  %v1322_v12 = vadd.f32 1.0, %v2836_v20 }
 0xf89   :  { %v1508_v63 = vmul.f32 %v2830_v32, %v1507_v45 }
 0xf8a   :  { %v1707_v41 = vmul.f32 %v2832_v59, %v1706_v7  ;;  %2837 = vrcp.f32 %v1322_v12  ;;  %v1349_v7 = vand.u32 2147483648, %v1322_v12  ;;  %vm1343_vm13 = vweird.f32 %v1322_v12 }
 0xf8b   :  { %v1509_v48 = vadd.f32 %v2830_v32, %v1508_v63  ;;  %v1347_v51 = vand.u32 2147483647, %v1322_v12 }
 0xf8c   :  { %v1708_v16 = vadd.f32 %v2832_v59, %v1707_v41  ;;  %v1350_v42 = vor.u32 1.1754944e-38, %v1349_v7  ;;  %v4221_v7 = vld [vmem:[#allocation4 + $0x28] sm:$0xff] }
 0xf8d   :  { %v1513_v60 = vsel %vm1512_vm4, %v2830_v32, %v1509_v48  ;;  %vm1348_vm15 = vcmp.eq.f32.partialorder %v1347_v51, 8.507059e+37  ;;  %v4227_v51 = vld [vmem:[%s4514_s2 + $0x8] sm:$0xff] }
 0xf8e   :  { %v4119_v11 = vsel %vm1515_vm5, %v1517_v2, %v1513_v60  ;;  %v1712_v26 = vsel %vm1711_vm8, %v2832_v59, %v1708_v16 }
 0xf8f   :  { %v1717_v5 = vsel %vm1714_vm9, %v1716_v44, %v1712_v26  ;;  %v1521_v59 = vmul.f32 %v4119_v11, %v3995_v24 }
 0xf90   :  { %v2838_v14 = vpop.eup %2837  ;;  %v1735_v47 = vmul.f32 %v1717_v5, %v4060_v0  ;;  %v2641_v0 = vmul.f32 -1.442695, %v4108_v8 }
 0xf91   :  { %v1339_v32 = vmul.f32 %v2838_v14, %v1322_v12  ;;  %vm1344_vm12 = vweird.f32 %v2838_v14 }
 0xf92   :  { %vm1345_vm14 = vmor %vm1343_vm13, %vm1344_vm12 }
 0xf93   :  { %v1340_v62 = vsub.f32 1.0, %v1339_v32 }
 0xf95   :  { %v1341_v45 = vmul.f32 %v2838_v14, %v1340_v62 }
 0xf97   :  { %v1342_v48 = vadd.f32 %v2838_v14, %v1341_v45  ;;  %v4203_v45 = vld [vmem:[#allocation4 + $0x38] sm:$0xff] }
 0xf99   :  { %v1346_v57 = vsel %vm1345_vm14, %v2838_v14, %v1342_v48  ;;  %v4218_v48 = vld [vmem:[%s4514_s2 + $0x18] sm:$0xff] }
 0xf9a   :  { %v1351_v41 = vsel %vm1348_vm15, %v1350_v42, %v1346_v57  ;;  %v4230_v57 = vld [vmem:[#allocation4 + $0x20] sm:$0xff]  ;;  %v3012_v42 = vld [vmem:[%s4514_s2 + $0x70] sm:$0xff] }
 0xfcd   :  { %v1524_v15 = vpop.permute.xlu2 %1523 }
 0xfce   :  { %v1526_v6 = vmul.f32 %v1524_v15, %v4119_v11 }
 0xfd0   :  { %1528 = vrot.lane.b32.xlu1 %v1526_v6, %s3085_s21 }
 0xfd5   :  { %v1738_v53 = vpop.permute.xlu2 %1737 }
 0xfd6   :  { %v1740_v55 = vmul.f32 %v1738_v53, %v1717_v5 }
 0xfd8   :  { %1742 = vrot.lane.b32.xlu0 %v1740_v55, %s3084_s19  ;;  %1367 = vrot.lane.b32.xlu1 %v2834_v31, %s3084_s19 }
0x1042   :  { %v1529_v63 = vpop.permute.xlu1 %1528 }
0x1043   :  { %v4129_v18 = vadd.f32 %v1529_v63, %v1521_v59  ;;  %v4209_v59 = vld [vmem:[%s4514_s2 + $0x28] sm:$0xff]  ;;  %v4212_v63 = vld [vmem:[#allocation4 + $0x30] sm:$0xff] }
0x1045   :  { %2839 = vtanh.f32 %v4129_v18 }
0x104a   :  { %v1743_v60 = vpop.permute.xlu0 %1742  ;;  %v1368_v35 = vpop.permute.xlu1 %1367 }
0x104b   :  { %v2840_v24 = vpop.eup %2839  ;;  %v4133_v2 = vadd.f32 %v1743_v60, %v1735_v47  ;;  %v1370_v15 = vmul.f32 %v1368_v35, %v1351_v41  ;;  %v4237_v47 = vld [vmem:[#allocation4 + $0x18] sm:$0xff]  ;;  %v4243_v41 = vld [vmem:[#allocation4 + $0x10] sm:$0xff]  ;;  %v3016_v35 = vld [vmem:[%s4514_s2 + $0x50] sm:$0xff] }
0x104c   :  { %1534 = vrot.lane.b32.xlu2 %v2840_v24, %s3085_s21  ;;  %v3014_v60 = vld [vmem:[%s4514_s2 + $0x60] sm:$0xff]  ;;  %v4249_v24 = vld [vmem:[#allocation4 + $0x8] sm:$0xff] }
0x104d   :  { %2841 = vtanh.f32 %v4133_v2  ;;  %1372 = vst.msk [vmem:[#allocation3 + $0x18] sm:$0xff] %vm270_vm10, %v1370_v15  ;;  %1543 = vrot.lane.b32.xlu1 %v1370_v15, %s3085_s21  ;;  %v3018_v15 = vld [vmem:[%s4514_s2 + $0x40] sm:$0xff] }
0x104e   :  { %2843 = vpow2.f32 %v2641_v0  ;;  %v3020_v0 = vld [vmem:[%s4514_s2 + $0x30] sm:$0xff] }
0x1053   :  { %v2842_v6 = vpop.eup %2841 }
0x1054   :  { %1748 = vrot.lane.b32.xlu2 %v2842_v6, %s3084_s19  ;;  %v2844_v16 = vpop.eup %2843  ;;  %v4255_v6 = vld [vmem:[#allocation4] sm:$0xff] }
0x1055   :  { %v1703_v19 = vadd.f32 1.0, %v2844_v16  ;;  %v3021_v16 = vld [vmem:[%s4514_s2 + $0x20] sm:$0xff] }
0x1057   :  { %2845 = vrcp.f32 %v1703_v19  ;;  %v1730_v56 = vand.u32 2147483648, %v1703_v19  ;;  %vm1724_vm3 = vweird.f32 %v1703_v19  ;;  %v1728_v20 = vand.u32 2147483647, %v1703_v19 }
0x1059   :  { %v1731_v12 = vor.u32 1.1754944e-38, %v1730_v56  ;;  %vm1729_vm5 = vcmp.eq.f32.partialorder %v1728_v20, 8.507059e+37 }
0x105d   :  { %v2846_v52 = vpop.eup %2845 }
0x105e   :  { %v1720_v26 = vmul.f32 %v2846_v52, %v1703_v19  ;;  %vm1725_vm2 = vweird.f32 %v2846_v52  ;;  %v3022_v19 = vld [vmem:[%s4514_s2 + $0x10] sm:$0xff] }
0x105f   :  { %vm1726_vm4 = vmor %vm1724_vm3, %vm1725_vm2 }
0x1060   :  { %v1721_v44 = vsub.f32 1.0, %v1720_v26 }
0x1062   :  { %v1722_v5 = vmul.f32 %v2846_v52, %v1721_v44 }
0x1064   :  { %v1723_v31 = vadd.f32 %v2846_v52, %v1722_v5 }
0x1066   :  { %v1727_v8 = vsel %vm1726_vm4, %v2846_v52, %v1723_v31  ;;  %v3023_v52 = vld [vmem:[%s4514_s2] sm:$0xff]  ;;  %v4598_v31 = vld [vmem:[#allocation11_spill] sm:$0xff] }
0x1067   :  { %v1732_v14 = vsel %vm1729_vm5, %v1731_v12, %v1727_v8  ;;  %v152_v56 = vadd.f32 %v4598_v31, %v3263_v28 }
0x10a6   :  { %v1535_v53 = vpop.permute.xlu2 %1534 }
0x10a7   :  { %v1537_v55 = vmul.f32 %v1535_v53, %v4119_v11  ;;  %v4200_v11 = vld [vmem:[%s4514_s2 + $0x38] sm:$0xff] }
0x10a9   :  { %1539 = vrot.lane.b32.xlu0 %v1537_v55, %s3084_s19 }
0x10ae   :  { %v1749_v32 = vpop.permute.xlu2 %1748 }
0x10af   :  { %v1751_v62 = vmul.f32 %v1749_v32, %v1732_v14 }
0x10b1   :  { %2648 = vmatmul.msk.f32.vlgmr.msra.gmra.mxu0 %vm270_vm10, %v1751_v62 }
0x10b2   :  { %2379 = vmatpush.msra.mxu0 %v3884_v38 }
0x10b4   :  { %2380 = vmatpush.msra.mxu0 %v3887_v37 }
0x10b6   :  { %2381 = vmatpush.msra.mxu0 %v3890_v58 }
0x10b8   :  { %2382 = vmatpush.msra.mxu0 %v3893_v25  ;;  %v4162_v25 = vld [vmem:[%s4514_s2 + $0x78] sm:$0xff] }
0x10ba   :  { %2383 = vmatpush.msra.mxu0 %v3897_v46  ;;  %v4165_v46 = vld [vmem:[#allocation4 + $0x58] sm:$0xff] }
0x10bc   :  { %2384 = vmatpush.msra.mxu0 %v3900_v40  ;;  %v4171_v40 = vld [vmem:[%s4514_s2 + $0x68] sm:$0xff] }
0x10be   :  { %2385 = vmatpush.msra.mxu0 %v3903_v23  ;;  %v4174_v23 = vld [vmem:[#allocation4 + $0x50] sm:$0xff] }
0x10bf   :  { %v1544_v38 = vpop.permute.xlu1 %1543 }
0x10c0   :  { %2386 = vmatpush.msra.mxu0 %v3906_v49  ;;  %v4180_v49 = vld [vmem:[%s4514_s2 + $0x58] sm:$0xff] }
0x10c2   :  { %2387 = vmatpush.msra.mxu0 %v3909_v27  ;;  %v4183_v27 = vld [vmem:[#allocation4 + $0x48] sm:$0xff] }
0x10c4   :  { %2388 = vmatpush.msra.mxu0 %v3912_v33  ;;  %v1752_v33 = vsel %vm270_vm10, %v1751_v62, %v1537_v55 }
0x10c6   :  { %2389 = vmatpush.msra.mxu0 %v3915_v21  ;;  %v4190_v21 = vld [vmem:[%s4514_s2 + $0x48] sm:$0xff] }
0x10c8   :  { %2390 = vmatpush.msra.mxu0 %v3918_v4  ;;  %v4193_v4 = vld [vmem:[#allocation4 + $0x40] sm:$0xff] }
0x111b   :  { %v1540_v37 = vpop.permute.xlu0 %1539 }
0x111c   :  { %v1546_v58 = vsel %vm441_vm0, %v1540_v37, %v1544_v38 }
0x111d   :  { %2634 = vmatmul.msk.f32.vlgmr.msra.gmra.mxu1 %vm376_vm11, %v1546_v58  ;;  %2635 = vmatmul.msk.f32.vlgmr.msrb.gmra.mxu2 %vm376_vm11, %v1546_v58 }
0x111e   :  { %1957 = vmatpush.msra.mxu1 %v4162_v25  ;;  %2035 = vmatpush.msrb.mxu2 %v4165_v46 }
0x1120   :  { %1958 = vmatpush.msra.mxu1 %v4171_v40  ;;  %2036 = vmatpush.msrb.mxu2 %v4174_v23 }
0x1122   :  { %1959 = vmatpush.msra.mxu1 %v4180_v49  ;;  %2037 = vmatpush.msrb.mxu2 %v4183_v27 }
0x1124   :  { %1960 = vmatpush.msra.mxu1 %v4190_v21  ;;  %2038 = vmatpush.msrb.mxu2 %v4193_v4 }
0x1125   :  { %2642 = vmatmul.msk.f32.vlgmr.msrb.gmra.mxu1 %vm376_vm11, %v1752_v33 }
0x1126   :  { %1961 = vmatpush.msra.mxu1 %v4200_v11  ;;  %2039 = vmatpush.msrb.mxu2 %v4203_v45 }
0x1128   :  { %1962 = vmatpush.msra.mxu1 %v4209_v59  ;;  %2040 = vmatpush.msrb.mxu2 %v4212_v63 }
0x112a   :  { %1963 = vmatpush.msra.mxu1 %v4218_v48  ;;  %2041 = vmatpush.msrb.mxu2 %v4221_v7 }
0x112c   :  { %1964 = vmatpush.msra.mxu1 %v4227_v51  ;;  %2042 = vmatpush.msrb.mxu2 %v4230_v57 }
0x112d   :  { %2649 = vmatmul.msk.f32.vlgmr.msra.gmra.mxu1 %vm270_vm10, %v1751_v62 }
0x112e   :  { %2212 = vmatpush.msrb.mxu1 %v3012_v42  ;;  %2043 = vmatpush.msrb.mxu2 %v4237_v47  ;;  %v1946_v55 = vpop.f32.mrf.mxu0 }
0x112f   :  { %v1969_v20 = vadd.f32 %v1946_v55, %v152_v56 }
0x1130   :  { %2213 = vmatpush.msrb.mxu1 %v3014_v60  ;;  %2044 = vmatpush.msrb.mxu2 %v4243_v41 }
0x1131   :  { %v2650_v12 = vmul.f32 -1.442695, %v1969_v20 }
0x1132   :  { %2214 = vmatpush.msrb.mxu1 %v3016_v35  ;;  %2045 = vmatpush.msrb.mxu2 %v4249_v24 }
0x1134   :  { %2215 = vmatpush.msrb.mxu1 %v3018_v15  ;;  %2046 = vmatpush.msrb.mxu2 %v4255_v6 }
0x1136   :  { %2216 = vmatpush.msrb.mxu1 %v3020_v0 }
0x1138   :  { %2217 = vmatpush.msrb.mxu1 %v3021_v16 }
0x113a   :  { %2218 = vmatpush.msrb.mxu1 %v3022_v19 }
0x113c   :  { %2219 = vmatpush.msrb.mxu1 %v3023_v52 }
0x113e   :  { %2399 = vmatpush.msra.mxu1 %v4582_v9 }
0x1140   :  { %2400 = vmatpush.msra.mxu1 %v4583_v34 }
0x1142   :  { %2401 = vmatpush.msra.mxu1 %v4584_v36 }
0x1144   :  { %2402 = vmatpush.msra.mxu1 %v4585_v29 }
0x1146   :  { %2403 = vmatpush.msra.mxu1 %v4586_v39  ;;  %v4289_v39 = vld [vmem:[%s4517_s5] ss:$0 sm:$0xff] }
0x1148   :  { %2404 = vmatpush.msra.mxu1 %v4587_v1 }
0x114a   :  { %2405 = vmatpush.msra.mxu1 %v4588_v3 }
0x114c   :  { %2406 = vmatpush.msra.mxu1 %v4589_v13  ;;  %v4597_v13 = vld [vmem:[#allocation14_spill] sm:$0xff] }
0x114e   :  { %2407 = vmatpush.msra.mxu1 %v4590_v61  ;;  %v193_v61 = vadd.f32 %v4597_v13, %v3256_v22 }
0x1150   :  { %2408 = vmatpush.msra.mxu1 %v4591_v10 }
0x1152   :  { %2409 = vmatpush.msra.mxu1 %v4592_v30 }
0x1154   :  { %2410 = vmatpush.msra.mxu1 %v4593_v43 }
0x119a   :  { %v1567_v9 = vpop.f32.mrf.mxu1 }
0x119b   :  { %v1568_v44 = vadd.f32 %v1567_v9, %v3577_v17 }
0x119d   :  { %v2636_v5 = vmul.f32 -1.442695, %v1568_v44 }
0x11a0   :  { %v1587_v34 = vpop.f32.mrf.mxu2 }
0x11a1   :  { %v4283_v36 = vadd.f32 %v1587_v34, %v3566_v50 }
0x11a2   :  { %v1773_v29 = vpop.f32.mrf.mxu1 }
0x11a3   :  { %2847 = vtanh.f32 %v4283_v36  ;;  %v1774_v1 = vadd.f32 %v4289_v39, %v1773_v29 }
0x11a5   :  { %2849 = vtanh.f32 %v1774_v1  ;;  %v2643_v53 = vmul.f32 -1.442695, %v1774_v1 }
0x11a9   :  { %v2848_v3 = vpop.eup %2847 }
0x11aa   :  { %1631 = vrot.lane.b32.xlu0 %v2848_v3, %s3084_s19  ;;  %v1966_v10 = vpop.f32.mrf.mxu1 }
0x11ab   :  { %v4295_v30 = vadd.f32 %v1966_v10, %v193_v61  ;;  %v2850_v43 = vpop.eup %2849 }
0x11ac   :  { %1798 = vrot.lane.b32.xlu1 %v2850_v43, %s3085_s21 }
0x11ad   :  { %2851 = vtanh.f32 %v4295_v30 }
0x11ae   :  { %2853 = vpow2.f32 %v2636_v5 }
0x11af   :  { %2855 = vpow2.f32 %v2643_v53 }
0x11b0   :  { %2857 = vpow2.f32 %v2650_v12 }
0x11b3   :  { %v2852_v26 = vpop.eup %2851 }
0x11b4   :  { %2012 = vrot.lane.b32.xlu1 %v2852_v26, %s3084_s19  ;;  %v2854_v8 = vpop.eup %2853 }
0x11b5   :  { %v2856_v14 = vpop.eup %2855  ;;  %v1596_v32 = vadd.f32 1.0, %v2854_v8 }
0x11b6   :  { %v1779_v62 = vadd.f32 1.0, %v2856_v14  ;;  %v2858_v38 = vpop.eup %2857 }
0x11b7   :  { %2859 = vrcp.f32 %v1596_v32  ;;  %v1977_v58 = vadd.f32 1.0, %v2858_v38  ;;  %v1609_v34 = vand.u32 2147483648, %v1596_v32  ;;  %vm1603_vm7 = vweird.f32 %v1596_v32 }
0x11b8   :  { %2861 = vrcp.f32 %v1779_v62  ;;  %v1607_v29 = vand.u32 2147483647, %v1596_v32  ;;  %v1791_v61 = vand.u32 2147483648, %v1779_v62  ;;  %vm1785_vm12 = vweird.f32 %v1779_v62 }
0x11b9   :  { %2863 = vrcp.f32 %v1977_v58  ;;  %v1610_v10 = vor.u32 1.1754944e-38, %v1609_v34  ;;  %v1789_v43 = vand.u32 2147483647, %v1779_v62  ;;  %v1990_v14 = vand.u32 2147483648, %v1977_v58 }
0x11ba   :  { %vm1608_vm13 = vcmp.eq.f32.partialorder %v1607_v29, 8.507059e+37  ;;  %v1792_v31 = vor.u32 1.1754944e-38, %v1791_v61  ;;  %vm1984_vm3 = vweird.f32 %v1977_v58 }
0x11bb   :  { %vm1790_vm15 = vcmp.eq.f32.partialorder %v1789_v43, 8.507059e+37  ;;  %v1991_v38 = vor.u32 1.1754944e-38, %v1990_v14  ;;  %v2651_v43 = vmul.f32 -1.442695, %v4295_v30 }
0x11bd   :  { %v2860_v37 = vpop.eup %2859 }
0x11be   :  { %v2862_v33 = vpop.eup %2861  ;;  %v1599_v42 = vmul.f32 %v2860_v37, %v1596_v32  ;;  %vm1604_vm6 = vweird.f32 %v2860_v37  ;;  %v1988_v32 = vand.u32 2147483647, %v1977_v58 }
0x11bf   :  { %v1781_v60 = vmul.f32 %v2862_v33, %v1779_v62  ;;  %v2864_v0 = vpop.eup %2863  ;;  %vm1605_vm8 = vmor %vm1603_vm7, %vm1604_vm6  ;;  %vm1786_vm9 = vweird.f32 %v2862_v33 }
0x11c0   :  { %v1600_v35 = vsub.f32 1.0, %v1599_v42  ;;  %v1980_v52 = vmul.f32 %v2864_v0, %v1977_v58  ;;  %vm1787_vm14 = vmor %vm1785_vm12, %vm1786_vm9  ;;  %vm1985_vm2 = vweird.f32 %v2864_v0  ;;  %vm1989_vm5 = vcmp.eq.f32.partialorder %v1988_v32, 8.507059e+37 }
0x11c1   :  { %v1782_v15 = vsub.f32 1.0, %v1781_v60  ;;  %vm1986_vm4 = vmor %vm1984_vm3, %vm1985_vm2 }
0x11c2   :  { %v1601_v16 = vmul.f32 %v2860_v37, %v1600_v35  ;;  %v1981_v3 = vsub.f32 1.0, %v1980_v52 }
0x11c3   :  { %v1783_v19 = vmul.f32 %v2862_v33, %v1782_v15 }
0x11c4   :  { %v1602_v9 = vadd.f32 %v2860_v37, %v1601_v16  ;;  %v1982_v53 = vmul.f32 %v2864_v0, %v1981_v3 }
0x11c5   :  { %v1784_v1 = vadd.f32 %v2862_v33, %v1783_v19 }
0x11c6   :  { %v1606_v13 = vsel %vm1605_vm8, %v2860_v37, %v1602_v9  ;;  %v1983_v12 = vadd.f32 %v2864_v0, %v1982_v53 }
0x11c7   :  { %v1611_v44 = vsel %vm1608_vm13, %v1610_v10, %v1606_v13  ;;  %v1788_v5 = vsel %vm1787_vm14, %v2862_v33, %v1784_v1 }
0x11c8   :  { %v4303_v20 = vsel %vm1790_vm15, %v1792_v31, %v1788_v5  ;;  %v1987_v62 = vsel %vm1986_vm4, %v2864_v0, %v1983_v12  ;;  %v1629_v60 = vmul.f32 %v1611_v44, %v4117_v54 }
0x11c9   :  { %v1992_v37 = vsel %vm1989_vm5, %v1991_v38, %v1987_v62  ;;  %v1796_v58 = vmul.f32 %v4303_v20, %v4129_v18  ;;  %v2637_v18 = vmul.f32 -1.442695, %v4283_v36 }
0x11ca   :  { %v2010_v9 = vmul.f32 %v1992_v37, %v4133_v2 }
0x121c   :  { %v1632_v26 = vpop.permute.xlu0 %1631 }
0x121d   :  { %v1634_v55 = vmul.f32 %v1632_v26, %v1611_v44 }
0x121e   :  { %v1799_v56 = vpop.permute.xlu1 %1798 }
0x121f   :  { %1636 = vrot.lane.b32.xlu2 %v1634_v55, %s3084_s19  ;;  %v1801_v8 = vmul.f32 %v1799_v56, %v4303_v20 }
0x1221   :  { %1803 = vrot.lane.b32.xlu0 %v1801_v8, %s3085_s21 }
0x1226   :  { %v2013_v33 = vpop.permute.xlu1 %2012 }
0x1227   :  { %v2015_v42 = vmul.f32 %v2013_v33, %v1992_v37 }
0x1229   :  { %2017 = vrot.lane.b32.xlu2 %v2015_v42, %s3084_s19 }
0x1279   :  { %v1637_v35 = vpop.permute.xlu2 %1636 }
0x127a   :  { %v4310_v15 = vadd.f32 %v1637_v35, %v1629_v60 }
0x127c   :  { %2865 = vtanh.f32 %v4310_v15 }
0x1282   :  { %v2866_v16 = vpop.eup %2865 }
0x1283   :  { %1642 = vrot.lane.b32.xlu0 %v2866_v16, %s3084_s19  ;;  %v2018_v52 = vpop.permute.xlu2 %2017 }
0x1284   :  { %v4320_v54 = vadd.f32 %v2018_v52, %v2010_v9 }
0x1293   :  { %v1804_v0 = vpop.permute.xlu0 %1803 }
0x1294   :  { %v4316_v19 = vadd.f32 %v1804_v0, %v1796_v58 }
0x1296   :  { %2867 = vtanh.f32 %v4316_v19 }
0x1297   :  { %2869 = vtanh.f32 %v4320_v54 }
0x1298   :  { %2871 = vpow2.f32 %v2637_v18 }
0x129c   :  { %v2868_v34 = vpop.eup %2867 }
0x129d   :  { %1809 = vrot.lane.b32.xlu1 %v2868_v34, %s3085_s21  ;;  %v2870_v29 = vpop.eup %2869 }
0x129e   :  { %v2872_v1 = vpop.eup %2871 }
0x129f   :  { %v1597_v3 = vadd.f32 1.0, %v2872_v1 }
0x12a1   :  { %2873 = vrcp.f32 %v1597_v3  ;;  %v1624_v44 = vand.u32 2147483648, %v1597_v3  ;;  %vm1618_vm7 = vweird.f32 %v1597_v3  ;;  %v1622_v5 = vand.u32 2147483647, %v1597_v3 }
0x12a2   :  { %2875 = vpow2.f32 %v2651_v43 }
0x12a3   :  { %v1625_v55 = vor.u32 1.1754944e-38, %v1624_v44  ;;  %vm1623_vm9 = vcmp.eq.f32.partialorder %v1622_v5, 8.507059e+37 }
0x12a5   :  { %2023 = vrot.lane.b32.xlu1 %v2870_v29, %s3084_s19 }
0x12a7   :  { %v2874_v13 = vpop.eup %2873 }
0x12a8   :  { %v1614_v61 = vmul.f32 %v2874_v13, %v1597_v3  ;;  %vm1619_vm6 = vweird.f32 %v2874_v13  ;;  %v2876_v36 = vpop.eup %2875 }
0x12a9   :  { %vm1620_vm8 = vmor %vm1618_vm7, %vm1619_vm6  ;;  %v1978_v12 = vadd.f32 1.0, %v2876_v36 }
0x12aa   :  { %v1615_v10 = vsub.f32 1.0, %v1614_v61 }
0x12ab   :  { %2877 = vrcp.f32 %v1978_v12  ;;  %v2005_v42 = vand.u32 2147483648, %v1978_v12  ;;  %vm1999_vm13 = vweird.f32 %v1978_v12  ;;  %v2003_v60 = vand.u32 2147483647, %v1978_v12 }
0x12ac   :  { %v1616_v2 = vmul.f32 %v2874_v13, %v1615_v10  ;;  %v4403_v10 = vld [vmem:[%s4521_s9] ss:$0 sm:$0xff] }
0x12ad   :  { %v2006_v16 = vor.u32 1.1754944e-38, %v2005_v42  ;;  %vm2004_vm15 = vcmp.eq.f32.partialorder %v2003_v60, 8.507059e+37  ;;  %v4600_v42 = vld [vmem:[#allocation12_spill] sm:$0xff] }
0x12ae   :  { %v1617_v26 = vadd.f32 %v2874_v13, %v1616_v2  ;;  %v155_v60 = vadd.f32 %v4600_v42, %v3263_v28 }
0x12b0   :  { %v1621_v53 = vsel %vm1620_vm8, %v2874_v13, %v1617_v26 }
0x12b1   :  { %v1626_v31 = vsel %vm1623_vm9, %v1625_v55, %v1621_v53  ;;  %v2878_v30 = vpop.eup %2877 }
0x12b2   :  { %v1995_v14 = vmul.f32 %v2878_v30, %v1978_v12  ;;  %vm2000_vm12 = vweird.f32 %v2878_v30 }
0x12b3   :  { %vm2001_vm14 = vmor %vm1999_vm13, %vm2000_vm12 }
0x12b4   :  { %v1996_v32 = vsub.f32 1.0, %v1995_v14 }
0x12b6   :  { %v1997_v62 = vmul.f32 %v2878_v30, %v1996_v32 }
0x12b8   :  { %v1998_v33 = vadd.f32 %v2878_v30, %v1997_v62 }
0x12ba   :  { %v2002_v35 = vsel %vm2001_vm14, %v2878_v30, %v1998_v33 }
0x12bb   :  { %v2007_v58 = vsel %vm2004_vm15, %v2006_v16, %v2002_v35 }
0x12f5   :  { %v1643_v56 = vpop.permute.xlu0 %1642 }
0x12f6   :  { %v1645_v8 = vmul.f32 %v1643_v56, %v1626_v31 }
0x12f8   :  { %1647 = vst.msk [vmem:[#allocation3 + $0x20] sm:$0xff] %vm270_vm10, %v1645_v8  ;;  %1818 = vrot.lane.b32.xlu0 %v1645_v8, %s3085_s21 }
0x130f   :  { %v1810_v38 = vpop.permute.xlu1 %1809 }
0x1310   :  { %v1812_v37 = vmul.f32 %v1810_v38, %v4303_v20 }
0x1312   :  { %1814 = vrot.lane.b32.xlu2 %v1812_v37, %s3084_s19 }
0x1317   :  { %v2024_v0 = vpop.permute.xlu1 %2023 }
0x1318   :  { %v2026_v52 = vmul.f32 %v2024_v0, %v2007_v58 }
0x131a   :  { %2658 = vmatmul.msk.f32.vlgmr.msrb.gmra.mxu1 %vm270_vm10, %v2026_v52  ;;  %v2027_v29 = vsel %vm270_vm10, %v2026_v52, %v1812_v37 }
0x136a   :  { %v1819_v9 = vpop.permute.xlu0 %1818 }
0x136c   :  { %v1815_v34 = vpop.permute.xlu2 %1814 }
0x136d   :  { %v1821_v20 = vsel %vm441_vm0, %v1815_v34, %v1819_v9 }
0x136e   :  { %2644 = vmatmul.msk.f32.vlgmr.msra.gmra.mxu2 %vm376_vm11, %v1821_v20  ;;  %2645 = vmatmul.msk.f32.vlgmr.msra.gmra.mxu3 %vm376_vm11, %v1821_v20 }
0x136f   :  { %2232 = vmatpush.msra.mxu2 %v4162_v25  ;;  %2310 = vmatpush.msra.mxu3 %v4165_v46  ;;  %v2488_v25 = vld [vmem:[%s4520_s8 + $0x38] sm:$0xff]  ;;  %v2487_v46 = vld [vmem:[%s4520_s8 + $0x30] sm:$0xff] }
0x1371   :  { %2233 = vmatpush.msra.mxu2 %v4171_v40  ;;  %2311 = vmatpush.msra.mxu3 %v4174_v23  ;;  %v2486_v40 = vld [vmem:[%s4520_s8 + $0x28] sm:$0xff]  ;;  %v2485_v23 = vld [vmem:[%s4520_s8 + $0x20] sm:$0xff] }
0x1373   :  { %2234 = vmatpush.msra.mxu2 %v4180_v49  ;;  %2312 = vmatpush.msra.mxu3 %v4183_v27  ;;  %v2484_v49 = vld [vmem:[%s4520_s8 + $0x18] sm:$0xff]  ;;  %v2483_v27 = vld [vmem:[%s4520_s8 + $0x10] sm:$0xff] }
0x1375   :  { %2235 = vmatpush.msra.mxu2 %v4190_v21  ;;  %2313 = vmatpush.msra.mxu3 %v4193_v4  ;;  %v2482_v21 = vld [vmem:[%s4520_s8 + $0x8] sm:$0xff]  ;;  %v2481_v4 = vld [vmem:[%s4520_s8] sm:$0xff] }
0x1376   :  { %2652 = vmatmul.msk.f32.vlgmr.msrb.gmra.mxu2 %vm376_vm11, %v2027_v29 }
0x1377   :  { %2236 = vmatpush.msra.mxu2 %v4200_v11  ;;  %2314 = vmatpush.msra.mxu3 %v4203_v45  ;;  %v2473_v11 = vld [vmem:[#allocation3] sm:$0xff]  ;;  %v2474_v45 = vld [vmem:[#allocation3 + $0x8] sm:$0xff] }
0x1379   :  { %2237 = vmatpush.msra.mxu2 %v4209_v59  ;;  %2315 = vmatpush.msra.mxu3 %v4212_v63  ;;  %v2475_v59 = vld [vmem:[#allocation3 + $0x10] sm:$0xff]  ;;  %v2476_v63 = vld [vmem:[#allocation3 + $0x18] sm:$0xff] }
0x137b   :  { %2238 = vmatpush.msra.mxu2 %v4218_v48  ;;  %2316 = vmatpush.msra.mxu3 %v4221_v7  ;;  %v2477_v48 = vld [vmem:[#allocation3 + $0x20] sm:$0xff] }
0x137d   :  { %2239 = vmatpush.msra.mxu2 %v4227_v51  ;;  %2317 = vmatpush.msra.mxu3 %v4230_v57 }
0x137e   :  { %2659 = vmatmul.msk.f32.vlgmr.msra.gmra.mxu2 %vm270_vm10, %v2026_v52 }
0x137f   :  { %2525 = vmatpush.msrb.mxu2 %v2488_v25  ;;  %2318 = vmatpush.msra.mxu3 %v4237_v47 }
0x1381   :  { %2526 = vmatpush.msrb.mxu2 %v2487_v46  ;;  %2319 = vmatpush.msra.mxu3 %v4243_v41 }
0x1383   :  { %2527 = vmatpush.msrb.mxu2 %v2486_v40  ;;  %2320 = vmatpush.msra.mxu3 %v4249_v24 }
0x1385   :  { %2528 = vmatpush.msrb.mxu2 %v2485_v23  ;;  %2321 = vmatpush.msra.mxu3 %v4255_v6  ;;  %v4599_v6 = vld [vmem:[#allocation15_spill] sm:$0xff] }
0x1386   :  { %v196_v18 = vadd.f32 %v4599_v6, %v3256_v22 }
0x1387   :  { %2529 = vmatpush.msrb.mxu2 %v2484_v49 }
0x1389   :  { %2530 = vmatpush.msrb.mxu2 %v2483_v27 }
0x138b   :  { %2531 = vmatpush.msrb.mxu2 %v2482_v21 }
0x138d   :  { %2532 = vmatpush.msrb.mxu2 %v2481_v4 }
0x138e   :  { %2668 = vmatmul.msk.f32.vlgmr.msrb.gmra.mxu2 %vm270_vm10, %v2473_v11 }
0x1396   :  { %2669 = vmatmul.msk.f32.gmra.mxu2 %vm270_vm10, %v2474_v45 }
0x1397   :  { %v2221_v37 = vpop.f32.mrf.mxu1 }
0x1398   :  { %v2244_v35 = vadd.f32 %v2221_v37, %v155_v60 }
0x139a   :  { %v2660_v52 = vmul.f32 -1.442695, %v2244_v35 }
0x139e   :  { %2670 = vmatmul.msk.f32.gmra.mxu2 %vm270_vm10, %v2475_v59 }
0x13a6   :  { %2671 = vmatmul.msk.f32.gmra.mxu2 %vm270_vm10, %v2476_v63 }
0x13ae   :  { %2672 = vmatmul.msk.f32.gmra.mxu2 %vm270_vm10, %v2477_v48 }
0x13f1   :  { %v1842_v7 = vpop.f32.mrf.mxu2  ;;  %v1862_v51 = vpop.f32.mrf.mxu3 }
0x13f2   :  { %v4388_v57 = vadd.f32 %v1862_v51, %v3566_v50  ;;  %v1843_v53 = vadd.f32 %v1842_v7, %v3577_v17 }
0x13f4   :  { %2879 = vtanh.f32 %v4388_v57  ;;  %v2646_v55 = vmul.f32 -1.442695, %v1843_v53 }
0x13f9   :  { %v2048_v47 = vpop.f32.mrf.mxu2 }
0x13fa   :  { %v2880_v41 = vpop.eup %2879  ;;  %v2049_v24 = vadd.f32 %v4289_v39, %v2048_v47 }
0x13fb   :  { %1906 = vrot.lane.b32.xlu2 %v2880_v41, %s3084_s19 }
0x13fc   :  { %2881 = vtanh.f32 %v2049_v24  ;;  %v2653_v38 = vmul.f32 -1.442695, %v2049_v24 }
0x1401   :  { %v2241_v3 = vpop.f32.mrf.mxu2 }
0x1402   :  { %v2882_v1 = vpop.eup %2881  ;;  %v4395_v13 = vadd.f32 %v2241_v3, %v196_v18 }
0x1403   :  { %2073 = vrot.lane.b32.xlu0 %v2882_v1, %s3085_s21 }
0x1404   :  { %2883 = vtanh.f32 %v4395_v13 }
0x1405   :  { %2885 = vpow2.f32 %v2646_v55 }
0x140a   :  { %v2884_v61 = vpop.eup %2883 }
0x140b   :  { %2287 = vrot.lane.b32.xlu0 %v2884_v61, %s3084_s19  ;;  %v2886_v12 = vpop.eup %2885 }
0x140c   :  { %v1871_v30 = vadd.f32 1.0, %v2886_v12 }
0x140e   :  { %2887 = vrcp.f32 %v1871_v30  ;;  %v1884_v58 = vand.u32 2147483648, %v1871_v30  ;;  %vm1878_vm3 = vweird.f32 %v1871_v30  ;;  %v1882_v0 = vand.u32 2147483647, %v1871_v30 }
0x140f   :  { %2889 = vpow2.f32 %v2653_v38 }
0x1410   :  { %v1885_v20 = vor.u32 1.1754944e-38, %v1884_v58  ;;  %vm1883_vm5 = vcmp.eq.f32.partialorder %v1882_v0, 8.507059e+37  ;;  %2891 = vpow2.f32 %v2660_v52 }
0x1411   :  { %v2534_v2 = vpop.f32.mrf.mxu2 }
0x1412   :  { %v2535_v43 = vadd.f32 %v4403_v10, %v2534_v2 }
0x1414   :  { %2558 = vst.msk [vmem:[%s4522_s10] sm:$0xff] %vm86_vm1, %v2535_v43  ;;  %v2888_v14 = vpop.eup %2887 }
0x1415   :  { %v1874_v32 = vmul.f32 %v2888_v14, %v1871_v30  ;;  %vm1879_vm2 = vweird.f32 %v2888_v14  ;;  %v2890_v9 = vpop.eup %2889 }
0x1416   :  { %vm1880_vm4 = vmor %vm1878_vm3, %vm1879_vm2  ;;  %v2054_v29 = vadd.f32 1.0, %v2890_v9  ;;  %v2892_v28 = vpop.eup %2891 }
0x1417   :  { %v1875_v62 = vsub.f32 1.0, %v1874_v32  ;;  %v2252_v23 = vadd.f32 1.0, %v2892_v28 }
0x1418   :  { %2893 = vrcp.f32 %v2054_v29  ;;  %v2066_v63 = vand.u32 2147483648, %v2054_v29  ;;  %vm2060_vm7 = vweird.f32 %v2054_v29  ;;  %v2064_v7 = vand.u32 2147483647, %v2054_v29 }
0x1419   :  { %v2537_v22 = vpop.f32.mrf.mxu2  ;;  %v1876_v33 = vmul.f32 %v2888_v14, %v1875_v62  ;;  %2895 = vrcp.f32 %v2252_v23  ;;  %v2265_v3 = vand.u32 2147483648, %v2252_v23  ;;  %vm2259_vm13 = vweird.f32 %v2252_v23 }
0x141a   :  { %v2538_v26 = vadd.f32 %v4403_v10, %v2537_v22  ;;  %v2067_v47 = vor.u32 1.1754944e-38, %v2066_v63  ;;  %vm2065_vm9 = vcmp.eq.f32.partialorder %v2064_v7, 8.507059e+37  ;;  %v2263_v61 = vand.u32 2147483647, %v2252_v23 }
0x141b   :  { %v1877_v16 = vadd.f32 %v2888_v14, %v1876_v33  ;;  %v2266_v43 = vor.u32 1.1754944e-38, %v2265_v3 }
0x141c   :  { %2559 = vst.msk [vmem:[%s4522_s10 + $0x8] sm:$0xff] %vm86_vm1, %v2538_v26  ;;  %vm2264_vm15 = vcmp.eq.f32.partialorder %v2263_v61, 8.507059e+37 }
0x141d   :  { %v1881_v34 = vsel %vm1880_vm4, %v2888_v14, %v1877_v16 }
0x141e   :  { %v1886_v46 = vsel %vm1883_vm5, %v1885_v20, %v1881_v34  ;;  %v2894_v49 = vpop.eup %2893  ;;  %v2661_v20 = vmul.f32 -1.442695, %v4395_v13 }
0x141f   :  { %v2056_v27 = vmul.f32 %v2894_v49, %v2054_v29  ;;  %v2896_v4 = vpop.eup %2895  ;;  %vm2061_vm6 = vweird.f32 %v2894_v49 }
0x1420   :  { %v2255_v45 = vmul.f32 %v2896_v4, %v2252_v23  ;;  %vm2062_vm8 = vmor %vm2060_vm7, %vm2061_vm6  ;;  %vm2260_vm12 = vweird.f32 %v2896_v4 }
0x1421   :  { %v2540_v44 = vpop.f32.mrf.mxu2  ;;  %v2057_v21 = vsub.f32 1.0, %v2056_v27  ;;  %vm2261_vm14 = vmor %vm2259_vm13, %vm2260_vm12 }
0x1422   :  { %v2541_v5 = vadd.f32 %v4403_v10, %v2540_v44  ;;  %v2256_v48 = vsub.f32 1.0, %v2255_v45 }
0x1423   :  { %v2058_v11 = vmul.f32 %v2894_v49, %v2057_v21 }
0x1424   :  { %2560 = vst.msk [vmem:[%s4522_s10 + $0x10] sm:$0xff] %vm86_vm1, %v2541_v5  ;;  %v2257_v41 = vmul.f32 %v2896_v4, %v2256_v48  ;;  %v1904_v5 = vmul.f32 %v1886_v46, %v4310_v15 }
0x1425   :  { %v2059_v59 = vadd.f32 %v2894_v49, %v2058_v11 }
0x1426   :  { %v2258_v1 = vadd.f32 %v2896_v4, %v2257_v41 }
0x1427   :  { %v2063_v51 = vsel %vm2062_vm8, %v2894_v49, %v2059_v59 }
0x1428   :  { %v4434_v6 = vsel %vm2065_vm9, %v2067_v47, %v2063_v51  ;;  %v2262_v2 = vsel %vm2261_vm14, %v2896_v4, %v2258_v1 }
0x1429   :  { %v2543_v36 = vpop.f32.mrf.mxu2  ;;  %v2267_v22 = vsel %vm2264_vm15, %v2266_v43, %v2262_v2 }
0x142a   :  { %v2544_v31 = vadd.f32 %v4403_v10, %v2543_v36  ;;  %v2071_v36 = vmul.f32 %v4434_v6, %v4316_v19  ;;  %v2285_v15 = vmul.f32 %v2267_v22, %v4320_v54  ;;  %v2647_v19 = vmul.f32 -1.442695, %v4388_v57 }
0x142c   :  { %2561 = vst.msk [vmem:[%s4522_s10 + $0x18] sm:$0xff] %vm86_vm1, %v2544_v31 }
0x1431   :  { %v2546_v56 = vpop.f32.mrf.mxu2 }
0x1432   :  { %v2547_v8 = vadd.f32 %v4403_v10, %v2546_v56 }
0x1434   :  { %2562 = vst.msk [vmem:[%s4522_s10 + $0x20] sm:$0xff] %vm86_vm1, %v2547_v8 }
0x1455   :  { %v1907_v25 = vpop.permute.xlu2 %1906 }
0x1456   :  { %v1909_v40 = vmul.f32 %v1907_v25, %v1886_v46 }
0x1458   :  { %1911 = vrot.lane.b32.xlu1 %v1909_v40, %s3084_s19 }
0x1475   :  { %v2074_v24 = vpop.permute.xlu0 %2073 }
0x1476   :  { %v2076_v18 = vmul.f32 %v2074_v24, %v4434_v6 }
0x1478   :  { %2078 = vrot.lane.b32.xlu2 %v2076_v18, %s3085_s21 }
0x147d   :  { %v2288_v26 = vpop.permute.xlu0 %2287 }
0x147e   :  { %v2290_v44 = vmul.f32 %v2288_v26, %v2267_v22 }
0x1480   :  { %2292 = vrot.lane.b32.xlu1 %v2290_v44, %s3084_s19 }
0x14ca   :  { %v1912_v53 = vpop.permute.xlu1 %1911 }
0x14cb   :  { %v4440_v55 = vadd.f32 %v1912_v53, %v1904_v5 }
0x14cd   :  { %2897 = vtanh.f32 %v4440_v55 }
0x14d2   :  { %v2079_v31 = vpop.permute.xlu2 %2078 }
0x14d3   :  { %v2898_v56 = vpop.eup %2897  ;;  %v4445_v8 = vadd.f32 %v2079_v31, %v2071_v36 }
0x14d4   :  { %1917 = vrot.lane.b32.xlu2 %v2898_v56, %s3084_s19 }
0x14d5   :  { %2899 = vtanh.f32 %v4445_v8 }
0x14db   :  { %v2900_v12 = vpop.eup %2899 }
0x14dc   :  { %2084 = vrot.lane.b32.xlu0 %v2900_v12, %s3085_s21 }
0x14f2   :  { %v2293_v30 = vpop.permute.xlu1 %2292 }
0x14f3   :  { %v2295_v14 = vadd.f32 %v2293_v30, %v2285_v15 }
0x14f5   :  { %2901 = vtanh.f32 %v2295_v14 }
0x14f6   :  { %2903 = vpow2.f32 %v2647_v19 }
0x14fb   :  { %v2902_v32 = vpop.eup %2901 }
0x14fc   :  { %2298 = vrot.lane.b32.xlu0 %v2902_v32, %s3084_s19  ;;  %v2904_v62 = vpop.eup %2903 }
0x14fd   :  { %v1872_v38 = vadd.f32 1.0, %v2904_v62 }
0x14ff   :  { %2905 = vrcp.f32 %v1872_v38  ;;  %v1899_v16 = vand.u32 2147483648, %v1872_v38  ;;  %vm1893_vm3 = vweird.f32 %v1872_v38  ;;  %v1897_v54 = vand.u32 2147483647, %v1872_v38 }
0x1500   :  { %2907 = vpow2.f32 %v2661_v20 }
0x1501   :  { %v1900_v0 = vor.u32 1.1754944e-38, %v1899_v16  ;;  %vm1898_vm5 = vcmp.eq.f32.partialorder %v1897_v54, 8.507059e+37 }
0x1505   :  { %v2906_v37 = vpop.eup %2905 }
0x1506   :  { %v1889_v33 = vmul.f32 %v2906_v37, %v1872_v38  ;;  %vm1894_vm2 = vweird.f32 %v2906_v37  ;;  %v2908_v29 = vpop.eup %2907 }
0x1507   :  { %vm1895_vm4 = vmor %vm1893_vm3, %vm1894_vm2  ;;  %v2253_v46 = vadd.f32 1.0, %v2908_v29 }
0x1508   :  { %v1890_v42 = vsub.f32 1.0, %v1889_v33 }
0x1509   :  { %2909 = vrcp.f32 %v2253_v46  ;;  %v2280_v4 = vand.u32 2147483648, %v2253_v46  ;;  %vm2274_vm7 = vweird.f32 %v2253_v46  ;;  %v2278_v11 = vand.u32 2147483647, %v2253_v46 }
0x150a   :  { %v1891_v60 = vmul.f32 %v2906_v37, %v1890_v42 }
0x150b   :  { %v2281_v45 = vor.u32 1.1754944e-38, %v2280_v4  ;;  %vm2279_vm9 = vcmp.eq.f32.partialorder %v2278_v11, 8.507059e+37 }
0x150c   :  { %v1892_v35 = vadd.f32 %v2906_v37, %v1891_v60 }
0x150e   :  { %v1896_v58 = vsel %vm1895_vm4, %v2906_v37, %v1892_v35 }
0x150f   :  { %v1901_v52 = vsel %vm1898_vm5, %v1900_v0, %v1896_v58  ;;  %v2910_v28 = vpop.eup %2909 }
0x1510   :  { %v2270_v23 = vmul.f32 %v2910_v28, %v2253_v46  ;;  %vm2275_vm6 = vweird.f32 %v2910_v28 }
0x1511   :  { %vm2276_vm8 = vmor %vm2274_vm7, %vm2275_vm6 }
0x1512   :  { %v2271_v49 = vsub.f32 1.0, %v2270_v23 }
0x1514   :  { %v2272_v27 = vmul.f32 %v2910_v28, %v2271_v49 }
0x1516   :  { %v2273_v21 = vadd.f32 %v2910_v28, %v2272_v27 }
0x1518   :  { %v2277_v13 = vsel %vm2276_vm8, %v2910_v28, %v2273_v21 }
0x1519   :  { %v2282_v59 = vsel %vm2279_vm9, %v2281_v45, %v2277_v13 }
0x152e   :  { %v1918_v9 = vpop.permute.xlu2 %1917 }
0x152f   :  { %v1920_v57 = vmul.f32 %v1918_v9, %v1901_v52 }
0x1531   :  { %1922 = vst.msk [vmem:[#allocation3 + $0x28] sm:$0xff] %vm270_vm10, %v1920_v57  ;;  %2093 = vrot.lane.b32.xlu2 %v1920_v57, %s3085_s21 }
0x1538   :  { %v2478_v34 = vld [vmem:[#allocation3 + $0x28] sm:$0xff] }
0x1539   :  { %2673 = vmatmul.msk.f32.gmra.mxu2 %vm270_vm10, %v2478_v34 }
0x154e   :  { %v2085_v25 = vpop.permute.xlu0 %2084 }
0x154f   :  { %v2087_v40 = vmul.f32 %v2085_v25, %v4434_v6 }
0x1551   :  { %2089 = vrot.lane.b32.xlu1 %v2087_v40, %s3084_s19 }
0x156e   :  { %v2299_v63 = vpop.permute.xlu0 %2298 }
0x156f   :  { %v2301_v48 = vmul.f32 %v2299_v63, %v2282_v59 }
0x1571   :  { %v2302_v7 = vsel %vm270_vm10, %v2301_v48, %v2087_v40 }
0x158b   :  { %v2094_v41 = vpop.permute.xlu2 %2093 }
0x15bc   :  { %v2549_v51 = vpop.f32.mrf.mxu2 }
0x15bd   :  { %v2550_v47 = vadd.f32 %v4403_v10, %v2549_v51 }
0x15bf   :  { %2563 = vst.msk [vmem:[%s4522_s10 + $0x28] sm:$0xff] %vm86_vm1, %v2550_v47 }
0x15c3   :  { %v2090_v24 = vpop.permute.xlu1 %2089 }
0x15c4   :  { %v2096_v6 = vsel %vm441_vm0, %v2090_v24, %v2094_v41 }
0x15c5   :  { %2654 = vmatmul.msk.f32.vlgmr.msrb.gmra.mxu3 %vm376_vm11, %v2096_v6  ;;  %2655 = vmatmul.msk.f32.vlgmr.msrb.gmra.mxu0 %vm376_vm11, %v2096_v6 }
0x15cd   :  { %2662 = vmatmul.msk.f32.vlgmr.msra.gmra.mxu3 %vm376_vm11, %v2302_v7 }
0x1642   :  { %v2137_v18 = vpop.f32.mrf.mxu0 }
0x1643   :  { %v4470_v1 = vadd.f32 %v2137_v18, %v3566_v50 }
0x1645   :  { %2911 = vtanh.f32 %v4470_v1  ;;  %v2657_v4 = vmul.f32 -1.442695, %v4470_v1 }
0x1648   :  { %v2117_v3 = vpop.f32.mrf.mxu3 }
0x1649   :  { %v2118_v44 = vadd.f32 %v2117_v3, %v3577_v17 }
0x164b   :  { %v2912_v61 = vpop.eup %2911  ;;  %v2656_v53 = vmul.f32 -1.442695, %v2118_v44 }
0x164c   :  { %2181 = vrot.lane.b32.xlu1 %v2912_v61, %s3084_s19 }
0x1650   :  { %v2323_v2 = vpop.f32.mrf.mxu3 }
0x1651   :  { %v2324_v43 = vadd.f32 %v4289_v39, %v2323_v2 }
0x1653   :  { %2913 = vtanh.f32 %v2324_v43  ;;  %v2663_v26 = vmul.f32 -1.442695, %v2324_v43 }
0x1655   :  { %2915 = vpow2.f32 %v2663_v26 }
0x1656   :  { %2917 = vpow2.f32 %v2656_v53 }
0x1659   :  { %v2914_v22 = vpop.eup %2913 }
0x165a   :  { %2348 = vrot.lane.b32.xlu2 %v2914_v22, %s3085_s21 }
0x165b   :  { %v2916_v5 = vpop.eup %2915 }
0x165c   :  { %v2329_v36 = vadd.f32 1.0, %v2916_v5  ;;  %v2918_v31 = vpop.eup %2917 }
0x165d   :  { %v2146_v12 = vadd.f32 1.0, %v2918_v31 }
0x165e   :  { %2919 = vrcp.f32 %v2329_v36  ;;  %v2341_v62 = vand.u32 2147483648, %v2329_v36  ;;  %vm2335_vm13 = vweird.f32 %v2329_v36  ;;  %v2339_v38 = vand.u32 2147483647, %v2329_v36 }
0x165f   :  { %2921 = vrcp.f32 %v2146_v12  ;;  %v2159_v0 = vand.u32 2147483648, %v2146_v12  ;;  %vm2153_vm3 = vweird.f32 %v2146_v12  ;;  %v2157_v52 = vand.u32 2147483647, %v2146_v12 }
0x1660   :  { %v2342_v42 = vor.u32 1.1754944e-38, %v2341_v62  ;;  %vm2340_vm15 = vcmp.eq.f32.partialorder %v2339_v38, 8.507059e+37 }
0x1661   :  { %v2160_v57 = vor.u32 1.1754944e-38, %v2159_v0  ;;  %vm2158_vm5 = vcmp.eq.f32.partialorder %v2157_v52, 8.507059e+37 }
0x1664   :  { %v2920_v56 = vpop.eup %2919 }
0x1665   :  { %v2331_v15 = vmul.f32 %v2920_v56, %v2329_v36  ;;  %v2922_v39 = vpop.eup %2921  ;;  %vm2336_vm12 = vweird.f32 %v2920_v56 }
0x1666   :  { %v2149_v32 = vmul.f32 %v2922_v39, %v2146_v12  ;;  %vm2337_vm14 = vmor %vm2335_vm13, %vm2336_vm12  ;;  %vm2154_vm2 = vweird.f32 %v2922_v39 }
0x1667   :  { %v2332_v30 = vsub.f32 1.0, %v2331_v15  ;;  %vm2155_vm4 = vmor %vm2153_vm3, %vm2154_vm2 }
0x1668   :  { %v2150_v37 = vsub.f32 1.0, %v2149_v32 }
0x1669   :  { %v2333_v14 = vmul.f32 %v2920_v56, %v2332_v30 }
0x166a   :  { %v2151_v60 = vmul.f32 %v2922_v39, %v2150_v37 }
0x166b   :  { %v2334_v19 = vadd.f32 %v2920_v56, %v2333_v14 }
0x166c   :  { %v2152_v58 = vadd.f32 %v2922_v39, %v2151_v60 }
0x166d   :  { %v2338_v33 = vsel %vm2337_vm14, %v2920_v56, %v2334_v19 }
0x166e   :  { %v2343_v16 = vsel %vm2340_vm15, %v2342_v42, %v2338_v33  ;;  %v2156_v9 = vsel %vm2155_vm4, %v2922_v39, %v2152_v58 }
0x166f   :  { %v2161_v20 = vsel %vm2158_vm5, %v2160_v57, %v2156_v9  ;;  %v2346_v25 = vmul.f32 %v2343_v16, %v4445_v8 }
0x1670   :  { %v2179_v23 = vmul.f32 %v2161_v20, %v4440_v55 }
0x16b4   :  { %v2349_v35 = vpop.permute.xlu2 %2348 }
0x16b5   :  { %v2351_v54 = vmul.f32 %v2349_v35, %v2343_v16 }
0x16b7   :  { %2353 = vrot.lane.b32.xlu1 %v2351_v54, %s3085_s21 }
0x16be   :  { %v2182_v34 = vpop.permute.xlu1 %2181 }
0x16bf   :  { %v2184_v29 = vmul.f32 %v2182_v34, %v2161_v20 }
0x16c1   :  { %2186 = vrot.lane.b32.xlu0 %v2184_v29, %s3084_s19 }
0x1729   :  { %v2354_v46 = vpop.permute.xlu1 %2353 }
0x172a   :  { %v2356_v40 = vadd.f32 %v2354_v46, %v2346_v25 }
0x172c   :  { %2923 = vtanh.f32 %v2356_v40 }
0x1732   :  { %v2924_v28 = vpop.eup %2923 }
0x1733   :  { %2359 = vrot.lane.b32.xlu0 %v2924_v28, %s3085_s21  ;;  %v2187_v49 = vpop.permute.xlu0 %2186 }
0x1734   :  { %v4482_v27 = vadd.f32 %v2187_v49, %v2179_v23 }
0x1736   :  { %2925 = vtanh.f32 %v4482_v27 }
0x1737   :  { %2927 = vpow2.f32 %v2657_v4 }
0x173c   :  { %v2926_v21 = vpop.eup %2925 }
0x173d   :  { %2192 = vrot.lane.b32.xlu2 %v2926_v21, %s3084_s19  ;;  %v2928_v8 = vpop.eup %2927 }
0x173e   :  { %v2147_v11 = vadd.f32 1.0, %v2928_v8 }
0x1740   :  { %2929 = vrcp.f32 %v2147_v11  ;;  %v2174_v48 = vand.u32 2147483648, %v2147_v11  ;;  %vm2168_vm7 = vweird.f32 %v2147_v11  ;;  %v2172_v7 = vand.u32 2147483647, %v2147_v11 }
0x1742   :  { %v2175_v47 = vor.u32 1.1754944e-38, %v2174_v48  ;;  %vm2173_vm9 = vcmp.eq.f32.partialorder %v2172_v7, 8.507059e+37 }
0x1746   :  { %v2930_v13 = vpop.eup %2929 }
0x1747   :  { %v2164_v45 = vmul.f32 %v2930_v13, %v2147_v11  ;;  %vm2169_vm6 = vweird.f32 %v2930_v13 }
0x1748   :  { %vm2170_vm8 = vmor %vm2168_vm7, %vm2169_vm6 }
0x1749   :  { %v2165_v59 = vsub.f32 1.0, %v2164_v45 }
0x174b   :  { %v2166_v55 = vmul.f32 %v2930_v13, %v2165_v59 }
0x174d   :  { %v2167_v63 = vadd.f32 %v2930_v13, %v2166_v55 }
0x174f   :  { %v2171_v51 = vsel %vm2170_vm8, %v2930_v13, %v2167_v63 }
0x1750   :  { %v2176_v41 = vsel %vm2173_vm9, %v2175_v47, %v2171_v51 }
0x1797   :  { %v2193_v24 = vpop.permute.xlu2 %2192 }
0x1798   :  { %v2195_v6 = vmul.f32 %v2193_v24, %v2176_v41 }
0x179a   :  { %2197 = vst.msk [vmem:[#allocation3 + $0x30] sm:$0xff] %vm270_vm10, %v2195_v6  ;;  %2368 = vrot.lane.b32.xlu2 %v2195_v6, %s3085_s21 }
0x17a1   :  { %v2479_v18 = vld [vmem:[#allocation3 + $0x30] sm:$0xff] }
0x17a2   :  { %2674 = vmatmul.msk.f32.gmra.mxu2 %vm270_vm10, %v2479_v18 }
0x17a5   :  { %v2360_v1 = vpop.permute.xlu0 %2359 }
0x17a6   :  { %v2362_v3 = vmul.f32 %v2360_v1, %v2343_v16 }
0x17a8   :  { %2364 = vrot.lane.b32.xlu1 %v2362_v3, %s3084_s19 }
0x17f4   :  { %v2369_v61 = vpop.permute.xlu2 %2368 }
0x181a   :  { %v2365_v2 = vpop.permute.xlu1 %2364 }
0x181b   :  { %v2371_v43 = vsel %vm441_vm0, %v2365_v2, %v2369_v61 }
0x181c   :  { %2664 = vmatmul.msk.f32.vlgmr.msra.gmra.mxu0 %vm376_vm11, %v2371_v43  ;;  %2665 = vmatmul.msk.f32.vlgmr.msra.gmra.mxu1 %vm376_vm11, %v2371_v43 }
0x1825   :  { %v2552_v22 = vpop.f32.mrf.mxu2 }
0x1826   :  { %v2553_v26 = vadd.f32 %v4403_v10, %v2552_v22 }
0x1828   :  { %2564 = vst.msk [vmem:[%s4522_s10 + $0x30] sm:$0xff] %vm86_vm1, %v2553_v26 }
0x1899   :  { %v2412_v44 = vpop.f32.mrf.mxu1  ;;  %v2392_v36 = vpop.f32.mrf.mxu0 }
0x189a   :  { %v2413_v5 = vadd.f32 %v2412_v44, %v3566_v50  ;;  %v2393_v31 = vadd.f32 %v2392_v36, %v3577_v17 }
0x189c   :  { %2931 = vtanh.f32 %v2413_v5  ;;  %v2666_v56 = vmul.f32 -1.442695, %v2393_v31  ;;  %v2667_v58 = vmul.f32 -1.442695, %v2413_v5 }
0x189e   :  { %2933 = vpow2.f32 %v2666_v56 }
0x18a2   :  { %v2932_v53 = vpop.eup %2931 }
0x18a3   :  { %2456 = vrot.lane.b32.xlu0 %v2932_v53, %s3084_s19 }
0x18a4   :  { %v2934_v12 = vpop.eup %2933 }
0x18a5   :  { %v2421_v15 = vadd.f32 1.0, %v2934_v12 }
0x18a7   :  { %2935 = vrcp.f32 %v2421_v15  ;;  %v2434_v62 = vand.u32 2147483648, %v2421_v15  ;;  %vm2428_vm0 = vweird.f32 %v2421_v15  ;;  %v2432_v50 = vand.u32 2147483647, %v2421_v15 }
0x18a9   :  { %v2435_v37 = vor.u32 1.1754944e-38, %v2434_v62  ;;  %vm2433_vm13 = vcmp.eq.f32.partialorder %v2432_v50, 8.507059e+37 }
0x18ad   :  { %v2936_v30 = vpop.eup %2935 }
0x18ae   :  { %v2424_v39 = vmul.f32 %v2936_v30, %v2421_v15  ;;  %vm2429_vm11 = vweird.f32 %v2936_v30 }
0x18af   :  { %vm2430_vm12 = vmor %vm2428_vm0, %vm2429_vm11 }
0x18b0   :  { %v2425_v14 = vsub.f32 1.0, %v2424_v39 }
0x18b2   :  { %v2426_v32 = vmul.f32 %v2936_v30, %v2425_v14 }
0x18b4   :  { %v2427_v19 = vadd.f32 %v2936_v30, %v2426_v32 }
0x18b6   :  { %v2431_v38 = vsel %vm2430_vm12, %v2936_v30, %v2427_v19 }
0x18b7   :  { %v2436_v17 = vsel %vm2433_vm13, %v2435_v37, %v2431_v38 }
0x18b8   :  { %v2454_v60 = vmul.f32 %v2436_v17, %v4482_v27 }
0x1915   :  { %v2457_v33 = vpop.permute.xlu0 %2456 }
0x1916   :  { %v2459_v42 = vmul.f32 %v2457_v33, %v2436_v17 }
0x1918   :  { %2461 = vrot.lane.b32.xlu1 %v2459_v42, %s3084_s19 }
0x198a   :  { %v2462_v35 = vpop.permute.xlu1 %2461 }
0x198b   :  { %v2464_v16 = vadd.f32 %v2462_v35, %v2454_v60 }
0x198d   :  { %2937 = vtanh.f32 %v2464_v16 }
0x198e   :  { %2939 = vpow2.f32 %v2667_v58 }
0x1993   :  { %v2938_v54 = vpop.eup %2937 }
0x1994   :  { %2467 = vrot.lane.b32.xlu2 %v2938_v54, %s3084_s19  ;;  %v2940_v0 = vpop.eup %2939 }
0x1995   :  { %v2422_v52 = vadd.f32 1.0, %v2940_v0 }
0x1997   :  { %2941 = vrcp.f32 %v2422_v52  ;;  %v2449_v25 = vand.u32 2147483648, %v2422_v52  ;;  %vm2443_vm15 = vweird.f32 %v2422_v52  ;;  %v2447_v46 = vand.u32 2147483647, %v2422_v52 }
0x1999   :  { %v2450_v28 = vor.u32 1.1754944e-38, %v2449_v25  ;;  %vm2448_vm3 = vcmp.eq.f32.partialorder %v2447_v46, 8.507059e+37 }
0x199d   :  { %v2942_v9 = vpop.eup %2941 }
0x199e   :  { %v2439_v57 = vmul.f32 %v2942_v9, %v2422_v52  ;;  %vm2444_vm14 = vweird.f32 %v2942_v9 }
0x199f   :  { %vm2445_vm2 = vmor %vm2443_vm15, %vm2444_vm14 }
0x19a0   :  { %v2440_v34 = vsub.f32 1.0, %v2439_v57 }
0x19a2   :  { %v2441_v20 = vmul.f32 %v2942_v9, %v2440_v34 }
0x19a4   :  { %v2442_v29 = vadd.f32 %v2942_v9, %v2441_v20 }
0x19a6   :  { %v2446_v40 = vsel %vm2445_vm2, %v2942_v9, %v2442_v29 }
0x19a7   :  { %v2451_v23 = vsel %vm2448_vm3, %v2450_v28, %v2446_v40 }
0x19ee   :  { %v2468_v49 = vpop.permute.xlu2 %2467 }
0x19ef   :  { %v2470_v27 = vmul.f32 %v2468_v49, %v2451_v23 }
0x19f1   :  { %2472 = vst.msk [vmem:[#allocation3 + $0x38] sm:$0xff] %vm270_vm10, %v2470_v27 }
0x19f8   :  { %v2480_v21 = vld [vmem:[#allocation3 + $0x38] sm:$0xff] }
0x19f9   :  { %2675 = vmatmul.msk.f32.gmra.mxu2 %vm270_vm10, %v2480_v21 }
0x1a7c   :  { %v2555_v4 = vpop.f32.mrf.mxu2 }
0x1a7d   :  { %v2556_v8 = vadd.f32 %v4403_v10, %v2555_v4 }
0x1a7f   :  { %2565 = vst.msk [vmem:[%s4522_s10 + $0x38] sm:$0xff] %vm86_vm1, %v2556_v8 }
0x1a80   :  { %2570 = vsyncpa [#allocation5], 1 }
0x1a81   :  { %2571 = vsyncpa [#allocation7], 1 }

</bundles_post_ra>
